<compile_context>
chip_gen: v7x
topology: tpu7x:2x2x1
jax: 0.10.0
libtpu: 0.0.40
codegen_flags: <defaults>
</compile_context>

<pallas_src>
import jax
import jax.numpy as jnp
from jax.experimental import pallas as pl
from jax.experimental.pallas import tpu as pltpu


def _default_h_blocks(H):
    """Split H across grid steps only where it buys TensorCore parallelism.

    v7x has 2 TensorCores per chip; v5e/v6e have 1, where an extra grid step
    at batch 1 only adds per-step overhead.  Mis-detection is harmless (both
    paths are correct)."""
    try:
        kind = jax.devices()[0].device_kind.lower()
    except Exception:
        return 1
    if ("v7" in kind or "tpu7" in kind) and H % 2 == 0 and H >= 16:
        return 2
    return 1


def relu_conv2d(x_nchw, w_oihw, h_blocks=None):
    """Equivalent of Conv2d(Cin, Cout, 3, stride=1, padding=1, bias=False)(ReLU(x))."""
    N, Cin, H, W = x_nchw.shape
    Cout, Cin_w, KH, KW = w_oihw.shape
    assert (KH, KW) == (3, 3) and Cin_w == Cin

    # W padded to a sublane multiple with >= 1 zero column so the cyclic
    # output rolls emulate the spatial zero padding.
    Wp = ((W + 1 + 7) // 8) * 8

    if h_blocks is None:
        h_blocks = _default_h_blocks(H)
    nh = h_blocks if (h_blocks >= 1 and H % h_blocks == 0) else 1
    HB = H // nh

    dtype = x_nchw.dtype

    def kernel(x_ref, w_ref, o_ref, xpad_ref):
        # x_ref   : (H, W, Cin)        full-height NHWC activations (VMEM)
        # w_ref   : (KH*Cin, KW*Cout)  weights, rows grouped by kh, cols by kw
        # o_ref   : (HB, Wp, Cout)     this step's output rows (cols W:Wp junk)
        # xpad_ref: (HB+2, Wp, Cin)    zero-bordered, ReLU'd activation slab

        # ---- fused ReLU + zero padding (border only; interior overwritten) --
        if nh == 1:
            xpad_ref[0:1, :, :] = jnp.zeros((1, Wp, Cin), dtype)
            xpad_ref[H + 1:H + 2, :, :] = jnp.zeros((1, Wp, Cin), dtype)
            xpad_ref[1:H + 1, W:Wp, :] = jnp.zeros((H, Wp - W, Cin), dtype)
            xpad_ref[1:H + 1, 0:W, :] = jnp.maximum(x_ref[...], 0.0)
        else:
            hb = pl.program_id(1)
            # zero pad columns for every row (roll-wrap correctness needs this)
            xpad_ref[:, W:Wp, :] = jnp.zeros((HB + 2, Wp - W, Cin), dtype)

            @pl.when(hb == 0)
            def _():
                xpad_ref[0:1, 0:W, :] = jnp.zeros((1, W, Cin), dtype)
                xpad_ref[1:HB + 2, 0:W, :] = jnp.maximum(
                    x_ref[0:HB + 1, :, :], 0.0)

            @pl.when(hb == nh - 1)
            def _():
                xpad_ref[HB + 1:HB + 2, 0:W, :] = jnp.zeros((1, W, Cin), dtype)
                xpad_ref[0:HB + 1, 0:W, :] = jnp.maximum(
                    x_ref[H - HB - 1:H, :, :], 0.0)

            if nh > 2:
                @pl.when(jnp.logical_and(hb > 0, hb < nh - 1))
                def _():
                    h0 = hb * HB
                    xpad_ref[0:HB + 2, 0:W, :] = jnp.maximum(
                        x_ref[pl.ds(h0 - 1, HB + 2), :, :], 0.0)

        # ---- 3 MXU matmuls (one per kernel row), accumulated in f32 ---------
        # Each LHS is a free row-shifted view of xpad (Wp multiple of 8).
        acc = None
        for kh in range(KH):
            lhs = xpad_ref[kh:kh + HB, :, :].reshape(HB * Wp, Cin)
            y = jnp.dot(lhs, w_ref[kh * Cin:(kh + 1) * Cin, :],
                        preferred_element_type=jnp.float32)
            acc = y if acc is None else acc + y

        # acc[:, kw*Cout:(kw+1)*Cout] holds kernel-column kw (dw = kw-1)
        # evaluated at un-shifted W positions; shift the 32-lane outputs along
        # W (XLU).  The cyclic wrap only ever reads the all-zero pad columns.
        y_l = acc[:, 0:Cout].reshape(HB, Wp, Cout)              # kw=0, dw=-1
        y_c = acc[:, Cout:2 * Cout].reshape(HB, Wp, Cout)       # kw=1, dw= 0
        y_r = acc[:, 2 * Cout:3 * Cout].reshape(HB, Wp, Cout)   # kw=2, dw=+1
        out = (y_c
               + pltpu.roll(y_l, shift=1, axis=1)
               + pltpu.roll(y_r, shift=Wp - 1, axis=1))
        o_ref[...] = out.astype(o_ref.dtype)

    # NCHW -> NHWC; OIHW -> (KH*Cin, KW*Cout) with rows grouped by kh and
    # columns grouped by kw.  XLA glue kept outside the kernel.
    x_nhwc = jnp.transpose(x_nchw, (0, 2, 3, 1))
    w2d = jnp.transpose(w_oihw, (2, 1, 3, 0)).reshape(KH * Cin, KW * Cout)

    out = pl.pallas_call(
        kernel,
        out_shape=jax.ShapeDtypeStruct((N, H, Wp, Cout), dtype),
        grid=(N, nh),
        in_specs=[
            # full-height input block; same block index for all hb steps so it
            # is not re-DMAed within a batch element (only 0.4 MB anyway).
            pl.BlockSpec((None, H, W, Cin), lambda n, hb: (n, 0, 0, 0)),
            pl.BlockSpec((KH * Cin, KW * Cout), lambda n, hb: (0, 0)),  # resident
        ],
        out_specs=pl.BlockSpec((None, HB, Wp, Cout),
                               lambda n, hb: (n, hb, 0, 0)),
        scratch_shapes=[
            pltpu.VMEM((HB + 2, Wp, Cin), dtype),   # padded + ReLU'd slab
        ],
        compiler_params=pltpu.CompilerParams(
            dimension_semantics=("parallel", "parallel"),
        ),
    )(x_nhwc, w2d)

    # drop the padded columns, back to PyTorch's NCHW
    return jnp.transpose(out[:, :, :W, :], (0, 3, 1, 2))


if __name__ == "__main__":
    key = jax.random.PRNGKey(0)
    kx, kw = jax.random.split(key)

    # Shapes from the module: x77 = randn(1, 128, 28, 28), conv 128 -> 32, 3x3.
    N, Cin, H, W = 1, 128, 28, 28
    Cout, KH, KW = 32, 3, 3

    x = jax.random.normal(kx, (N, Cin, H, W), dtype=jnp.float32)
    # deterministic Kaiming-uniform-style init (like torch Conv2d default)
    fan_in = Cin * KH * KW
    bound = (1.0 / fan_in) ** 0.5
    w = jax.random.uniform(kw, (Cout, Cin, KH, KW),
                           minval=-bound, maxval=bound, dtype=jnp.float32)

    fwd = jax.jit(relu_conv2d)
    out = jax.block_until_ready(fwd(x, w))

    # sanity check against XLA's reference conv (ReLU applied first)
    ref = jax.lax.conv_general_dilated(
        jnp.maximum(x, 0.0), w,
        window_strides=(1, 1), padding=((1, 1), (1, 1)),
        dimension_numbers=("NCHW", "OIHW", "NCHW"),
    )
    assert out.shape == (N, Cout, H, W)
    err = float(jnp.max(jnp.abs(out - ref)))
    assert jnp.allclose(out, ref, atol=1e-4, rtol=1e-4), err

    print("KERNEL_OK")
</pallas_src>

<mosaic_0001>
module attributes {stable_mosaic.version = 11 : i64} {
  func.func @kernel(%arg0: i32, %arg1: i32, %arg2: memref<1x28x28x128xf32, #tpu.memory_space<vmem>>, %arg3: memref<384x96xf32, #tpu.memory_space<vmem>>, %arg4: memref<1x28x32x32xf32, #tpu.memory_space<vmem>>, %arg5: memref<30x32x128xf32, #tpu.memory_space<vmem>>) attributes {dimension_semantics = [#tpu.dimension_semantics<parallel>, #tpu.dimension_semantics<parallel>], iteration_bounds = array<i64: 1, 1>, scalar_prefetch = 0 : i64, scratch_operands = 1 : i64, tpu.core_type = #tpu.core_type<tc>, window_params = [{transform_indices = @transform_0, window_bounds = array<i64: 1, 28, 28, 128>}, {pipeline_mode = #tpu.pipeline_mode<synchronous>, transform_indices = @transform_1, window_bounds = array<i64: 384, 96>}, {transform_indices = @transform_2, window_bounds = array<i64: 1, 28, 32, 32>}]} {
    %cst = arith.constant 0.000000e+00 : f32
    %0 = vector.broadcast %cst : f32 to vector<1x32x128xf32>
    %c0 = arith.constant 0 : index
    %c0_0 = arith.constant 0 : index
    %c0_1 = arith.constant 0 : index
    %1 = vector.load %arg5[%c0, %c0_0, %c0_1] : memref<30x32x128xf32, #tpu.memory_space<vmem>>, vector<1x32x128xf32>
    tpu.vector_store %arg5[%c0, %c0_0, %c0_1], %0 {strides = array<i32>} : memref<30x32x128xf32, #tpu.memory_space<vmem>>, vector<1x32x128xf32>,
    %cst_2 = arith.constant 0.000000e+00 : f32
    %2 = vector.broadcast %cst_2 : f32 to vector<1x32x128xf32>
    %c29 = arith.constant 29 : index
    %c0_3 = arith.constant 0 : index
    %c0_4 = arith.constant 0 : index
    %3 = vector.load %arg5[%c29, %c0_3, %c0_4] : memref<30x32x128xf32, #tpu.memory_space<vmem>>, vector<1x32x128xf32>
    tpu.vector_store %arg5[%c29, %c0_3, %c0_4], %2 {strides = array<i32>} : memref<30x32x128xf32, #tpu.memory_space<vmem>>, vector<1x32x128xf32>,
    %cst_5 = arith.constant 0.000000e+00 : f32
    %4 = vector.broadcast %cst_5 : f32 to vector<28x4x128xf32>
    %c1 = arith.constant 1 : index
    %c28 = arith.constant 28 : index
    %c0_6 = arith.constant 0 : index
    %5 = vector.load %arg5[%c1, %c28, %c0_6] : memref<30x32x128xf32, #tpu.memory_space<vmem>>, vector<28x4x128xf32>
    tpu.vector_store %arg5[%c1, %c28, %c0_6], %4 {strides = array<i32>} : memref<30x32x128xf32, #tpu.memory_space<vmem>>, vector<28x4x128xf32>,
    %c0_7 = arith.constant 0 : index
    %c0_8 = arith.constant 0 : index
    %c0_9 = arith.constant 0 : index
    %c0_10 = arith.constant 0 : index
    %6 = vector.load %arg2[%c0_7, %c0_8, %c0_9, %c0_10] : memref<1x28x28x128xf32, #tpu.memory_space<vmem>>, vector<1x28x28x128xf32>
    %7 = vector.shape_cast %6 : vector<1x28x28x128xf32> to vector<28x28x128xf32>
    %cst_11 = arith.constant 0.000000e+00 : f32
    %8 = vector.broadcast %cst_11 : f32 to vector<28x28x128xf32>
    %9 = arith.maximumf %7, %8 : vector<28x28x128xf32>
    %c1_12 = arith.constant 1 : index
    %c0_13 = arith.constant 0 : index
    %c0_14 = arith.constant 0 : index
    %10 = vector.load %arg5[%c1_12, %c0_13, %c0_14] : memref<30x32x128xf32, #tpu.memory_space<vmem>>, vector<28x28x128xf32>
    tpu.vector_store %arg5[%c1_12, %c0_13, %c0_14], %9 {strides = array<i32>} : memref<30x32x128xf32, #tpu.memory_space<vmem>>, vector<28x28x128xf32>,
    %c0_15 = arith.constant 0 : index
    %c0_16 = arith.constant 0 : index
    %c0_17 = arith.constant 0 : index
    %11 = vector.load %arg5[%c0_15, %c0_16, %c0_17] : memref<30x32x128xf32, #tpu.memory_space<vmem>>, vector<28x32x128xf32>
    %12 = vector.shape_cast %11 : vector<28x32x128xf32> to vector<896x128xf32>
    %c0_18 = arith.constant 0 : index
    %c0_19 = arith.constant 0 : index
    %13 = vector.load %arg3[%c0_18, %c0_19] : memref<384x96xf32, #tpu.memory_space<vmem>>, vector<128x96xf32>
    %cst_20 = arith.constant dense<0.000000e+00> : vector<896x96xf32>
    %14 = tpu.matmul %12, %13, %cst_20 {dimension_numbers = #tpu.dot_dimension_numbers<[1], [0], [0], [1], [0, 0, 1, 1], [], []>} : vector<896x128xf32>, vector<128x96xf32>, vector<896x96xf32> -> vector<896x96xf32>
    %c1_21 = arith.constant 1 : index
    %c0_22 = arith.constant 0 : index
    %c0_23 = arith.constant 0 : index
    %15 = vector.load %arg5[%c1_21, %c0_22, %c0_23] : memref<30x32x128xf32, #tpu.memory_space<vmem>>, vector<28x32x128xf32>
    %16 = vector.shape_cast %15 : vector<28x32x128xf32> to vector<896x128xf32>
    %c128 = arith.constant 128 : index
    %c0_24 = arith.constant 0 : index
    %17 = vector.load %arg3[%c128, %c0_24] : memref<384x96xf32, #tpu.memory_space<vmem>>, vector<128x96xf32>
    %cst_25 = arith.constant dense<0.000000e+00> : vector<896x96xf32>
    %18 = tpu.matmul %16, %17, %cst_25 {dimension_numbers = #tpu.dot_dimension_numbers<[1], [0], [0], [1], [0, 0, 1, 1], [], []>} : vector<896x128xf32>, vector<128x96xf32>, vector<896x96xf32> -> vector<896x96xf32>
    %19 = arith.addf %14, %18 : vector<896x96xf32>
    %c2 = arith.constant 2 : index
    %c0_26 = arith.constant 0 : index
    %c0_27 = arith.constant 0 : index
    %20 = vector.load %arg5[%c2, %c0_26, %c0_27] : memref<30x32x128xf32, #tpu.memory_space<vmem>>, vector<28x32x128xf32>
    %21 = vector.shape_cast %20 : vector<28x32x128xf32> to vector<896x128xf32>
    %c256 = arith.constant 256 : index
    %c0_28 = arith.constant 0 : index
    %22 = vector.load %arg3[%c256, %c0_28] : memref<384x96xf32, #tpu.memory_space<vmem>>, vector<128x96xf32>
    %cst_29 = arith.constant dense<0.000000e+00> : vector<896x96xf32>
    %23 = tpu.matmul %21, %22, %cst_29 {dimension_numbers = #tpu.dot_dimension_numbers<[1], [0], [0], [1], [0, 0, 1, 1], [], []>} : vector<896x128xf32>, vector<128x96xf32>, vector<896x96xf32> -> vector<896x96xf32>
    %24 = arith.addf %19, %23 : vector<896x96xf32>
    %25 = vector.extract_strided_slice %24 {offsets = [0, 0], sizes = [896, 32], strides = [1, 1]} : vector<896x96xf32> to vector<896x32xf32>
    %26 = vector.shape_cast %25 : vector<896x32xf32> to vector<28x32x32xf32>
    %27 = vector.extract_strided_slice %24 {offsets = [0, 32], sizes = [896, 32], strides = [1, 1]} : vector<896x96xf32> to vector<896x32xf32>
    %28 = vector.shape_cast %27 : vector<896x32xf32> to vector<28x32x32xf32>
    %29 = vector.extract_strided_slice %24 {offsets = [0, 64], sizes = [896, 32], strides = [1, 1]} : vector<896x96xf32> to vector<896x32xf32>
    %30 = vector.shape_cast %29 : vector<896x32xf32> to vector<28x32x32xf32>
    %c1_i32 = arith.constant 1 : i32
    %31 = tpu.dynamic_rotate %26 by %c1_i32 dim 1 : vector<28x32x32xf32>, i32 -> vector<28x32x32xf32>
    %32 = arith.addf %28, %31 : vector<28x32x32xf32>
    %c31_i32 = arith.constant 31 : i32
    %33 = tpu.dynamic_rotate %30 by %c31_i32 dim 1 : vector<28x32x32xf32>, i32 -> vector<28x32x32xf32>
    %34 = arith.addf %32, %33 : vector<28x32x32xf32>
    %c0_30 = arith.constant 0 : index
    %c0_31 = arith.constant 0 : index
    %c0_32 = arith.constant 0 : index
    %c0_33 = arith.constant 0 : index
    %35 = vector.load %arg4[%c0_30, %c0_31, %c0_32, %c0_33] : memref<1x28x32x32xf32, #tpu.memory_space<vmem>>, vector<1x28x32x32xf32>
    %36 = vector.shape_cast %35 : vector<1x28x32x32xf32> to vector<28x32x32xf32>
    %37 = vector.shape_cast %34 : vector<28x32x32xf32> to vector<1x28x32x32xf32>
    tpu.vector_store %arg4[%c0_30, %c0_31, %c0_32, %c0_33], %37 {strides = array<i32>} : memref<1x28x32x32xf32, #tpu.memory_space<vmem>>, vector<1x28x32x32xf32>,
    return
  }
  func.func @transform_0(%arg0: i32, %arg1: i32) -> (i32, i32, i32, i32) {
    %c0_i32 = arith.constant 0 : i32
    %c0_i32_0 = arith.constant 0 : i32
    %c0_i32_1 = arith.constant 0 : i32
    %c0_i32_2 = arith.constant 0 : i32
    return %arg0, %c0_i32, %c0_i32_0, %c0_i32_1 : i32, i32, i32, i32
  }
  func.func @transform_1(%arg0: i32, %arg1: i32) -> (i32, i32) {
    %c0_i32 = arith.constant 0 : i32
    %c0_i32_0 = arith.constant 0 : i32
    %c0_i32_1 = arith.constant 0 : i32
    return %c0_i32, %c0_i32_0 : i32, i32
  }
  func.func @transform_2(%arg0: i32, %arg1: i32) -> (i32, i32, i32, i32) {
    %c0_i32 = arith.constant 0 : i32
    %c0_i32_0 = arith.constant 0 : i32
    %c0_i32_1 = arith.constant 0 : i32
    return %arg0, %arg1, %c0_i32, %c0_i32_0 : i32, i32, i32, i32
  }
}

</mosaic_0001>

<bundles_post_ra>
// kernel: relu_conv2d.1
= control target key start
LH: loop header
LB: loop body
LE: loop exit
PB: predicated region body
PF: predicated region fallthrough
CT: control target
= control target key end

     0   :  { %v10914_v3 = vmov 0.0   ;;  %s6676_s18 = smov 32   ;;  %s6677_s19 = smov 96   ;;  %vm5225_vm2 = vcmask 261120   ;;  %s10908_s1 = inlined_call_operand.vmem [shape: f32[384,96], index: 1, kind: input, shape index: {}]   ;;  %s10909_s0 = inlined_call_operand.vmem [shape: f32[1,28,28,128], index: 0, kind: input, shape index: {}]   ;;  %s10910_s2 = inlined_call_operand.vmem [shape: f32[1,28,32,32], index: 2, kind: output, shape index: {}]  }
   0x1   :  { %v625_v0 = vld [vmem:[%s10908_s1 + $0x80] sm:$0xff]  ;;  %v626_v1 = vld [vmem:[%s10908_s1 + $0x88] sm:$0xff]  ;;  %11 = vst [vmem:[#allocation2] sm:$0xff] %v10914_v3  ;;  %5958 = vmatprep.mubr.f32.mxu0 %v10914_v3  ;;  %21 = vst [vmem:[#allocation2 + $0x3c] sm:$0xf] %v10914_v3 }
   0x2   :  { %v497_v2 = vld [vmem:[%s10908_s1] sm:$0xff]  ;;  %22 = vst [vmem:[#allocation2 + $0x5c] sm:$0xf] %v10914_v3  ;;  %23 = vst [vmem:[#allocation2 + $0x7c] sm:$0xf] %v10914_v3  ;;  %v6326_v4 = vpack.c.bf16 %v626_v1, %v625_v0  ;;  %v498_v5 = vld [vmem:[%s10908_s1 + $0x8] sm:$0xff] }
   0x3   :  { %24 = vst [vmem:[#allocation2 + $0x9c] sm:$0xf] %v10914_v3  ;;  %25 = vst [vmem:[#allocation2 + $0xbc] sm:$0xf] %v10914_v3  ;;  %v627_v6 = vld [vmem:[%s10908_s1 + $0x90] sm:$0xff]  ;;  %v628_v7 = vld [vmem:[%s10908_s1 + $0x98] sm:$0xff]  ;;  %v6741_v8 = vpack.c.bf16 %v498_v5, %v497_v2 }
   0x4   :  { %26 = vst [vmem:[#allocation2 + $0xdc] sm:$0xf] %v10914_v3  ;;  %27 = vst [vmem:[#allocation2 + $0xfc] sm:$0xf] %v10914_v3  ;;  %v6330_v9 = vpack.c.bf16 %v628_v7, %v627_v6  ;;  %v499_v10 = vld [vmem:[%s10908_s1 + $0x10] sm:$0xff]  ;;  %v500_v11 = vld [vmem:[%s10908_s1 + $0x18] sm:$0xff]  ;;  %6327 = vmatprep.subr.bf16.mxu1 %v6326_v4 }
   0x5   :  { %28 = vst [vmem:[#allocation2 + $0x11c] sm:$0xf] %v10914_v3  ;;  %29 = vst [vmem:[#allocation2 + $0x13c] sm:$0xf] %v10914_v3  ;;  %v629_v12 = vld [vmem:[%s10908_s1 + $0xa0] sm:$0xff]  ;;  %v6752_v13 = vpack.c.bf16 %v500_v11, %v499_v10  ;;  %v630_v14 = vld [vmem:[%s10908_s1 + $0xa8] sm:$0xff]  ;;  %6359 = vmatprep.subr.bf16.mxu0 %v6741_v8  ;;  %6329 = vmatpush3.bf16.msra.mxu1 %v6326_v4 }
   0x6   :  { %30 = vst [vmem:[#allocation2 + $0x15c] sm:$0xf] %v10914_v3  ;;  %31 = vst [vmem:[#allocation2 + $0x17c] sm:$0xf] %v10914_v3  ;;  %v501_v15 = vld [vmem:[%s10908_s1 + $0x20] sm:$0xff]  ;;  %v502_v16 = vld [vmem:[%s10908_s1 + $0x28] sm:$0xff]  ;;  %6361 = vmatpush3.bf16.msra.mxu0 %v6741_v8  ;;  %6331 = vmatprep.subr.bf16.mxu1 %v6330_v9  ;;  %v6334_v17 = vpack.c.bf16 %v630_v14, %v629_v12 }
   0x7   :  { %32 = vst [vmem:[#allocation2 + $0x19c] sm:$0xf] %v10914_v3  ;;  %33 = vst [vmem:[#allocation2 + $0x1bc] sm:$0xf] %v10914_v3  ;;  %6363 = vmatprep.subr.bf16.mxu0 %v6752_v13  ;;  %v6766_v18 = vpack.c.bf16 %v502_v16, %v501_v15  ;;  %v631_v19 = vld [vmem:[%s10908_s1 + $0xb0] sm:$0xff]  ;;  %v632_v20 = vld [vmem:[%s10908_s1 + $0xb8] sm:$0xff] }
   0x8   :  { %34 = vst [vmem:[#allocation2 + $0x1dc] sm:$0xf] %v10914_v3  ;;  %35 = vst [vmem:[#allocation2 + $0x1fc] sm:$0xf] %v10914_v3  ;;  %v503_v21 = vld [vmem:[%s10908_s1 + $0x30] sm:$0xff]  ;;  %v504_v22 = vld [vmem:[%s10908_s1 + $0x38] sm:$0xff]  ;;  %v6338_v23 = vpack.c.bf16 %v632_v20, %v631_v19 }
   0x9   :  { %36 = vst [vmem:[#allocation2 + $0x21c] sm:$0xf] %v10914_v3  ;;  %37 = vst [vmem:[#allocation2 + $0x23c] sm:$0xf] %v10914_v3  ;;  %6333 = vmatpush3.bf16.msra.mxu1 %v6330_v9  ;;  %v6782_v24 = vpack.c.bf16 %v504_v22, %v503_v21  ;;  %v633_v25 = vld [vmem:[%s10908_s1 + $0xc0] sm:$0xff]  ;;  %v634_v26 = vld [vmem:[%s10908_s1 + $0xc8] sm:$0xff] }
   0xa   :  { %38 = vst [vmem:[#allocation2 + $0x25c] sm:$0xf] %v10914_v3  ;;  %39 = vst [vmem:[#allocation2 + $0x27c] sm:$0xf] %v10914_v3  ;;  %6365 = vmatpush3.bf16.msra.mxu0 %v6752_v13  ;;  %6335 = vmatprep.subr.bf16.mxu1 %v6334_v17  ;;  %v6793_v27 = vld [vmem:[%s10909_s0] sm:$0xff]  ;;  %v506_v29 = vld [vmem:[%s10908_s1 + $0x48] sm:$0xff]  ;;  %v6342_v38 = vpack.c.bf16 %v634_v26, %v633_v25 }
   0xb   :  { %40 = vst [vmem:[#allocation2 + $0x29c] sm:$0xf] %v10914_v3  ;;  %41 = vst [vmem:[#allocation2 + $0x2bc] sm:$0xf] %v10914_v3  ;;  %6367 = vmatprep.subr.bf16.mxu0 %v6766_v18  ;;  %v505_v28 = vld [vmem:[%s10908_s1 + $0x40] sm:$0xff]  ;;  %v10913_v30 = vmax.f32 %v6793_v27, 0.0 }
   0xc   :  { %42 = vst [vmem:[#allocation2 + $0x2dc] sm:$0xf] %v10914_v3  ;;  %43 = vst [vmem:[#allocation2 + $0x2fc] sm:$0xf] %v10914_v3  ;;  %v6805_v31 = vld [vmem:[%s10909_s0 + $0x8] sm:$0xff]  ;;  %v635_v32 = vld [vmem:[%s10908_s1 + $0xd0] sm:$0xff]  ;;  %v6839_v45 = vpack.c.bf16 %v506_v29, %v505_v28 }
   0xd   :  { %44 = vst [vmem:[#allocation2 + $0x31c] sm:$0xf] %v10914_v3  ;;  %45 = vst [vmem:[#allocation2 + $0x33c] sm:$0xf] %v10914_v3  ;;  %6337 = vmatpush3.bf16.msra.mxu1 %v6334_v17  ;;  %v636_v33 = vld [vmem:[%s10908_s1 + $0xd8] sm:$0xff]  ;;  %v10912_v34 = vmax.f32 %v6805_v31, 0.0  ;;  %5758 = vmatprep.mubr.f32.mxu1 %v10913_v30 }
   0xe   :  { %46 = vst [vmem:[#allocation2 + $0x35c] sm:$0xf] %v10914_v3  ;;  %47 = vst [vmem:[#allocation2 + $0x37c] sm:$0xf] %v10914_v3  ;;  %v6817_v35 = vld [vmem:[%s10909_s0 + $0x10] sm:$0xff]  ;;  %v53_v37 = vld [vmem:[%s10909_s0 + $0x20] sm:$0xff]  ;;  %6369 = vmatpush3.bf16.msra.mxu0 %v6766_v18  ;;  %6339 = vmatprep.subr.bf16.mxu1 %v6338_v23  ;;  %v6346_v0 = vpack.c.bf16 %v636_v33, %v635_v32 }
   0xf   :  { %48 = vst [vmem:[#allocation2 + $0x39c] sm:$0xf] %v10914_v3  ;;  %v52_v36 = vld [vmem:[%s10909_s0 + $0x18] sm:$0xf]  ;;  %v507_v39 = vld [vmem:[%s10908_s1 + $0x50] sm:$0xff]  ;;  %v10911_v40 = vmax.f32 %v6817_v35, 0.0  ;;  %6371 = vmatprep.subr.bf16.mxu0 %v6782_v24 }
  0x10   :  { %v164_v41 = vmax.f32 %v52_v36, 0.0  ;;  %v6830_v42 = vmax.f32 %v53_v37, 0.0  ;;  %v54_v43 = vld [vmem:[%s10909_s0 + $0x28] sm:$0xff]  ;;  %v55_v44 = vld [vmem:[%s10909_s0 + $0x30] sm:$0xff]  ;;  %v508_v46 = vld [vmem:[%s10908_s1 + $0x58] sm:$0xff] }
  0x11   :  { %v6846_v47 = vmax.f32 %v54_v43, 0.0  ;;  %v6848_v48 = vmax.f32 %v55_v44, 0.0  ;;  %v56_v49 = vld [vmem:[%s10909_s0 + $0x38] sm:$0xf]  ;;  %v57_v50 = vld [vmem:[%s10909_s0 + $0x40] sm:$0xff]  ;;  %v58_v53 = vld [vmem:[%s10909_s0 + $0x48] sm:$0xff]  ;;  %6341 = vmatpush3.bf16.msra.mxu1 %v6338_v23  ;;  %v6904_v7 = vpack.c.bf16 %v508_v46, %v507_v39 }
  0x12   :  { %276 = vst [vmem:[#allocation2 + $0x38] sm:$0xf] %v164_v41  ;;  %277 = vst [vmem:[#allocation2 + $0x40] sm:$0xff] %v6830_v42  ;;  %v168_v51 = vmax.f32 %v56_v49, 0.0  ;;  %v6857_v52 = vmax.f32 %v57_v50, 0.0  ;;  %v59_v54 = vld [vmem:[%s10909_s0 + $0x50] sm:$0xff]  ;;  %6373 = vmatpush3.bf16.msra.mxu0 %v6782_v24  ;;  %6343 = vmatprep.subr.bf16.mxu1 %v6342_v38 }
  0x13   :  { %v60_v55 = vld [vmem:[%s10909_s0 + $0x58] sm:$0xf]  ;;  %v637_v56 = vld [vmem:[%s10908_s1 + $0xe0] sm:$0xff]  ;;  %v638_v57 = vld [vmem:[%s10908_s1 + $0xe8] sm:$0xff]  ;;  %278 = vst [vmem:[#allocation2 + $0x48] sm:$0xff] %v6846_v47  ;;  %v6876_v58 = vmax.f32 %v58_v53, 0.0  ;;  %6375 = vmatprep.subr.bf16.mxu0 %v6839_v45 }
  0x14   :  { %279 = vst [vmem:[#allocation2 + $0x50] sm:$0xff] %v6848_v48  ;;  %v6878_v59 = vmax.f32 %v59_v54, 0.0  ;;  %v172_v60 = vmax.f32 %v60_v55, 0.0  ;;  %v61_v61 = vld [vmem:[%s10909_s0 + $0x60] sm:$0xff]  ;;  %v62_v62 = vld [vmem:[%s10909_s0 + $0x68] sm:$0xff]  ;;  %v63_v63 = vld [vmem:[%s10909_s0 + $0x70] sm:$0xff]  ;;  %v6350_v28 = vpack.c.bf16 %v638_v57, %v637_v56 }
  0x15   :  { %v509_v1 = vld [vmem:[%s10908_s1 + $0x60] sm:$0xff]  ;;  %280 = vst [vmem:[#allocation2 + $0x58] sm:$0xf] %v168_v51  ;;  %281 = vst [vmem:[#allocation2 + $0x60] sm:$0xff] %v6857_v52  ;;  %v6894_v2 = vmax.f32 %v61_v61, 0.0  ;;  %v6896_v4 = vmax.f32 %v62_v62, 0.0  ;;  %6345 = vmatpush3.bf16.msra.mxu1 %v6342_v38 }
  0x16   :  { %v6898_v5 = vmax.f32 %v63_v63, 0.0  ;;  %v64_v6 = vld [vmem:[%s10909_s0 + $0x78] sm:$0xf]  ;;  %v510_v9 = vld [vmem:[%s10908_s1 + $0x68] sm:$0xff]  ;;  %283 = vst [vmem:[#allocation2 + $0x70] sm:$0xff] %v6878_v59  ;;  %v65_v11 = vld [vmem:[%s10909_s0 + $0x80] sm:$0xff]  ;;  %6377 = vmatpush3.bf16.msra.mxu0 %v6839_v45  ;;  %6347 = vmatprep.subr.bf16.mxu1 %v6346_v0 }
  0x17   :  { %284 = vst [vmem:[#allocation2 + $0x78] sm:$0xf] %v172_v60  ;;  %v176_v10 = vmax.f32 %v64_v6, 0.0  ;;  %v66_v12 = vld [vmem:[%s10909_s0 + $0x88] sm:$0xff]  ;;  %286 = vst [vmem:[#allocation2 + $0x88] sm:$0xff] %v6896_v4  ;;  %v6918_v14 = vmax.f32 %v65_v11, 0.0  ;;  %6379 = vmatprep.subr.bf16.mxu0 %v6904_v7  ;;  %v6960_v38 = vpack.c.bf16 %v510_v9, %v509_v1 }
  0x18   :  { %287 = vst [vmem:[#allocation2 + $0x90] sm:$0xff] %v6898_v5  ;;  %v6920_v15 = vmax.f32 %v66_v12, 0.0  ;;  %v67_v16 = vld [vmem:[%s10909_s0 + $0x90] sm:$0xff]  ;;  %v68_v17 = vld [vmem:[%s10909_s0 + $0x98] sm:$0xf]  ;;  %v69_v19 = vld [vmem:[%s10909_s0 + $0xa0] sm:$0xff] }
  0x19   :  { %v639_v20 = vld [vmem:[%s10908_s1 + $0xf0] sm:$0xff]  ;;  %v640_v21 = vld [vmem:[%s10908_s1 + $0xf8] sm:$0xff]  ;;  %288 = vst [vmem:[#allocation2 + $0x98] sm:$0xf] %v176_v10  ;;  %v6937_v22 = vmax.f32 %v67_v16, 0.0  ;;  %v180_v23 = vmax.f32 %v68_v17, 0.0  ;;  %6349 = vmatpush3.bf16.msra.mxu1 %v6346_v0 }
  0x1a   :  { %v6939_v25 = vmax.f32 %v69_v19, 0.0  ;;  %v70_v26 = vld [vmem:[%s10909_s0 + $0xa8] sm:$0xff]  ;;  %v511_v29 = vld [vmem:[%s10908_s1 + $0x70] sm:$0xff]  ;;  %v72_v36 = vld [vmem:[%s10909_s0 + $0xb8] sm:$0xf]  ;;  %6381 = vmatpush3.bf16.msra.mxu0 %v6904_v7  ;;  %6351 = vmatprep.subr.bf16.mxu1 %v6350_v28  ;;  %v6354_v61 = vpack.c.bf16 %v640_v21, %v639_v20 }
  0x1b   :  { %v6948_v32 = vmax.f32 %v70_v26, 0.0  ;;  %v71_v33 = vld [vmem:[%s10909_s0 + $0xb0] sm:$0xff]  ;;  %v73_v37 = vld [vmem:[%s10909_s0 + $0xc0] sm:$0xff]  ;;  %v512_v39 = vld [vmem:[%s10908_s1 + $0x78] sm:$0xff]  ;;  %292 = vst [vmem:[#allocation2 + $0xb8] sm:$0xf] %v180_v23  ;;  %6383 = vmatprep.subr.bf16.mxu0 %v6960_v38 }
  0x1c   :  { %v6965_v41 = vmax.f32 %v71_v33, 0.0  ;;  %v184_v43 = vmax.f32 %v72_v36, 0.0  ;;  %v6967_v44 = vmax.f32 %v73_v37, 0.0  ;;  %v74_v46 = vld [vmem:[%s10909_s0 + $0xc8] sm:$0xff]  ;;  %v75_v49 = vld [vmem:[%s10909_s0 + $0xd0] sm:$0xff]  ;;  %v77_v54 = vld [vmem:[%s10909_s0 + $0xe0] sm:$0xff]  ;;  %v7003_v1 = vpack.c.bf16 %v512_v39, %v511_v29 }
  0x1d   :  { %v6975_v50 = vmax.f32 %v74_v46, 0.0  ;;  %v6977_v51 = vmax.f32 %v75_v49, 0.0  ;;  %v76_v53 = vld [vmem:[%s10909_s0 + $0xd8] sm:$0xf]  ;;  %v78_v55 = vld [vmem:[%s10909_s0 + $0xe8] sm:$0xff]  ;;  %v6988_v57 = vmax.f32 %v77_v54, 0.0  ;;  %6353 = vmatpush3.bf16.msra.mxu1 %v6350_v28 }
  0x1e   :  { %296 = vst [vmem:[#allocation2 + $0xd8] sm:$0xf] %v184_v43  ;;  %v188_v56 = vmax.f32 %v76_v53, 0.0  ;;  %v6990_v60 = vmax.f32 %v78_v55, 0.0  ;;  %v2004_v62 = vld [vmem:[%s10908_s1 + $0x100] sm:$0xff]  ;;  %v79_v63 = vld [vmem:[%s10909_s0 + $0xf0] sm:$0xff]  ;;  %6385 = vmatpush3.bf16.msra.mxu0 %v6960_v38  ;;  %6355 = vmatprep.subr.bf16.mxu1 %v6354_v61 }
  0x1f   :  { %v80_v0 = vld [vmem:[%s10909_s0 + $0xf8] sm:$0xf]  ;;  %v7005_v6 = vmax.f32 %v79_v63, 0.0  ;;  %v81_v10 = vld [vmem:[%s10909_s0 + $0x100] sm:$0xff]  ;;  %v82_v11 = vld [vmem:[%s10909_s0 + $0x108] sm:$0xff]  ;;  %6387 = vmatprep.subr.bf16.mxu0 %v7003_v1 }
  0x20   :  { %300 = vst [vmem:[#allocation2 + $0xf8] sm:$0xf] %v188_v56  ;;  %v192_v9 = vmax.f32 %v80_v0, 0.0  ;;  %v83_v12 = vld [vmem:[%s10909_s0 + $0x110] sm:$0xff]  ;;  %v2005_v16 = vld [vmem:[%s10908_s1 + $0x108] sm:$0xff]  ;;  %v7019_v17 = vmax.f32 %v81_v10, 0.0 }
  0x21   :  { %v7021_v19 = vmax.f32 %v82_v11, 0.0  ;;  %v7023_v20 = vmax.f32 %v83_v12, 0.0  ;;  %v84_v21 = vld [vmem:[%s10909_s0 + $0x118] sm:$0xf]  ;;  %v85_v26 = vld [vmem:[%s10909_s0 + $0x120] sm:$0xff]  ;;  %v86_v33 = vld [vmem:[%s10909_s0 + $0x128] sm:$0xff]  ;;  %v6390_v28 = vpack.c.bf16 %v2005_v16, %v2004_v62  ;;  %6357 = vmatpush3.bf16.msra.mxu1 %v6354_v61 }
  0x22   :  { %304 = vst [vmem:[#allocation2 + $0x118] sm:$0xf] %v192_v9  ;;  %v196_v23 = vmax.f32 %v84_v21, 0.0  ;;  %v7032_v29 = vmax.f32 %v85_v26, 0.0  ;;  %v87_v36 = vld [vmem:[%s10909_s0 + $0x130] sm:$0xff]  ;;  %v7041_v37 = vmax.f32 %v86_v33, 0.0  ;;  %6389 = vmatpush3.bf16.msra.mxu0 %v7003_v1  ;;  %6422 = vmatprep.subr.bf16.mxu1 %v6741_v8 }
  0x23   :  { %v7043_v39 = vmax.f32 %v87_v36, 0.0  ;;  %v88_v43 = vld [vmem:[%s10909_s0 + $0x138] sm:$0xf]  ;;  %v89_v46 = vld [vmem:[%s10909_s0 + $0x140] sm:$0xff]  ;;  %v90_v49 = vld [vmem:[%s10909_s0 + $0x148] sm:$0xff]  ;;  %6391 = vmatprep.subr.bf16.mxu0 %v6390_v28 }
  0x24   :  { %308 = vst [vmem:[#allocation2 + $0x138] sm:$0xf] %v196_v23  ;;  %v2006_v53 = vld [vmem:[%s10908_s1 + $0x110] sm:$0xff]  ;;  %v2007_v54 = vld [vmem:[%s10908_s1 + $0x118] sm:$0xff]  ;;  %v200_v55 = vmax.f32 %v88_v43, 0.0  ;;  %v7060_v56 = vmax.f32 %v89_v46, 0.0  ;;  %5759 = vmatmul.mubr.f32.vlgmr.msra.gmra.mrb[0].mxu1 %v10912_v34 }
  0x25   :  { %v7062_v62 = vmax.f32 %v90_v49, 0.0  ;;  %v91_v63 = vld [vmem:[%s10909_s0 + $0x150] sm:$0xff]  ;;  %v92_v9 = vld [vmem:[%s10909_s0 + $0x158] sm:$0xf]  ;;  %v93_v10 = vld [vmem:[%s10909_s0 + $0x160] sm:$0xff]  ;;  %v6394_v21 = vpack.c.bf16 %v2007_v54, %v2006_v53  ;;  %5959 = vmatmul.mubr.f32.vlgmr.msra.gmra.mrb[0].mxu0 %v10914_v3  ;;  %5761 = vmatprep.mubr.f32.mxu1 %v10911_v40 }
  0x26   :  { %v7067_v0 = vmax.f32 %v91_v63, 0.0  ;;  %312 = vst [vmem:[#allocation2 + $0x158] sm:$0xf] %v200_v55  ;;  %v204_v11 = vmax.f32 %v92_v9, 0.0  ;;  %v7076_v12 = vmax.f32 %v93_v10, 0.0  ;;  %v94_v61 = vld [vmem:[%s10909_s0 + $0x168] sm:$0xff]  ;;  %6393 = vmatpush3.bf16.msra.mxu0 %v6390_v28  ;;  %5961 = vmatprep.mubr.f32.mxu0 %v10914_v3 }
  0x27   :  { %v95_v16 = vld [vmem:[%s10909_s0 + $0x170] sm:$0xff]  ;;  %v7085_v23 = vmax.f32 %v94_v61, 0.0  ;;  %v96_v33 = vld [vmem:[%s10909_s0 + $0x178] sm:$0xf]  ;;  %v97_v36 = vld [vmem:[%s10909_s0 + $0x180] sm:$0xff]  ;;  %6395 = vmatprep.subr.bf16.mxu0 %v6394_v21  ;;  %6430 = vmatpush3.bf16.msra.mxu1 %v6741_v8 }
  0x28   :  { %v7087_v26 = vmax.f32 %v95_v16, 0.0  ;;  %v98_v43 = vld [vmem:[%s10909_s0 + $0x188] sm:$0xff]  ;;  %v7100_v46 = vld [vmem:[#allocation2 + $0x38] sm:$0xff]  ;;  %v2008_v49 = vld [vmem:[%s10908_s1 + $0x120] sm:$0xff]  ;;  %316 = vst [vmem:[#allocation2 + $0x178] sm:$0xf] %v204_v11  ;;  %6423 = vmatprep.subr.bf16.mxu1 %v6752_v13 }
  0x29   :  { %v2009_v53 = vld [vmem:[%s10908_s1 + $0x128] sm:$0xff]  ;;  %v208_v54 = vmax.f32 %v96_v33, 0.0  ;;  %v7108_v55 = vmax.f32 %v97_v36, 0.0  ;;  %v7110_v63 = vmax.f32 %v98_v43, 0.0  ;;  %v99_v9 = vld [vmem:[%s10909_s0 + $0x190] sm:$0xff]  ;;  %v101_v11 = vld [vmem:[%s10909_s0 + $0x1a0] sm:$0xff]  ;;  %5762 = vmatmul.mubr.f32.gmra.mrb[2].mxu1 %v7100_v46 }
  0x2a   :  { %v100_v10 = vld [vmem:[%s10909_s0 + $0x198] sm:$0xf]  ;;  %v2010_v61 = vld [vmem:[%s10908_s1 + $0x130] sm:$0xff]  ;;  %v7131_v33 = vmax.f32 %v99_v9, 0.0  ;;  %v7133_v43 = vmax.f32 %v101_v11, 0.0  ;;  %v102_v28 = vld [vmem:[%s10909_s0 + $0x1a8] sm:$0xff]  ;;  %v6398_v34 = vpack.c.bf16 %v2009_v53, %v2008_v49  ;;  %5764 = vmatprep.mubr.f32.mxu1 %v6830_v42  ;;  %6397 = vmatpush3.bf16.msra.mxu0 %v6394_v21 }
  0x2b   :  { %11100 = vst [vmem:[#allocation3_spill] sm:$0xff] %v7110_v63  ;;  %v2011_v16 = vld [vmem:[%s10908_s1 + $0x138] sm:$0xff]  ;;  %320 = vst [vmem:[#allocation2 + $0x198] sm:$0xf] %v208_v54  ;;  %v212_v36 = vmax.f32 %v100_v10, 0.0  ;;  %v103_v40 = vld [vmem:[%s10909_s0 + $0x1b0] sm:$0xff]  ;;  %6431 = vmatpush3.bf16.msra.mxu1 %v6752_v13 }
  0x2c   :  { %11101 = vst [vmem:[#allocation4_spill] sm:$0xff] %v7133_v43  ;;  %v7141_v30 = vmax.f32 %v102_v28, 0.0  ;;  %v7143_v3 = vmax.f32 %v103_v40, 0.0  ;;  %v104_v54 = vld [vmem:[%s10909_s0 + $0x1b8] sm:$0xf]  ;;  %v105_v9 = vld [vmem:[%s10909_s0 + $0x1c0] sm:$0xff]  ;;  %6399 = vmatprep.subr.bf16.mxu0 %v6398_v34  ;;  %v6402_v21 = vpack.c.bf16 %v2011_v16, %v2010_v61  ;;  %6424 = vmatprep.subr.bf16.mxu1 %v6766_v18 }
  0x2d   :  { %v106_v10 = vld [vmem:[%s10909_s0 + $0x1c8] sm:$0xff]  ;;  %324 = vst [vmem:[#allocation2 + $0x1b8] sm:$0xf] %v212_v36  ;;  %v216_v49 = vmax.f32 %v104_v54, 0.0  ;;  %v7156_v40 = vmax.f32 %v105_v9, 0.0  ;;  %v107_v11 = vld [vmem:[%s10909_s0 + $0x1d0] sm:$0xff]  ;;  %5765 = vmatmul.mubr.f32.gmra.mrb[4].mxu1 %v6846_v47 }
  0x2e   :  { %11102 = vst [vmem:[#allocation5_spill] sm:$0xff] %v7141_v30  ;;  %11103 = vst [vmem:[#allocation6_spill] sm:$0xff] %v7143_v3  ;;  %v7158_v53 = vmax.f32 %v106_v10, 0.0  ;;  %v108_v28 = vld [vmem:[%s10909_s0 + $0x1d8] sm:$0xf]  ;;  %v11106_v3 = vmov 0.0   ;;  %5767 = vmatprep.mubr.f32.mxu1 %v6848_v48  ;;  %6401 = vmatpush3.bf16.msra.mxu0 %v6398_v34 }
  0x2f   :  { %11104 = vst [vmem:[#allocation7_spill] sm:$0xff] %v7156_v40  ;;  %5962 = vmatmul.mubr.f32.gmra.mrb[2].mxu0 %v11106_v3  ;;  %v7169_v8 = vmax.f32 %v107_v11, 0.0  ;;  %v220_v36 = vmax.f32 %v108_v28, 0.0  ;;  %v109_v54 = vld [vmem:[%s10909_s0 + $0x1e0] sm:$0xff]  ;;  %v110_v9 = vld [vmem:[%s10909_s0 + $0x1e8] sm:$0xff]  ;;  %v11108_v10 = vmax.f32 %v6793_v27, 0.0  ;;  %6403 = vmatprep.subr.bf16.mxu0 %v6402_v21 }
  0x30   :  { %11105 = vst [vmem:[#allocation8_spill] sm:$0xff] %v7158_v53  ;;  %v2012_v3 = vld [vmem:[%s10908_s1 + $0x140] sm:$0xff]  ;;  %328 = vst [vmem:[#allocation2 + $0x1d8] sm:$0xf] %v216_v49  ;;  %v7182_v11 = vmax.f32 %v109_v54, 0.0  ;;  %v7184_v28 = vmax.f32 %v110_v9, 0.0  ;;  %6432 = vmatpush3.bf16.msra.mxu1 %v6766_v18 }
  0x31   :  { %11107 = vst [vmem:[#allocation9_spill] sm:$0xff] %v7169_v8  ;;  %5964 = vmatprep.mubr.f32.mxu0 %v11108_v10  ;;  %v111_v8 = vld [vmem:[%s10909_s0 + $0x1f0] sm:$0xff]  ;;  %v112_v53 = vld [vmem:[%s10909_s0 + $0x1f8] sm:$0xf]  ;;  %v113_v27 = vld [vmem:[%s10909_s0 + $0x200] sm:$0xff]  ;;  %v11115_v13 = vmax.f32 %v6805_v31, 0.0  ;;  %6425 = vmatprep.subr.bf16.mxu1 %v6782_v24 }
  0x32   :  { %11109 = vst [vmem:[#allocation10_spill] sm:$0xff] %v7182_v11  ;;  %11110 = vst [vmem:[#allocation11_spill] sm:$0xff] %v7184_v28  ;;  %v2013_v49 = vld [vmem:[%s10908_s1 + $0x148] sm:$0xff]  ;;  %v7198_v54 = vmax.f32 %v111_v8, 0.0  ;;  %v224_v9 = vmax.f32 %v112_v53, 0.0  ;;  %v7200_v10 = vmax.f32 %v113_v27, 0.0  ;;  %6405 = vmatpush3.bf16.msra.mxu0 %v6402_v21 }
  0x33   :  { %332 = vst [vmem:[#allocation2 + $0x1f8] sm:$0xf] %v220_v36  ;;  %v114_v28 = vld [vmem:[%s10909_s0 + $0x208] sm:$0xff]  ;;  %v115_v11 = vld [vmem:[%s10909_s0 + $0x210] sm:$0xff]  ;;  %v116_v53 = vld [vmem:[%s10909_s0 + $0x218] sm:$0xf]  ;;  %5965 = vmatmul.mubr.f32.gmra.mrb[4].mxu0 %v11115_v13 }
  0x34   :  { %11111 = vst [vmem:[#allocation12_spill] sm:$0xff] %v7198_v54  ;;  %11112 = vst [vmem:[#allocation13_spill] sm:$0xff] %v7200_v10  ;;  %v7210_v61 = vmax.f32 %v114_v28, 0.0  ;;  %v7212_v16 = vmax.f32 %v115_v11, 0.0  ;;  %v117_v8 = vld [vmem:[%s10909_s0 + $0x220] sm:$0xff]  ;;  %v118_v36 = vld [vmem:[%s10909_s0 + $0x228] sm:$0xff]  ;;  %6433 = vmatpush3.bf16.msra.mxu1 %v6782_v24 }
  0x35   :  { %v7227_v11 = vld [vmem:[#allocation2 + $0x58] sm:$0xff]  ;;  %336 = vst [vmem:[#allocation2 + $0x218] sm:$0xf] %v224_v9  ;;  %v228_v28 = vmax.f32 %v116_v53, 0.0  ;;  %v7229_v27 = vmax.f32 %v117_v8, 0.0  ;;  %v11116_v10 = vmax.f32 %v6817_v35, 0.0  ;;  %v6406_v53 = vpack.c.bf16 %v2013_v49, %v2012_v3  ;;  %6426 = vmatprep.subr.bf16.mxu1 %v6839_v45 }
  0x36   :  { %11113 = vst [vmem:[#allocation14_spill] sm:$0xff] %v7210_v61  ;;  %11114 = vst [vmem:[#allocation15_spill] sm:$0xff] %v7212_v16  ;;  %v7231_v16 = vmax.f32 %v118_v36, 0.0  ;;  %v119_v61 = vld [vmem:[%s10909_s0 + $0x230] sm:$0xff]  ;;  %v120_v13 = vld [vmem:[%s10909_s0 + $0x238] sm:$0xf]  ;;  %5768 = vmatmul.mubr.f32.gmra.mrb[6].mxu1 %v7227_v11 }
  0x37   :  { %5967 = vmatprep.mubr.f32.mxu0 %v11116_v10  ;;  %v7238_v31 = vmax.f32 %v119_v61, 0.0  ;;  %v124_v9 = vld [vmem:[%s10909_s0 + $0x258] sm:$0xf]  ;;  %340 = vst [vmem:[#allocation2 + $0x238] sm:$0xf] %v228_v28  ;;  %v232_v8 = vmax.f32 %v120_v13, 0.0  ;;  %5770 = vmatprep.mubr.f32.mxu1 %v6857_v52 }
  0x38   :  { %v236_v36 = vmax.f32 %v124_v9, 0.0  ;;  %v2014_v34 = vld [vmem:[%s10908_s1 + $0x150] sm:$0xff]  ;;  %v2015_v35 = vld [vmem:[%s10908_s1 + $0x158] sm:$0xff]  ;;  %5968 = vmatmul.mubr.f32.gmra.mrb[6].mxu0 %v7100_v46  ;;  %v121_v18 = vld [vmem:[%s10909_s0 + $0x240] sm:$0xff]  ;;  %6407 = vmatprep.subr.bf16.mxu0 %v6406_v53 }
  0x39   :  { %344 = vst [vmem:[#allocation2 + $0x258] sm:$0xf] %v232_v8  ;;  %5970 = vmatprep.mubr.f32.mxu0 %v6830_v42  ;;  %v7261_v3 = vmax.f32 %v121_v18, 0.0  ;;  %v122_v49 = vld [vmem:[%s10909_s0 + $0x248] sm:$0xff]  ;;  %v6410_v10 = vpack.c.bf16 %v2015_v35, %v2014_v34  ;;  %v2016_v61 = vld [vmem:[%s10908_s1 + $0x160] sm:$0xff]  ;;  %v7279_v21 = vld [vmem:[#allocation2 + $0x78] sm:$0xff]  ;;  %6409 = vmatpush3.bf16.msra.mxu0 %v6406_v53 }
  0x3a   :  { %348 = vst [vmem:[#allocation2 + $0x278] sm:$0xf] %v236_v36  ;;  %v7266_v46 = vmax.f32 %v122_v49, 0.0  ;;  %5771 = vmatmul.mubr.f32.gmra.mrb[8].mxu1 %v6876_v58  ;;  %v2017_v42 = vld [vmem:[%s10908_s1 + $0x168] sm:$0xff]  ;;  %v123_v24 = vld [vmem:[%s10909_s0 + $0x250] sm:$0xff] }
  0x3b   :  { %5773 = vmatprep.mubr.f32.mxu1 %v6878_v59  ;;  %v7285_v28 = vmax.f32 %v123_v24, 0.0  ;;  %v128_v13 = vld [vmem:[%s10909_s0 + $0x278] sm:$0xf]  ;;  %6411 = vmatprep.subr.bf16.mxu0 %v6410_v10  ;;  %v6414_v9 = vpack.c.bf16 %v2017_v42, %v2016_v61  ;;  %v2018_v8 = vld [vmem:[%s10908_s1 + $0x170] sm:$0xff]  ;;  %v126_v36 = vld [vmem:[%s10909_s0 + $0x268] sm:$0xff] }
  0x3c   :  { %5971 = vmatmul.mubr.f32.gmra.mrb[8].mxu0 %v6846_v47  ;;  %v240_v47 = vmax.f32 %v128_v13, 0.0  ;;  %6434 = vmatpush3.bf16.msra.mxu1 %v6839_v45  ;;  %v125_v45 = vld [vmem:[%s10909_s0 + $0x260] sm:$0xff]  ;;  %v7310_v35 = vmax.f32 %v126_v36, 0.0  ;;  %v127_v18 = vld [vmem:[%s10909_s0 + $0x270] sm:$0xff]  ;;  %v7348_v24 = vld [vmem:[#allocation2 + $0xb8] sm:$0xff] }
  0x3d   :  { %5973 = vmatprep.mubr.f32.mxu0 %v6848_v48  ;;  %v2019_v48 = vld [vmem:[%s10908_s1 + $0x178] sm:$0xff]  ;;  %6427 = vmatprep.subr.bf16.mxu1 %v6904_v7  ;;  %v7305_v53 = vmax.f32 %v125_v45, 0.0  ;;  %v7323_v49 = vmax.f32 %v127_v18, 0.0  ;;  %v131_v13 = vld [vmem:[%s10909_s0 + $0x290] sm:$0xff] }
  0x3e   :  { %5774 = vmatmul.mubr.f32.gmra.mrb[10].mxu1 %v7279_v21  ;;  %352 = vst [vmem:[#allocation2 + $0x298] sm:$0xf] %v240_v47  ;;  %6413 = vmatpush3.bf16.msra.mxu0 %v6410_v10  ;;  %v6418_v34 = vpack.c.bf16 %v2019_v48, %v2018_v8  ;;  %v134_v8 = vld [vmem:[%s10909_s0 + $0x2a8] sm:$0xff]  ;;  %v7376_v45 = vld [vmem:[#allocation2 + $0xd8] sm:$0xff]  ;;  %v135_v36 = vld [vmem:[%s10909_s0 + $0x2b0] sm:$0xff] }
  0x3f   :  { %5776 = vmatprep.mubr.f32.mxu1 %v6894_v2  ;;  %6415 = vmatprep.subr.bf16.mxu0 %v6414_v9  ;;  %v7371_v48 = vmax.f32 %v134_v8, 0.0  ;;  %v140_v18 = vld [vmem:[%s10909_s0 + $0x2d8] sm:$0xf] }
  0x40   :  { %5974 = vmatmul.mubr.f32.gmra.mrb[10].mxu0 %v7227_v11  ;;  %6435 = vmatpush3.bf16.msra.mxu1 %v6904_v7  ;;  %v132_v7 = vld [vmem:[%s10909_s0 + $0x298] sm:$0xf] }
  0x41   :  { %5976 = vmatprep.mubr.f32.mxu0 %v6857_v52  ;;  %6428 = vmatprep.subr.bf16.mxu1 %v6960_v38  ;;  %v7317_v52 = vld [vmem:[#allocation2 + $0x98] sm:$0xff]  ;;  %v244_v10 = vmax.f32 %v132_v7, 0.0  ;;  %v252_v7 = vmax.f32 %v140_v18, 0.0  ;;  %v141_v18 = vld [vmem:[%s10909_s0 + $0x2e0] sm:$0xff] }
  0x42   :  { %5777 = vmatmul.mubr.f32.gmra.mrb[12].mxu1 %v6896_v4  ;;  %6417 = vmatpush3.bf16.msra.mxu0 %v6414_v9  ;;  %v7354_v9 = vmax.f32 %v131_v13, 0.0  ;;  %v144_v8 = vld [vmem:[%s10909_s0 + $0x2f8] sm:$0xf] }
  0x43   :  { %5779 = vmatprep.mubr.f32.mxu1 %v6898_v5  ;;  %6419 = vmatprep.subr.bf16.mxu0 %v6418_v34  ;;  %356 = vst [vmem:[#allocation2 + $0x2b8] sm:$0xf] %v244_v10  ;;  %v137_v10 = vld [vmem:[%s10909_s0 + $0x2c0] sm:$0xff]  ;;  %364 = vst [vmem:[#allocation2 + $0x2f8] sm:$0xf] %v252_v7  ;;  %v7422_v7 = vmax.f32 %v141_v18, 0.0 }
  0x44   :  { %5977 = vmatmul.mubr.f32.gmra.mrb[12].mxu0 %v6876_v58  ;;  %6436 = vmatpush3.bf16.msra.mxu1 %v6960_v38  ;;  %v130_v38 = vld [vmem:[%s10909_s0 + $0x288] sm:$0xff]  ;;  %v148_v18 = vld [vmem:[%s10909_s0 + $0x318] sm:$0xf] }
  0x45   :  { %5979 = vmatprep.mubr.f32.mxu0 %v6878_v59  ;;  %6429 = vmatprep.subr.bf16.mxu1 %v7003_v1  ;;  %v129_v59 = vld [vmem:[%s10909_s0 + $0x280] sm:$0xff]  ;;  %v7342_v42 = vmax.f32 %v130_v38, 0.0  ;;  %v138_v38 = vld [vmem:[%s10909_s0 + $0x2c8] sm:$0xff]  ;;  %11119 = vst [vmem:[#allocation18_spill] sm:$0xff] %v7422_v7  ;;  %v7460_v7 = vld [vmem:[#allocation2 + $0x138] sm:$0xff] }
  0x46   :  { %5780 = vmatmul.mubr.f32.gmra.mrb[14].mxu1 %v7317_v52  ;;  %6421 = vmatpush3.bf16.msra.mxu0 %v6418_v34  ;;  %v7337_v61 = vmax.f32 %v129_v59, 0.0  ;;  %v7382_v34 = vmax.f32 %v135_v36, 0.0  ;;  %v7394_v59 = vmax.f32 %v137_v10, 0.0  ;;  %v7399_v13 = vmax.f32 %v138_v38, 0.0  ;;  %v142_v10 = vld [vmem:[%s10909_s0 + $0x2e8] sm:$0xff] }
  0x47   :  { %5782 = vmatprep.mubr.f32.mxu1 %v6918_v14  ;;  %v256_v36 = vmax.f32 %v144_v8, 0.0  ;;  %v7427_v38 = vmax.f32 %v142_v10, 0.0  ;;  %v143_v8 = vld [vmem:[%s10909_s0 + $0x2f0] sm:$0xff]  ;;  %v260_v10 = vmax.f32 %v148_v18, 0.0 }
  0x48   :  { %5980 = vmatmul.mubr.f32.gmra.mrb[14].mxu0 %v7279_v21  ;;  %6437 = vmatpush3.bf16.msra.mxu1 %v7003_v1  ;;  %v136_v1 = vld [vmem:[%s10909_s0 + $0x2b8] sm:$0xf]  ;;  %11117 = vst [vmem:[#allocation16_spill] sm:$0xff] %v7399_v13 }
  0x49   :  { %5982 = vmatprep.mubr.f32.mxu0 %v6894_v2  ;;  %v248_v47 = vmax.f32 %v136_v1, 0.0  ;;  %v7404_v1 = vld [vmem:[#allocation2 + $0xf8] sm:$0xff]  ;;  %368 = vst [vmem:[#allocation2 + $0x318] sm:$0xf] %v256_v36  ;;  %11120 = vst [vmem:[#allocation19_spill] sm:$0xff] %v7427_v38  ;;  %v7438_v36 = vmax.f32 %v143_v8, 0.0 }
  0x4a   :  { %5783 = vmatmul.mubr.f32.gmra.mrb[16].mxu1 %v6920_v15  ;;  %v145_v38 = vld [vmem:[%s10909_s0 + $0x300] sm:$0xff]  ;;  %372 = vst [vmem:[#allocation2 + $0x338] sm:$0xf] %v260_v10  ;;  %v147_v10 = vld [vmem:[%s10909_s0 + $0x310] sm:$0xff]  ;;  %v7516_v13 = vld [vmem:[#allocation2 + $0x178] sm:$0xff] }
  0x4b   :  { %5785 = vmatprep.mubr.f32.mxu1 %v6937_v22  ;;  %360 = vst [vmem:[#allocation2 + $0x2d8] sm:$0xf] %v248_v47  ;;  %v139_v47 = vld [vmem:[%s10909_s0 + $0x2d0] sm:$0xff]  ;;  %11121 = vst [vmem:[#allocation20_spill] sm:$0xff] %v7438_v36  ;;  %v7450_v8 = vmax.f32 %v145_v38, 0.0  ;;  %v146_v36 = vld [vmem:[%s10909_s0 + $0x308] sm:$0xff] }
  0x4c   :  { %5983 = vmatmul.mubr.f32.gmra.mrb[16].mxu0 %v6896_v4  ;;  %v133_v4 = vld [vmem:[%s10909_s0 + $0x2a0] sm:$0xff]  ;;  %v7455_v18 = vmax.f32 %v146_v36, 0.0  ;;  %v7466_v38 = vmax.f32 %v147_v10, 0.0  ;;  %v152_v36 = vld [vmem:[%s10909_s0 + $0x338] sm:$0xf] }
  0x4d   :  { %5985 = vmatprep.mubr.f32.mxu0 %v6898_v5  ;;  %v7366_v5 = vmax.f32 %v133_v4, 0.0  ;;  %v7410_v4 = vmax.f32 %v139_v47, 0.0  ;;  %v7432_v47 = vld [vmem:[#allocation2 + $0x118] sm:$0xff]  ;;  %11122 = vst [vmem:[#allocation21_spill] sm:$0xff] %v7450_v8  ;;  %v149_v8 = vld [vmem:[%s10909_s0 + $0x320] sm:$0xff] }
  0x4e   :  { %5786 = vmatmul.mubr.f32.gmra.mrb[18].mxu1 %v7348_v24  ;;  %11123 = vst [vmem:[#allocation22_spill] sm:$0xff] %v7455_v18  ;;  %11124 = vst [vmem:[#allocation23_spill] sm:$0xff] %v7466_v38  ;;  %v264_v18 = vmax.f32 %v152_v36, 0.0  ;;  %v7478_v10 = vmax.f32 %v149_v8, 0.0  ;;  %v150_v38 = vld [vmem:[%s10909_s0 + $0x328] sm:$0xff] }
  0x4f   :  { %5788 = vmatprep.mubr.f32.mxu1 %v6939_v25  ;;  %11118 = vst [vmem:[#allocation17_spill] sm:$0xff] %v7410_v4  ;;  %v7483_v36 = vmax.f32 %v150_v38, 0.0  ;;  %v7488_v4 = vld [vmem:[#allocation2 + $0x158] sm:$0xff] }
  0x50   :  { %5986 = vmatmul.mubr.f32.gmra.mrb[18].mxu0 %v7317_v52  ;;  %376 = vst [vmem:[#allocation2 + $0x358] sm:$0xf] %v264_v18  ;;  %11125 = vst [vmem:[#allocation24_spill] sm:$0xff] %v7478_v10  ;;  %v151_v18 = vld [vmem:[%s10909_s0 + $0x330] sm:$0xff]  ;;  %v156_v38 = vld [vmem:[%s10909_s0 + $0x358] sm:$0xf] }
  0x51   :  { %5988 = vmatprep.mubr.f32.mxu0 %v6918_v14  ;;  %11126 = vst [vmem:[#allocation25_spill] sm:$0xff] %v7483_v36  ;;  %11127 = vst [vmem:[#allocation26_spill] sm:$0xff] %v7488_v4  ;;  %v7494_v8 = vmax.f32 %v151_v18, 0.0  ;;  %v268_v36 = vmax.f32 %v156_v38, 0.0  ;;  %v153_v10 = vld [vmem:[%s10909_s0 + $0x340] sm:$0xff] }
  0x52   :  { %5789 = vmatmul.mubr.f32.gmra.mrb[20].mxu1 %v6948_v32  ;;  %v7506_v18 = vmax.f32 %v153_v10, 0.0 }
  0x53   :  { %5791 = vmatprep.mubr.f32.mxu1 %v6965_v41  ;;  %11128 = vst [vmem:[#allocation27_spill] sm:$0xff] %v7494_v8  ;;  %380 = vst [vmem:[#allocation2 + $0x378] sm:$0xf] %v268_v36  ;;  %v154_v8 = vld [vmem:[%s10909_s0 + $0x348] sm:$0xff]  ;;  %v155_v36 = vld [vmem:[%s10909_s0 + $0x350] sm:$0xff] }
  0x54   :  { %5989 = vmatmul.mubr.f32.gmra.mrb[20].mxu0 %v6920_v15  ;;  %11129 = vst [vmem:[#allocation28_spill] sm:$0xff] %v7506_v18  ;;  %v7511_v38 = vmax.f32 %v154_v8, 0.0  ;;  %v7522_v10 = vmax.f32 %v155_v36, 0.0  ;;  %v160_v8 = vld [vmem:[%s10909_s0 + $0x378] sm:$0xf]  ;;  %v7533_v18 = vld [vmem:[%s10909_s0 + $0x360] sm:$0xff] }
  0x55   :  { %5991 = vmatprep.mubr.f32.mxu0 %v6937_v22  ;;  %11132 = vst [vmem:[#allocation31_spill] sm:$0xff] %v7533_v18  ;;  %v11136_v36 = vld [vmem:[#allocation6_spill] sm:$0xff]  ;;  %v11138_v18 = vld [vmem:[#allocation8_spill] sm:$0xff] }
  0x56   :  { %5792 = vmatmul.mubr.f32.gmra.mrb[22].mxu1 %v7376_v45  ;;  %11130 = vst [vmem:[#allocation29_spill] sm:$0xff] %v7511_v38  ;;  %11131 = vst [vmem:[#allocation30_spill] sm:$0xff] %v7522_v10  ;;  %v272_v38 = vmax.f32 %v160_v8, 0.0  ;;  %v7540_v8 = vld [vmem:[%s10909_s0 + $0x368] sm:$0xff]  ;;  %v7562_v10 = vld [vmem:[#allocation2 + $0x1b8] sm:$0xff] }
  0x57   :  { %5794 = vmatprep.mubr.f32.mxu1 %v6967_v44  ;;  %11133 = vst [vmem:[#allocation32_spill] sm:$0xff] %v7540_v8  ;;  %11135 = vst [vmem:[#allocation34_spill] sm:$0xff] %v7562_v10  ;;  %v6666_v8 = vld [vmem:[#allocation2 + $0x40] sm:$0xff] }
  0x58   :  { %5992 = vmatmul.mubr.f32.gmra.mrb[22].mxu0 %v7348_v24  ;;  %384 = vst [vmem:[#allocation2 + $0x398] sm:$0xf] %v272_v38  ;;  %v7551_v38 = vld [vmem:[%s10909_s0 + $0x370] sm:$0xff]  ;;  %s6675_s0 = smov 64  }
  0x59   :  { %5994 = vmatprep.mubr.f32.mxu0 %v6939_v25  ;;  %11134 = vst [vmem:[#allocation33_spill] sm:$0xff] %v7551_v38  ;;  %v7572_v38 = vld [vmem:[#allocation2 + $0x1d8] sm:$0xff] }
  0x5a   :  { %5795 = vmatmul.mubr.f32.gmra.mrb[24].mxu1 %v6975_v50  ;;  %11137 = vst [vmem:[#allocation35_spill] sm:$0xff] %v7572_v38 }
  0x5b   :  { %5797 = vmatprep.mubr.f32.mxu1 %v6977_v51 }
  0x5c   :  { %5995 = vmatmul.mubr.f32.gmra.mrb[24].mxu0 %v6948_v32 }
  0x5d   :  { %5997 = vmatprep.mubr.f32.mxu0 %v6965_v41 }
  0x5e   :  { %5798 = vmatmul.mubr.f32.gmra.mrb[26].mxu1 %v7404_v1 }
  0x5f   :  { %5800 = vmatprep.mubr.f32.mxu1 %v6988_v57 }
  0x60   :  { %5998 = vmatmul.mubr.f32.gmra.mrb[26].mxu0 %v7376_v45 }
  0x61   :  { %6000 = vmatprep.mubr.f32.mxu0 %v6967_v44 }
  0x62   :  { %5801 = vmatmul.mubr.f32.gmra.mrb[28].mxu1 %v6990_v60 }
  0x63   :  { %5803 = vmatprep.mubr.f32.mxu1 %v7005_v6 }
  0x64   :  { %6001 = vmatmul.mubr.f32.gmra.mrb[28].mxu0 %v6975_v50 }
  0x65   :  { %6003 = vmatprep.mubr.f32.mxu0 %v6977_v51 }
  0x66   :  { %5804 = vmatmul.mubr.f32.gmra.mrb[30].mxu1 %v7432_v47 }
  0x67   :  { %5806 = vmatprep.mubr.f32.mxu1 %v7019_v17 }
  0x68   :  { %6004 = vmatmul.mubr.f32.gmra.mrb[30].mxu0 %v7404_v1 }
  0x69   :  { %6006 = vmatprep.mubr.f32.mxu0 %v6988_v57 }
  0x6a   :  { %5807 = vmatmul.mubr.f32.gmra.mrb[32].mxu1 %v7021_v19 }
  0x6b   :  { %5809 = vmatprep.mubr.f32.mxu1 %v7023_v20 }
  0x6c   :  { %6007 = vmatmul.mubr.f32.gmra.mrb[32].mxu0 %v6990_v60 }
  0x6d   :  { %6009 = vmatprep.mubr.f32.mxu0 %v7005_v6 }
  0x6e   :  { %5810 = vmatmul.mubr.f32.gmra.mrb[34].mxu1 %v7460_v7 }
  0x6f   :  { %5812 = vmatprep.mubr.f32.mxu1 %v7032_v29 }
  0x70   :  { %6010 = vmatmul.mubr.f32.gmra.mrb[34].mxu0 %v7432_v47 }
  0x71   :  { %6012 = vmatprep.mubr.f32.mxu0 %v7019_v17 }
  0x72   :  { %5813 = vmatmul.mubr.f32.gmra.mrb[36].mxu1 %v7041_v37 }
  0x73   :  { %5815 = vmatprep.mubr.f32.mxu1 %v7043_v39 }
  0x74   :  { %6013 = vmatmul.mubr.f32.gmra.mrb[36].mxu0 %v7021_v19 }
  0x75   :  { %6015 = vmatprep.mubr.f32.mxu0 %v7023_v20 }
  0x76   :  { %5816 = vmatmul.mubr.f32.gmra.mrb[38].mxu1 %v7488_v4 }
  0x77   :  { %5818 = vmatprep.mubr.f32.mxu1 %v7060_v56 }
  0x78   :  { %6016 = vmatmul.mubr.f32.gmra.mrb[38].mxu0 %v7460_v7 }
  0x79   :  { %6018 = vmatprep.mubr.f32.mxu0 %v7032_v29 }
  0x7a   :  { %5819 = vmatmul.mubr.f32.gmra.mrb[40].mxu1 %v7062_v62 }
  0x7b   :  { %5821 = vmatprep.mubr.f32.mxu1 %v7067_v0 }
  0x7c   :  { %6019 = vmatmul.mubr.f32.gmra.mrb[40].mxu0 %v7041_v37 }
  0x7d   :  { %6021 = vmatprep.mubr.f32.mxu0 %v7043_v39 }
  0x7e   :  { %5822 = vmatmul.mubr.f32.gmra.mrb[42].mxu1 %v7516_v13 }
  0x7f   :  { %5824 = vmatprep.mubr.f32.mxu1 %v7076_v12 }
  0x80   :  { %6022 = vmatmul.mubr.f32.gmra.mrb[42].mxu0 %v7488_v4  ;;  %v7546_v4 = vld [vmem:[#allocation2 + $0x198] sm:$0xff] }
  0x81   :  { %6024 = vmatprep.mubr.f32.mxu0 %v7060_v56 }
  0x82   :  { %5825 = vmatmul.mubr.f32.gmra.mrb[44].mxu1 %v7085_v23 }
  0x83   :  { %5827 = vmatprep.mubr.f32.mxu1 %v7087_v26 }
  0x84   :  { %6025 = vmatmul.mubr.f32.gmra.mrb[44].mxu0 %v7062_v62 }
  0x85   :  { %6027 = vmatprep.mubr.f32.mxu0 %v7067_v0 }
  0x86   :  { %5828 = vmatmul.mubr.f32.gmra.mrb[46].mxu1 %v7546_v4 }
  0x87   :  { %5830 = vmatprep.mubr.f32.mxu1 %v7108_v55 }
  0x88   :  { %6028 = vmatmul.mubr.f32.gmra.mrb[46].mxu0 %v7516_v13 }
  0x89   :  { %6030 = vmatprep.mubr.f32.mxu0 %v7076_v12 }
  0x8a   :  { %5831 = vmatmul.mubr.f32.gmra.mrb[48].mxu1 %v7110_v63 }
  0x8b   :  { %5833 = vmatprep.mubr.f32.mxu1 %v7131_v33 }
  0x8c   :  { %6031 = vmatmul.mubr.f32.gmra.mrb[48].mxu0 %v7085_v23 }
  0x8d   :  { %6033 = vmatprep.mubr.f32.mxu0 %v7087_v26 }
  0x8e   :  { %5834 = vmatmul.mubr.f32.gmra.mrb[50].mxu1 %v7562_v10 }
  0x8f   :  { %5836 = vmatprep.mubr.f32.mxu1 %v7133_v43  ;;  %v6667_v43 = vld [vmem:[#allocation2 + $0x48] sm:$0xff] }
  0x90   :  { %6034 = vmatmul.mubr.f32.gmra.mrb[50].mxu0 %v7546_v4 }
  0x91   :  { %6036 = vmatprep.mubr.f32.mxu0 %v7108_v55 }
  0x92   :  { %5837 = vmatmul.mubr.f32.gmra.mrb[52].mxu1 %v7141_v30  ;;  %v11139_v30 = vld [vmem:[#allocation9_spill] sm:$0xff] }
  0x93   :  { %5839 = vmatprep.mubr.f32.mxu1 %v11136_v36  ;;  %v6668_v36 = vld [vmem:[#allocation2 + $0x50] sm:$0xff] }
  0x94   :  { %6037 = vmatmul.mubr.f32.gmra.mrb[52].mxu0 %v7110_v63  ;;  %v7580_v63 = vld [vmem:[#allocation2 + $0x1f8] sm:$0xff] }
  0x95   :  { %6039 = vmatprep.mubr.f32.mxu0 %v7131_v33 }
  0x96   :  { %5840 = vmatmul.mubr.f32.gmra.mrb[54].mxu1 %v7572_v38  ;;  %v11140_v38 = vld [vmem:[#allocation10_spill] sm:$0xff] }
  0x97   :  { %5842 = vmatprep.mubr.f32.mxu1 %v7156_v40  ;;  %v11141_v40 = vld [vmem:[#allocation11_spill] sm:$0xff] }
  0x98   :  { %6040 = vmatmul.mubr.f32.gmra.mrb[54].mxu0 %v7562_v10  ;;  %v6669_v10 = vld [vmem:[#allocation2 + $0x60] sm:$0xff] }
  0x99   :  { %6158 = vmatprep.mubr.f32.mxu0 %v6666_v8  ;;  %v6670_v8 = vld [vmem:[#allocation2 + $0x70] sm:$0xff] }
  0x9a   :  { %5843 = vmatmul.mubr.f32.gmra.mrb[56].mxu1 %v11138_v18 }
  0x9b   :  { %5845 = vmatprep.mubr.f32.mxu1 %v11139_v30 }
  0x9c   :  { %6159 = vmatmul.mubr.f32.vlgmr.msra.gmra.mrb[0].mxu0 %v6667_v43  ;;  %v7588_v43 = vld [vmem:[#allocation2 + $0x218] sm:$0xff] }
  0x9d   :  { %6161 = vmatprep.mubr.f32.mxu0 %v6668_v36  ;;  %v11142_v36 = vld [vmem:[#allocation13_spill] sm:$0xff] }
  0x9e   :  { %5846 = vmatmul.mubr.f32.gmra.mrb[58].mxu1 %v7580_v63 }
  0x9f   :  { %5848 = vmatprep.mubr.f32.mxu1 %v11140_v38 }
  0xa0   :  { %6162 = vmatmul.mubr.f32.gmra.mrb[2].mxu0 %v7227_v11  ;;  %v11143_v11 = vld [vmem:[#allocation14_spill] sm:$0xff] }
  0xa1   :  { %6164 = vmatprep.mubr.f32.mxu0 %v6669_v10  ;;  %v6671_v10 = vld [vmem:[#allocation2 + $0x88] sm:$0xff] }
  0xa2   :  { %5849 = vmatmul.mubr.f32.gmra.mrb[60].mxu1 %v11141_v40  ;;  %v11144_v40 = vld [vmem:[#allocation15_spill] sm:$0xff] }
  0xa3   :  { %5851 = vmatprep.mubr.f32.mxu1 %v7198_v54  ;;  %v6672_v54 = vld [vmem:[#allocation2 + $0x90] sm:$0xff] }
  0xa4   :  { %6165 = vmatmul.mubr.f32.gmra.mrb[4].mxu0 %v6876_v58  ;;  %v7596_v58 = vld [vmem:[#allocation2 + $0x238] sm:$0xff] }
  0xa5   :  { %6167 = vmatprep.mubr.f32.mxu0 %v6670_v8  ;;  %v11172_v8 = vld [vmem:[#allocation32_spill] sm:$0xff] }
  0xa6   :  { %5852 = vmatmul.mubr.f32.gmra.mrb[62].mxu1 %v7588_v43 }
  0xa7   :  { %5854 = vmatprep.mubr.f32.mxu1 %v11142_v36 }
  0xa8   :  { %6168 = vmatmul.mubr.f32.gmra.mrb[6].mxu0 %v7279_v21  ;;  %v11163_v21 = vld [vmem:[#allocation30_spill] sm:$0xff] }
  0xa9   :  { %6170 = vmatprep.mubr.f32.mxu0 %v6894_v2  ;;  %v7605_v2 = vld [vmem:[#allocation2 + $0x258] sm:$0xff] }
  0xaa   :  { %5855 = vmatmul.mubr.f32.gmra.mrb[64].mxu1 %v11143_v11 }
  0xab   :  { %5857 = vmatprep.mubr.f32.mxu1 %v11144_v40 }
  0xac   :  { %6171 = vmatmul.mubr.f32.gmra.mrb[8].mxu0 %v6671_v10  ;;  %v11173_v10 = vmax.f32 %v11172_v8, 0.0 }
  0xad   :  { %6173 = vmatprep.mubr.f32.mxu0 %v6672_v54  ;;  %v11161_v54 = vld [vmem:[#allocation29_spill] sm:$0xff] }
  0xae   :  { %5858 = vmatmul.mubr.f32.gmra.mrb[66].mxu1 %v7596_v58 }
  0xaf   :  { %5860 = vmatprep.mubr.f32.mxu1 %v7229_v27 }
  0xb0   :  { %6174 = vmatmul.mubr.f32.gmra.mrb[10].mxu0 %v7317_v52  ;;  %v7695_v52 = vld [vmem:[#allocation2 + $0x378] sm:$0xff] }
  0xb1   :  { %6176 = vmatprep.mubr.f32.mxu0 %v6918_v14  ;;  %v7615_v14 = vld [vmem:[#allocation2 + $0x278] sm:$0xff] }
  0xb2   :  { %5861 = vmatmul.mubr.f32.gmra.mrb[68].mxu1 %v7231_v16 }
  0xb3   :  { %5863 = vmatprep.mubr.f32.mxu1 %v7238_v31 }
  0xb4   :  { %6177 = vmatmul.mubr.f32.gmra.mrb[12].mxu0 %v6920_v15  ;;  %v7625_v15 = vld [vmem:[#allocation2 + $0x298] sm:$0xff] }
  0xb5   :  { %6179 = vmatprep.mubr.f32.mxu0 %v6937_v22  ;;  %v7635_v22 = vld [vmem:[#allocation2 + $0x2b8] sm:$0xff] }
  0xb6   :  { %5864 = vmatmul.mubr.f32.gmra.mrb[70].mxu1 %v7605_v2 }
  0xb7   :  { %5866 = vmatprep.mubr.f32.mxu1 %v7261_v3 }
  0xb8   :  { %6180 = vmatmul.mubr.f32.gmra.mrb[14].mxu0 %v7348_v24  ;;  %v11164_v24 = vld [vmem:[#allocation6_spill] sm:$0xff] }
  0xb9   :  { %6182 = vmatprep.mubr.f32.mxu0 %v6939_v25  ;;  %v7645_v25 = vld [vmem:[#allocation2 + $0x2d8] sm:$0xff] }
  0xba   :  { %5867 = vmatmul.mubr.f32.gmra.mrb[72].mxu1 %v7266_v46 }
  0xbb   :  { %5869 = vmatprep.mubr.f32.mxu1 %v7285_v28 }
  0xbc   :  { %6183 = vmatmul.mubr.f32.gmra.mrb[16].mxu0 %v6948_v32  ;;  %v11145_v32 = vld [vmem:[#allocation16_spill] sm:$0xff] }
  0xbd   :  { %6185 = vmatprep.mubr.f32.mxu0 %v6965_v41  ;;  %v11146_v41 = vld [vmem:[#allocation17_spill] sm:$0xff] }
  0xbe   :  { %5870 = vmatmul.mubr.f32.gmra.mrb[74].mxu1 %v7615_v14 }
  0xbf   :  { %5872 = vmatprep.mubr.f32.mxu1 %v7305_v53 }
  0xc0   :  { %6186 = vmatmul.mubr.f32.gmra.mrb[18].mxu0 %v7376_v45 }
  0xc1   :  { %6188 = vmatprep.mubr.f32.mxu0 %v6967_v44  ;;  %v7655_v44 = vld [vmem:[#allocation2 + $0x2f8] sm:$0xff] }
  0xc2   :  { %5873 = vmatmul.mubr.f32.gmra.mrb[76].mxu1 %v7310_v35 }
  0xc3   :  { %5875 = vmatprep.mubr.f32.mxu1 %v7323_v49 }
  0xc4   :  { %6189 = vmatmul.mubr.f32.gmra.mrb[20].mxu0 %v6975_v50  ;;  %v11147_v50 = vld [vmem:[#allocation26_spill] sm:$0xff] }
  0xc5   :  { %6191 = vmatprep.mubr.f32.mxu0 %v6977_v51  ;;  %v11148_v51 = vld [vmem:[#allocation18_spill] sm:$0xff] }
  0xc6   :  { %5876 = vmatmul.mubr.f32.gmra.mrb[78].mxu1 %v7625_v15 }
  0xc7   :  { %5878 = vmatprep.mubr.f32.mxu1 %v7337_v61 }
  0xc8   :  { %6192 = vmatmul.mubr.f32.gmra.mrb[22].mxu0 %v7404_v1  ;;  %v11168_v1 = vld [vmem:[#allocation31_spill] sm:$0xff] }
  0xc9   :  { %6194 = vmatprep.mubr.f32.mxu0 %v6988_v57  ;;  %v11149_v57 = vld [vmem:[#allocation19_spill] sm:$0xff] }
  0xca   :  { %5879 = vmatmul.mubr.f32.gmra.mrb[80].mxu1 %v7342_v42 }
  0xcb   :  { %5881 = vmatprep.mubr.f32.mxu1 %v7354_v9 }
  0xcc   :  { %6195 = vmatmul.mubr.f32.gmra.mrb[24].mxu0 %v6990_v60  ;;  %v11150_v60 = vld [vmem:[#allocation20_spill] sm:$0xff] }
  0xcd   :  { %6197 = vmatprep.mubr.f32.mxu0 %v7005_v6  ;;  %v7665_v6 = vld [vmem:[#allocation2 + $0x318] sm:$0xff] }
  0xce   :  { %5882 = vmatmul.mubr.f32.gmra.mrb[82].mxu1 %v7635_v22 }
  0xcf   :  { %5884 = vmatprep.mubr.f32.mxu1 %v7366_v5 }
  0xd0   :  { %6198 = vmatmul.mubr.f32.gmra.mrb[26].mxu0 %v7432_v47 }
  0xd1   :  { %6200 = vmatprep.mubr.f32.mxu0 %v7019_v17  ;;  %v11151_v17 = vld [vmem:[#allocation21_spill] sm:$0xff] }
  0xd2   :  { %5885 = vmatmul.mubr.f32.gmra.mrb[84].mxu1 %v7371_v48 }
  0xd3   :  { %5887 = vmatprep.mubr.f32.mxu1 %v7382_v34 }
  0xd4   :  { %6201 = vmatmul.mubr.f32.gmra.mrb[28].mxu0 %v7021_v19  ;;  %v11152_v19 = vld [vmem:[#allocation22_spill] sm:$0xff] }
  0xd5   :  { %6203 = vmatprep.mubr.f32.mxu0 %v7023_v20  ;;  %v11153_v20 = vld [vmem:[#allocation23_spill] sm:$0xff] }
  0xd6   :  { %5888 = vmatmul.mubr.f32.gmra.mrb[86].mxu1 %v7645_v25 }
  0xd7   :  { %5890 = vmatprep.mubr.f32.mxu1 %v7394_v59 }
  0xd8   :  { %6204 = vmatmul.mubr.f32.gmra.mrb[30].mxu0 %v7460_v7  ;;  %v11170_v7 = vld [vmem:[#allocation7_spill] sm:$0xff] }
  0xd9   :  { %6206 = vmatprep.mubr.f32.mxu0 %v7032_v29  ;;  %v7675_v29 = vld [vmem:[#allocation2 + $0x338] sm:$0xff] }
  0xda   :  { %5891 = vmatmul.mubr.f32.gmra.mrb[88].mxu1 %v11145_v32 }
  0xdb   :  { %5893 = vmatprep.mubr.f32.mxu1 %v11146_v41 }
  0xdc   :  { %6207 = vmatmul.mubr.f32.gmra.mrb[32].mxu0 %v7041_v37  ;;  %v11154_v37 = vld [vmem:[#allocation24_spill] sm:$0xff] }
  0xdd   :  { %6209 = vmatprep.mubr.f32.mxu0 %v7043_v39  ;;  %v11155_v39 = vld [vmem:[#allocation25_spill] sm:$0xff] }
  0xde   :  { %5894 = vmatmul.mubr.f32.gmra.mrb[90].mxu1 %v7655_v44 }
  0xdf   :  { %5896 = vmatprep.mubr.f32.mxu1 %v11148_v51 }
  0xe0   :  { %6210 = vmatmul.mubr.f32.gmra.mrb[34].mxu0 %v11147_v50 }
  0xe1   :  { %6212 = vmatprep.mubr.f32.mxu0 %v7060_v56  ;;  %v11156_v56 = vld [vmem:[#allocation3_spill] sm:$0xff] }
  0xe2   :  { %5897 = vmatmul.mubr.f32.gmra.mrb[92].mxu1 %v11149_v57 }
  0xe3   :  { %5899 = vmatprep.mubr.f32.mxu1 %v11150_v60 }
  0xe4   :  { %6213 = vmatmul.mubr.f32.gmra.mrb[36].mxu0 %v7062_v62  ;;  %v11157_v62 = vld [vmem:[#allocation27_spill] sm:$0xff] }
  0xe5   :  { %6215 = vmatprep.mubr.f32.mxu0 %v7067_v0  ;;  %v7685_v0 = vld [vmem:[#allocation2 + $0x358] sm:$0xff] }
  0xe6   :  { %5900 = vmatmul.mubr.f32.gmra.mrb[94].mxu1 %v7665_v6 }
  0xe7   :  { %5902 = vmatprep.mubr.f32.mxu1 %v11151_v17 }
  0xe8   :  { %6216 = vmatmul.mubr.f32.gmra.mrb[38].mxu0 %v7516_v13  ;;  %v11167_v13 = vld [vmem:[#allocation35_spill] sm:$0xff] }
  0xe9   :  { %6218 = vmatprep.mubr.f32.mxu0 %v7076_v12  ;;  %v11158_v12 = vld [vmem:[#allocation34_spill] sm:$0xff] }
  0xea   :  { %5903 = vmatmul.mubr.f32.gmra.mrb[96].mxu1 %v11152_v19 }
  0xeb   :  { %5905 = vmatprep.mubr.f32.mxu1 %v11153_v20 }
  0xec   :  { %6219 = vmatmul.mubr.f32.gmra.mrb[40].mxu0 %v7085_v23  ;;  %v11159_v23 = vld [vmem:[#allocation28_spill] sm:$0xff] }
  0xed   :  { %6221 = vmatprep.mubr.f32.mxu0 %v7087_v26  ;;  %v11160_v26 = vld [vmem:[#allocation4_spill] sm:$0xff] }
  0xee   :  { %5906 = vmatmul.mubr.f32.gmra.mrb[98].mxu1 %v7675_v29 }
  0xef   :  { %5908 = vmatprep.mubr.f32.mxu1 %v11154_v37 }
  0xf0   :  { %6222 = vmatmul.mubr.f32.gmra.mrb[42].mxu0 %v7546_v4  ;;  %v11169_v4 = vmax.f32 %v11168_v1, 0.0 }
  0xf1   :  { %6224 = vmatprep.mubr.f32.mxu0 %v7108_v55  ;;  %v11162_v55 = vld [vmem:[#allocation5_spill] sm:$0xff] }
  0xf2   :  { %5909 = vmatmul.mubr.f32.gmra.mrb[100].mxu1 %v11155_v39 }
  0xf3   :  { %5911 = vmatprep.mubr.f32.mxu1 %v11157_v62 }
  0xf4   :  { %6225 = vmatmul.mubr.f32.gmra.mrb[44].mxu0 %v11156_v56  ;;  %v11175_v56 = vld [vmem:[#allocation33_spill] sm:$0xff] }
  0xf5   :  { %6227 = vmatprep.mubr.f32.mxu0 %v7131_v33 }
  0xf6   :  { %5912 = vmatmul.mubr.f32.gmra.mrb[102].mxu1 %v7685_v0 }
  0xf7   :  { %5914 = vmatprep.mubr.f32.mxu1 %v11159_v23  ;;  %v7698_v45 = vpop.f32.mrb[0].mxu1 }
  0xf8   :  { %6228 = vmatmul.mubr.f32.gmra.mrb[46].mxu0 %v11158_v12  ;;  %11165 = vst [vmem:[#allocation8_spill] sm:$0xff] %v7698_v45  ;;  %v7701_v33 = vpop.f32.mrb[1].mxu1  ;;  %v11176_v12 = vmax.f32 %v11175_v56, 0.0 }
  0xf9   :  { %6230 = vmatprep.mubr.f32.mxu0 %v11160_v26  ;;  %11166 = vst [vmem:[#allocation9_spill] sm:$0xff] %v7701_v33  ;;  %v7716_v33 = vld [vmem:[#allocation2 + $0x398] sm:$0xff] }
  0xfa   :  { %5915 = vmatmul.mubr.f32.gmra.mrb[104].mxu1 %v11161_v54 }
  0xfb   :  { %5917 = vmatprep.mubr.f32.mxu1 %v11163_v21 }
  0xfc   :  { %6231 = vmatmul.mubr.f32.gmra.mrb[48].mxu0 %v11162_v55  ;;  %v7707_v47 = vpop.f32.mrb[2].mxu1 }
  0xfd   :  { %6233 = vmatprep.mubr.f32.mxu0 %v11164_v24  ;;  %11171 = vst [vmem:[#allocation10_spill] sm:$0xff] %v7707_v47  ;;  %v7711_v50 = vpop.f32.mrb[3].mxu1 }
  0xfe   :  { %5918 = vmatmul.mubr.f32.gmra.mrb[106].mxu1 %v7695_v52  ;;  %11174 = vst [vmem:[#allocation13_spill] sm:$0xff] %v7711_v50  ;;  %v11179_v50 = vld [vmem:[#allocation11_spill] sm:$0xff] }
  0xff   :  { %5920 = vmatprep.mubr.f32.mxu1 %v11169_v4 }
 0x100   :  { %6234 = vmatmul.mubr.f32.gmra.mrb[50].mxu0 %v11167_v13  ;;  %v7719_v45 = vpop.f32.mrb[4].mxu1 }
 0x101   :  { %6236 = vmatprep.mubr.f32.mxu0 %v11170_v7  ;;  %11177 = vst [vmem:[#allocation14_spill] sm:$0xff] %v7719_v45  ;;  %v7722_v4 = vpop.f32.mrb[5].mxu1  ;;  %v11180_v45 = vld [vmem:[#allocation12_spill] sm:$0xff] }
 0x102   :  { %5921 = vmatmul.mubr.f32.gmra.mrb[108].mxu1 %v11173_v10  ;;  %11178 = vst [vmem:[#allocation15_spill] sm:$0xff] %v7722_v4 }
 0x103   :  { %5923 = vmatprep.mubr.f32.mxu1 %v11176_v12 }
 0x104   :  { %6237 = vmatmul.mubr.f32.gmra.mrb[52].mxu0 %v11138_v18 }
 0x105   :  { %6239 = vmatprep.mubr.f32.mxu0 %v11139_v30 }
 0x106   :  { %5924 = vmatmul.mubr.f32.gmra.mrb[110].mxu1 %v7716_v33 }
 0x107   :  { %6042 = vmatprep.mubr.f32.mxu1 %v11160_v26 }
 0x108   :  { %6240 = vmatmul.mubr.f32.gmra.mrb[54].mxu0 %v7580_v63 }
 0x109   :  { %6242 = vmatprep.mubr.f32.mxu0 %v11140_v38  ;;  %v7727_v10 = vpop.f32.mrb[6].mxu1 }
 0x10a   :  { %6043 = vmatmul.mubr.f32.vlgmr.msra.gmra.mrb[56].mxu1 %v11162_v55  ;;  %v7730_v12 = vpop.f32.mrb[7].mxu1 }
 0x10b   :  { %6045 = vmatprep.mubr.f32.mxu1 %v11164_v24 }
 0x10c   :  { %6243 = vmatmul.mubr.f32.gmra.mrb[56].mxu0 %v11179_v50 }
 0x10d   :  { %6245 = vmatprep.mubr.f32.mxu0 %v11180_v45  ;;  %v7735_v47 = vpop.f32.mrb[8].mxu1 }
 0x10e   :  { %6046 = vmatmul.mubr.f32.gmra.mrb[58].mxu1 %v11167_v13  ;;  %v7738_v4 = vpop.f32.mrb[9].mxu1 }
 0x10f   :  { %6048 = vmatprep.mubr.f32.mxu1 %v11170_v7 }
 0x110   :  { %6246 = vmatmul.mubr.f32.gmra.mrb[58].mxu0 %v7588_v43 }
 0x111   :  { %6248 = vmatprep.mubr.f32.mxu0 %v11142_v36  ;;  %v7743_v26 = vpop.f32.mrb[10].mxu1 }
 0x112   :  { %6049 = vmatmul.mubr.f32.gmra.mrb[60].mxu1 %v11138_v18  ;;  %v7746_v55 = vpop.f32.mrb[11].mxu1 }
 0x113   :  { %6051 = vmatprep.mubr.f32.mxu1 %v11139_v30 }
 0x114   :  { %6249 = vmatmul.mubr.f32.gmra.mrb[60].mxu0 %v11143_v11 }
 0x115   :  { %6251 = vmatprep.mubr.f32.mxu0 %v11144_v40  ;;  %v7751_v24 = vpop.f32.mrb[12].mxu1 }
 0x116   :  { %6052 = vmatmul.mubr.f32.gmra.mrb[62].mxu1 %v7580_v63  ;;  %v7754_v13 = vpop.f32.mrb[13].mxu1 }
 0x117   :  { %6054 = vmatprep.mubr.f32.mxu1 %v11140_v38 }
 0x118   :  { %6252 = vmatmul.mubr.f32.gmra.mrb[62].mxu0 %v7596_v58 }
 0x119   :  { %6254 = vmatprep.mubr.f32.mxu0 %v7229_v27  ;;  %v7759_v18 = vpop.f32.mrb[14].mxu1 }
 0x11a   :  { %6055 = vmatmul.mubr.f32.gmra.mrb[64].mxu1 %v11179_v50  ;;  %v7762_v7 = vpop.f32.mrb[15].mxu1 }
 0x11b   :  { %6057 = vmatprep.mubr.f32.mxu1 %v11180_v45 }
 0x11c   :  { %6255 = vmatmul.mubr.f32.gmra.mrb[64].mxu0 %v7231_v16 }
 0x11d   :  { %6257 = vmatprep.mubr.f32.mxu0 %v7238_v31  ;;  %v7767_v30 = vpop.f32.mrb[16].mxu1 }
 0x11e   :  { %6058 = vmatmul.mubr.f32.gmra.mrb[66].mxu1 %v7588_v43  ;;  %v7770_v63 = vpop.f32.mrb[17].mxu1 }
 0x11f   :  { %6060 = vmatprep.mubr.f32.mxu1 %v11142_v36 }
 0x120   :  { %6258 = vmatmul.mubr.f32.gmra.mrb[66].mxu0 %v7605_v2 }
 0x121   :  { %6260 = vmatprep.mubr.f32.mxu0 %v7261_v3  ;;  %v7775_v38 = vpop.f32.mrb[18].mxu1 }
 0x122   :  { %6061 = vmatmul.mubr.f32.gmra.mrb[68].mxu1 %v11143_v11  ;;  %v7778_v50 = vpop.f32.mrb[19].mxu1 }
 0x123   :  { %6063 = vmatprep.mubr.f32.mxu1 %v11144_v40 }
 0x124   :  { %6261 = vmatmul.mubr.f32.gmra.mrb[68].mxu0 %v7266_v46 }
 0x125   :  { %6263 = vmatprep.mubr.f32.mxu0 %v7285_v28  ;;  %v7783_v43 = vpop.f32.mrb[20].mxu1 }
 0x126   :  { %6064 = vmatmul.mubr.f32.gmra.mrb[70].mxu1 %v7596_v58  ;;  %v7786_v45 = vpop.f32.mrb[21].mxu1 }
 0x127   :  { %6066 = vmatprep.mubr.f32.mxu1 %v7229_v27 }
 0x128   :  { %6264 = vmatmul.mubr.f32.gmra.mrb[70].mxu0 %v7615_v14 }
 0x129   :  { %6266 = vmatprep.mubr.f32.mxu0 %v7305_v53  ;;  %v7791_v36 = vpop.f32.mrb[22].mxu1 }
 0x12a   :  { %6067 = vmatmul.mubr.f32.gmra.mrb[72].mxu1 %v7231_v16  ;;  %v7794_v11 = vpop.f32.mrb[23].mxu1 }
 0x12b   :  { %6069 = vmatprep.mubr.f32.mxu1 %v7238_v31 }
 0x12c   :  { %6267 = vmatmul.mubr.f32.gmra.mrb[72].mxu0 %v7310_v35 }
 0x12d   :  { %6269 = vmatprep.mubr.f32.mxu0 %v7323_v49  ;;  %v7799_v40 = vpop.f32.mrb[24].mxu1 }
 0x12e   :  { %6070 = vmatmul.mubr.f32.gmra.mrb[74].mxu1 %v7605_v2  ;;  %v7802_v58 = vpop.f32.mrb[25].mxu1 }
 0x12f   :  { %6072 = vmatprep.mubr.f32.mxu1 %v7261_v3 }
 0x130   :  { %6270 = vmatmul.mubr.f32.gmra.mrb[74].mxu0 %v7625_v15 }
 0x131   :  { %6272 = vmatprep.mubr.f32.mxu0 %v7337_v61  ;;  %v7807_v16 = vpop.f32.mrb[26].mxu1 }
 0x132   :  { %6073 = vmatmul.mubr.f32.gmra.mrb[76].mxu1 %v7266_v46  ;;  %v7810_v27 = vpop.f32.mrb[27].mxu1 }
 0x133   :  { %6075 = vmatprep.mubr.f32.mxu1 %v7285_v28 }
 0x134   :  { %6273 = vmatmul.mubr.f32.gmra.mrb[76].mxu0 %v7342_v42 }
 0x135   :  { %6275 = vmatprep.mubr.f32.mxu0 %v7354_v9  ;;  %v7815_v31 = vpop.f32.mrb[28].mxu1 }
 0x136   :  { %6076 = vmatmul.mubr.f32.gmra.mrb[78].mxu1 %v7615_v14  ;;  %v7818_v2 = vpop.f32.mrb[29].mxu1 }
 0x137   :  { %6078 = vmatprep.mubr.f32.mxu1 %v7305_v53 }
 0x138   :  { %6276 = vmatmul.mubr.f32.gmra.mrb[78].mxu0 %v7635_v22 }
 0x139   :  { %6278 = vmatprep.mubr.f32.mxu0 %v7366_v5  ;;  %v7823_v3 = vpop.f32.mrb[30].mxu1 }
 0x13a   :  { %6079 = vmatmul.mubr.f32.gmra.mrb[80].mxu1 %v7310_v35  ;;  %v7826_v46 = vpop.f32.mrb[31].mxu1 }
 0x13b   :  { %6081 = vmatprep.mubr.f32.mxu1 %v7323_v49 }
 0x13c   :  { %6279 = vmatmul.mubr.f32.gmra.mrb[80].mxu0 %v7371_v48 }
 0x13d   :  { %6281 = vmatprep.mubr.f32.mxu0 %v7382_v34  ;;  %v7831_v28 = vpop.f32.mrb[32].mxu1 }
 0x13e   :  { %6082 = vmatmul.mubr.f32.gmra.mrb[82].mxu1 %v7625_v15  ;;  %v7834_v14 = vpop.f32.mrb[33].mxu1 }
 0x13f   :  { %6084 = vmatprep.mubr.f32.mxu1 %v7337_v61 }
 0x140   :  { %6282 = vmatmul.mubr.f32.gmra.mrb[82].mxu0 %v7645_v25 }
 0x141   :  { %6284 = vmatprep.mubr.f32.mxu0 %v7394_v59  ;;  %v7839_v53 = vpop.f32.mrb[34].mxu1 }
 0x142   :  { %6085 = vmatmul.mubr.f32.gmra.mrb[84].mxu1 %v7342_v42  ;;  %v7842_v35 = vpop.f32.mrb[35].mxu1 }
 0x143   :  { %6087 = vmatprep.mubr.f32.mxu1 %v7354_v9 }
 0x144   :  { %6285 = vmatmul.mubr.f32.gmra.mrb[84].mxu0 %v11145_v32 }
 0x145   :  { %6287 = vmatprep.mubr.f32.mxu0 %v11146_v41  ;;  %v7847_v49 = vpop.f32.mrb[36].mxu1 }
 0x146   :  { %6088 = vmatmul.mubr.f32.gmra.mrb[86].mxu1 %v7635_v22  ;;  %v7850_v15 = vpop.f32.mrb[37].mxu1 }
 0x147   :  { %6090 = vmatprep.mubr.f32.mxu1 %v7366_v5 }
 0x148   :  { %6288 = vmatmul.mubr.f32.gmra.mrb[86].mxu0 %v7655_v44 }
 0x149   :  { %6290 = vmatprep.mubr.f32.mxu0 %v11148_v51  ;;  %v7855_v61 = vpop.f32.mrb[38].mxu1 }
 0x14a   :  { %6091 = vmatmul.mubr.f32.gmra.mrb[88].mxu1 %v7371_v48  ;;  %v7858_v42 = vpop.f32.mrb[39].mxu1 }
 0x14b   :  { %6093 = vmatprep.mubr.f32.mxu1 %v7382_v34 }
 0x14c   :  { %6291 = vmatmul.mubr.f32.gmra.mrb[88].mxu0 %v11149_v57 }
 0x14d   :  { %6293 = vmatprep.mubr.f32.mxu0 %v11150_v60  ;;  %v7863_v9 = vpop.f32.mrb[40].mxu1 }
 0x14e   :  { %6094 = vmatmul.mubr.f32.gmra.mrb[90].mxu1 %v7645_v25  ;;  %v7866_v22 = vpop.f32.mrb[41].mxu1 }
 0x14f   :  { %6096 = vmatprep.mubr.f32.mxu1 %v7394_v59 }
 0x150   :  { %6294 = vmatmul.mubr.f32.gmra.mrb[90].mxu0 %v7665_v6 }
 0x151   :  { %6296 = vmatprep.mubr.f32.mxu0 %v11151_v17  ;;  %v7871_v5 = vpop.f32.mrb[42].mxu1 }
 0x152   :  { %6097 = vmatmul.mubr.f32.gmra.mrb[92].mxu1 %v11145_v32  ;;  %v7874_v48 = vpop.f32.mrb[43].mxu1 }
 0x153   :  { %6099 = vmatprep.mubr.f32.mxu1 %v11146_v41 }
 0x154   :  { %6297 = vmatmul.mubr.f32.gmra.mrb[92].mxu0 %v11152_v19 }
 0x155   :  { %6299 = vmatprep.mubr.f32.mxu0 %v11153_v20  ;;  %v7879_v34 = vpop.f32.mrb[44].mxu1 }
 0x156   :  { %6100 = vmatmul.mubr.f32.gmra.mrb[94].mxu1 %v7655_v44  ;;  %v7882_v25 = vpop.f32.mrb[45].mxu1 }
 0x157   :  { %6102 = vmatprep.mubr.f32.mxu1 %v11148_v51 }
 0x158   :  { %6300 = vmatmul.mubr.f32.gmra.mrb[94].mxu0 %v7675_v29 }
 0x159   :  { %6302 = vmatprep.mubr.f32.mxu0 %v11154_v37  ;;  %v7887_v59 = vpop.f32.mrb[46].mxu1 }
 0x15a   :  { %6103 = vmatmul.mubr.f32.gmra.mrb[96].mxu1 %v11149_v57  ;;  %v7890_v32 = vpop.f32.mrb[47].mxu1 }
 0x15b   :  { %6105 = vmatprep.mubr.f32.mxu1 %v11150_v60 }
 0x15c   :  { %6303 = vmatmul.mubr.f32.gmra.mrb[96].mxu0 %v11155_v39 }
 0x15d   :  { %6305 = vmatprep.mubr.f32.mxu0 %v11157_v62  ;;  %v7895_v41 = vpop.f32.mrb[48].mxu1 }
 0x15e   :  { %6106 = vmatmul.mubr.f32.gmra.mrb[98].mxu1 %v7665_v6  ;;  %v7898_v44 = vpop.f32.mrb[49].mxu1 }
 0x15f   :  { %6108 = vmatprep.mubr.f32.mxu1 %v11151_v17  ;;  %v11184_v17 = vmax.f32 %v11168_v1, 0.0  ;;  %v11188_v1 = vld [vmem:[#allocation8_spill] sm:$0xff] }
 0x160   :  { %6306 = vmatmul.mubr.f32.gmra.mrb[98].mxu0 %v7685_v0 }
 0x161   :  { %6308 = vmatprep.mubr.f32.mxu0 %v11159_v23  ;;  %v7903_v51 = vpop.f32.mrb[50].mxu1 }
 0x162   :  { %6109 = vmatmul.mubr.f32.gmra.mrb[100].mxu1 %v11152_v19  ;;  %v7906_v57 = vpop.f32.mrb[51].mxu1  ;;  %v2869_v19 = vlaneseq }
 0x163   :  { %11181 = vst [vmem:[#allocation16_spill] sm:$0xff] %v7906_v57  ;;  %6111 = vmatprep.mubr.f32.mxu1 %v11153_v20 }
 0x164   :  { %6309 = vmatmul.mubr.f32.gmra.mrb[100].mxu0 %v11161_v54 }
 0x165   :  { %6311 = vmatprep.mubr.f32.mxu0 %v11163_v21  ;;  %v7911_v60 = vpop.f32.mrb[52].mxu1 }
 0x166   :  { %11182 = vst [vmem:[#allocation17_spill] sm:$0xff] %v7911_v60  ;;  %6112 = vmatmul.mubr.f32.gmra.mrb[102].mxu1 %v7675_v29  ;;  %v7914_v6 = vpop.f32.mrb[53].mxu1  ;;  %v11186_v60 = vmax.f32 %v11172_v8, 0.0  ;;  %v11187_v29 = vmax.f32 %v11175_v56, 0.0 }
 0x167   :  { %11183 = vst [vmem:[#allocation26_spill] sm:$0xff] %v7914_v6  ;;  %6114 = vmatprep.mubr.f32.mxu1 %v11154_v37  ;;  %v7930_v6 = vshrl.u32 %v2869_v19, 7  ;;  %v11194_v19 = vld [vmem:[#allocation13_spill] sm:$0xff] }
 0x168   :  { %6312 = vmatmul.mubr.f32.gmra.mrb[102].mxu0 %v7695_v52 }
 0x169   :  { %6314 = vmatprep.mubr.f32.mxu0 %v11184_v17  ;;  %v7920_v57 = vpop.f32.mrb[54].mxu1  ;;  %vm2871_vm0 = vcmp.lt.s32.totalorder %v7930_v6, 1  ;;  %vm4104_vm1 = vcmp.lt.s32.totalorder %v7930_v6, 7 }
 0x16a   :  { %11185 = vst [vmem:[#allocation18_spill] sm:$0xff] %v7920_v57  ;;  %6115 = vmatmul.mubr.f32.gmra.mrb[104].mxu1 %v11155_v39  ;;  %v7923_v20 = vpop.f32.mrb[55].mxu1  ;;  %v11190_v39 = vld [vmem:[#allocation9_spill] sm:$0xff] }
 0x16b   :  { %6117 = vmatprep.mubr.f32.mxu1 %v11157_v62  ;;  %v6673_v62 = vld [vmem:[#allocation2] sm:$0xff] }
 0x16c   :  { %6315 = vmatmul.mubr.f32.gmra.mrb[104].mxu0 %v11186_v60 }
 0x16d   :  { %6317 = vmatprep.mubr.f32.mxu0 %v11187_v29 }
 0x16e   :  { %6118 = vmatmul.mubr.f32.gmra.mrb[106].mxu1 %v7685_v0 }
 0x16f   :  { %v6160_v37 = vpop.f32.mrb[0].mxu0  ;;  %6120 = vmatprep.mubr.f32.mxu1 %v11159_v23  ;;  %v11192_v23 = vld [vmem:[#allocation10_spill] sm:$0xff] }
 0x170   :  { %v7934_v17 = vadd.f32 %v6160_v37, %v11188_v1  ;;  %v2086_v57 = vpop.f32.mrb[1].mxu0  ;;  %6318 = vmatmul.mubr.f32.gmra.mrb[106].mxu0 %v7716_v33 }
 0x171   :  { %v7939_v8 = vadd.f32 %v2086_v57, %v11190_v39  ;;  %6320 = vmatprep.mubr.f32.mxu0 %v6673_v62  ;;  %v11196_v39 = vld [vmem:[#allocation14_spill] sm:$0xff] }
 0x172   :  { %11189 = vst [vmem:[#allocation19_spill] sm:$0xff] %v7934_v17  ;;  %v2785_v56 = vrot.slane %v7934_v17, 7  ;;  %3658 = vrot.lane.b32.xlu1 %v7934_v17, %s6675_s0  ;;  %6121 = vmatmul.mubr.f32.gmra.mrb[108].mxu1 %v11161_v54 }
 0x173   :  { %11191 = vst [vmem:[#allocation20_spill] sm:$0xff] %v7939_v8  ;;  %v2757_v0 = vrot.slane %v7939_v8, 7  ;;  %3656 = vrot.lane.b32.xlu0 %v7939_v8, %s6675_s0  ;;  %v6163_v33 = vpop.f32.mrb[2].mxu0  ;;  %6123 = vmatprep.mubr.f32.mxu1 %v11163_v21 }
 0x174   :  { %v7950_v57 = vadd.f32 %v6163_v33, %v11192_v23  ;;  %v2096_v60 = vpop.f32.mrb[3].mxu0  ;;  %6321 = vmatmul.mubr.f32.gmra.mrb[108].mxu0 %v6673_v62 }
 0x175   :  { %v7954_v29 = vadd.f32 %v2096_v60, %v11194_v19  ;;  %6323 = vmatprep.mubr.f32.mxu0 %v6673_v62  ;;  %v2928_v37 = vsel %vm2871_vm0, %v2757_v0, %v2785_v56  ;;  %v11198_v60 = vld [vmem:[#allocation15_spill] sm:$0xff] }
 0x176   :  { %11193 = vst [vmem:[#allocation21_spill] sm:$0xff] %v7950_v57  ;;  %3662 = vrot.lane.b32.xlu1 %v7950_v57, %s6675_s0  ;;  %6124 = vmatmul.mubr.f32.gmra.mrb[110].mxu1 %v7695_v52  ;;  %v2841_v23 = vrot.slane %v7950_v57, 7 }
 0x177   :  { %11195 = vst [vmem:[#allocation22_spill] sm:$0xff] %v7954_v29  ;;  %v2813_v1 = vrot.slane %v7954_v29, 7  ;;  %3098 = vrot.lane.b32.xlu0 %v2928_v37, %s6676_s18  ;;  %v6166_v54 = vpop.f32.mrb[4].mxu0 }
 0x178   :  { %v7964_v21 = vadd.f32 %v6166_v54, %v11196_v39  ;;  %v2106_v33 = vpop.f32.mrb[5].mxu0  ;;  %6324 = vmatmul.mubr.f32.gmra.mrb[110].mxu0 %v6673_v62 }
 0x179   :  { %v7968_v19 = vadd.f32 %v2106_v33, %v11198_v60  ;;  %v2900_v17 = vsel %vm2871_vm0, %v2785_v56, %v2813_v1  ;;  %v2872_v39 = vsel %vm2871_vm0, %v2813_v1, %v2841_v23  ;;  %v2956_v56 = vsel %vm2871_vm0, %v2841_v23, %v2757_v0 }
 0x17a   :  { %11197 = vst [vmem:[#allocation23_spill] sm:$0xff] %v7964_v21  ;;  %3100 = vrot.lane.b32.xlu1 %v2900_v17, %s6676_s18  ;;  %v2786_v60 = vrot.slane %v7964_v21, 7 }
 0x17b   :  { %11199 = vst [vmem:[#allocation24_spill] sm:$0xff] %v7968_v19  ;;  %3660 = vrot.lane.b32.xlu0 %v7954_v29, %s6675_s0  ;;  %v6169_v37 = vpop.f32.mrb[6].mxu0 }
 0x17c   :  { %v7976_v52 = vadd.f32 %v6169_v37, %v7727_v10  ;;  %v2116_v54 = vpop.f32.mrb[7].mxu0 }
 0x17d   :  { %v7979_v62 = vadd.f32 %v2116_v54, %v7730_v12  ;;  %v2758_v12 = vrot.slane %v7968_v19, 7 }
 0x17e   :  { %11200 = vst [vmem:[#allocation25_spill] sm:$0xff] %v7976_v52  ;;  %3102 = vrot.lane.b32.xlu1 %v2872_v39, %s6676_s18 }
 0x17f   :  { %11201 = vst [vmem:[#allocation3_spill] sm:$0xff] %v7979_v62  ;;  %3096 = vrot.lane.b32.xlu0 %v2956_v56, %s6676_s18  ;;  %v6172_v17 = vpop.f32.mrb[8].mxu0  ;;  %v2929_v54 = vsel %vm2871_vm0, %v2758_v12, %v2786_v60 }
 0x180   :  { %v7988_v33 = vadd.f32 %v6172_v17, %v7735_v47  ;;  %v2126_v10 = vpop.f32.mrb[9].mxu0  ;;  %v2814_v17 = vrot.slane %v7979_v62, 7 }
 0x181   :  { %v7993_v37 = vadd.f32 %v2126_v10, %v7738_v4  ;;  %v2842_v4 = vrot.slane %v7976_v52, 7 }
 0x182   :  { %11202 = vst [vmem:[#allocation27_spill] sm:$0xff] %v7988_v33  ;;  %3666 = vrot.lane.b32.xlu1 %v7964_v21, %s6675_s0 }
 0x183   :  { %11203 = vst [vmem:[#allocation34_spill] sm:$0xff] %v7993_v37  ;;  %3664 = vrot.lane.b32.xlu0 %v7968_v19, %s6675_s0  ;;  %v6175_v0 = vpop.f32.mrb[10].mxu0  ;;  %v2957_v10 = vsel %vm2871_vm0, %v2842_v4, %v2758_v12 }
 0x184   :  { %v8000_v1 = vadd.f32 %v6175_v0, %v7743_v26  ;;  %v2136_v47 = vpop.f32.mrb[11].mxu0 }
 0x185   :  { %v8003_v23 = vadd.f32 %v2136_v47, %v7746_v55 }
 0x186   :  { %11204 = vst [vmem:[#allocation28_spill] sm:$0xff] %v8000_v1  ;;  %3106 = vrot.lane.b32.xlu1 %v2929_v54, %s6676_s18 }
 0x187   :  { %11205 = vst [vmem:[#allocation4_spill] sm:$0xff] %v8003_v23  ;;  %3668 = vrot.lane.b32.xlu0 %v7979_v62, %s6675_s0  ;;  %v6178_v39 = vpop.f32.mrb[12].mxu0 }
 0x188   :  { %v8012_v56 = vadd.f32 %v6178_v39, %v7751_v24  ;;  %v2146_v26 = vpop.f32.mrb[13].mxu0  ;;  %v2901_v39 = vsel %vm2871_vm0, %v2786_v60, %v2814_v17 }
 0x189   :  { %v8016_v55 = vadd.f32 %v2146_v26, %v7754_v13  ;;  %v2873_v13 = vsel %vm2871_vm0, %v2814_v17, %v2842_v4 }
 0x18a   :  { %11206 = vst [vmem:[#allocation29_spill] sm:$0xff] %v8012_v56  ;;  %3670 = vrot.lane.b32.xlu1 %v7976_v52, %s6675_s0 }
 0x18b   :  { %11207 = vst [vmem:[#allocation5_spill] sm:$0xff] %v8016_v55  ;;  %3104 = vrot.lane.b32.xlu0 %v2957_v10, %s6676_s18  ;;  %v6181_v0 = vpop.f32.mrb[14].mxu0  ;;  %v2787_v10 = vrot.slane %v7988_v33, 7 }
 0x18c   :  { %v8024_v47 = vadd.f32 %v6181_v0, %v7759_v18  ;;  %v2156_v24 = vpop.f32.mrb[15].mxu0 }
 0x18d   :  { %v8027_v54 = vadd.f32 %v2156_v24, %v7762_v7  ;;  %v2759_v7 = vrot.slane %v7993_v37, 7 }
 0x18e   :  { %11208 = vst [vmem:[#allocation30_spill] sm:$0xff] %v8024_v47  ;;  %3110 = vrot.lane.b32.xlu1 %v2873_v13, %s6676_s18 }
 0x18f   :  { %11209 = vst [vmem:[#allocation6_spill] sm:$0xff] %v8027_v54  ;;  %3108 = vrot.lane.b32.xlu0 %v2901_v39, %s6676_s18  ;;  %v6184_v12 = vpop.f32.mrb[16].mxu0  ;;  %v2930_v24 = vsel %vm2871_vm0, %v2759_v7, %v2787_v10 }
 0x190   :  { %v8036_v26 = vadd.f32 %v6184_v12, %v7767_v30  ;;  %v2166_v18 = vpop.f32.mrb[17].mxu0  ;;  %v2815_v12 = vrot.slane %v8003_v23, 7 }
 0x191   :  { %v8041_v0 = vadd.f32 %v2166_v18, %v7770_v63  ;;  %v2843_v63 = vrot.slane %v8000_v1, 7 }
 0x192   :  { %11210 = vst [vmem:[#allocation35_spill] sm:$0xff] %v8036_v26  ;;  %3674 = vrot.lane.b32.xlu1 %v7988_v33, %s6675_s0 }
 0x193   :  { %11211 = vst [vmem:[#allocation31_spill] sm:$0xff] %v8041_v0  ;;  %3672 = vrot.lane.b32.xlu0 %v7993_v37, %s6675_s0  ;;  %v6187_v60 = vpop.f32.mrb[18].mxu0  ;;  %v2958_v18 = vsel %vm2871_vm0, %v2843_v63, %v2759_v7 }
 0x194   :  { %v8048_v4 = vadd.f32 %v6187_v60, %v7775_v38  ;;  %v2176_v30 = vpop.f32.mrb[19].mxu0 }
 0x195   :  { %v8051_v17 = vadd.f32 %v2176_v30, %v7778_v50 }
 0x196   :  { %11212 = vst [vmem:[#allocation7_spill] sm:$0xff] %v8048_v4  ;;  %3114 = vrot.lane.b32.xlu1 %v2930_v24, %s6676_s18 }
 0x197   :  { %11213 = vst [vmem:[#allocation32_spill] sm:$0xff] %v8051_v17  ;;  %3676 = vrot.lane.b32.xlu0 %v8003_v23, %s6675_s0  ;;  %v6190_v13 = vpop.f32.mrb[20].mxu0 }
 0x198   :  { %v8060_v39 = vadd.f32 %v6190_v13, %v7783_v43  ;;  %v2186_v38 = vpop.f32.mrb[21].mxu0  ;;  %v2902_v13 = vsel %vm2871_vm0, %v2787_v10, %v2815_v12 }
 0x199   :  { %v8064_v50 = vadd.f32 %v2186_v38, %v7786_v45  ;;  %v2874_v45 = vsel %vm2871_vm0, %v2815_v12, %v2843_v63 }
 0x19a   :  { %11214 = vst [vmem:[#allocation33_spill] sm:$0xff] %v8060_v39  ;;  %3678 = vrot.lane.b32.xlu1 %v8000_v1, %s6675_s0 }
 0x19b   :  { %11215 = vst [vmem:[#allocation11_spill] sm:$0xff] %v8064_v50  ;;  %3112 = vrot.lane.b32.xlu0 %v2958_v18, %s6676_s18  ;;  %v6193_v60 = vpop.f32.mrb[22].mxu0  ;;  %v2788_v18 = vrot.slane %v8012_v56, 7 }
 0x19c   :  { %v8072_v30 = vadd.f32 %v6193_v60, %v7791_v36  ;;  %v2196_v43 = vpop.f32.mrb[23].mxu0 }
 0x19d   :  { %v8075_v24 = vadd.f32 %v2196_v43, %v7794_v11  ;;  %v2760_v11 = vrot.slane %v8016_v55, 7  ;;  %v11517_v6 = vld [vmem:[#allocation7_spill] sm:$0xff] }
 0x19e   :  { %11216 = vst [vmem:[#allocation12_spill] sm:$0xff] %v8072_v30  ;;  %3118 = vrot.lane.b32.xlu1 %v2874_v45, %s6676_s18 }
 0x19f   :  { %11217 = vst [vmem:[#allocation8_spill] sm:$0xff] %v8075_v24  ;;  %3116 = vrot.lane.b32.xlu0 %v2902_v13, %s6676_s18  ;;  %v6196_v7 = vpop.f32.mrb[24].mxu0  ;;  %v2931_v43 = vsel %vm2871_vm0, %v2760_v11, %v2788_v18 }
 0x1a0   :  { %v8084_v38 = vadd.f32 %v6196_v7, %v7799_v40  ;;  %v2206_v36 = vpop.f32.mrb[25].mxu0  ;;  %v2816_v7 = vrot.slane %v8027_v54, 7 }
 0x1a1   :  { %v8089_v60 = vadd.f32 %v2206_v36, %v7802_v58  ;;  %v2844_v58 = vrot.slane %v8024_v47, 7 }
 0x1a2   :  { %11218 = vst [vmem:[#allocation9_spill] sm:$0xff] %v8084_v38  ;;  %3682 = vrot.lane.b32.xlu1 %v8012_v56, %s6675_s0 }
 0x1a3   :  { %11219 = vst [vmem:[#allocation10_spill] sm:$0xff] %v8089_v60  ;;  %3680 = vrot.lane.b32.xlu0 %v8016_v55, %s6675_s0  ;;  %v6199_v10 = vpop.f32.mrb[26].mxu0  ;;  %v2959_v36 = vsel %vm2871_vm0, %v2844_v58, %v2760_v11 }
 0x1a4   :  { %v8096_v63 = vadd.f32 %v6199_v10, %v7807_v16  ;;  %v2216_v40 = vpop.f32.mrb[27].mxu0 }
 0x1a5   :  { %v8099_v12 = vadd.f32 %v2216_v40, %v7810_v27 }
 0x1a6   :  { %11220 = vst [vmem:[#allocation13_spill] sm:$0xff] %v8096_v63  ;;  %3122 = vrot.lane.b32.xlu1 %v2931_v43, %s6676_s18 }
 0x1a7   :  { %11221 = vst [vmem:[#allocation14_spill] sm:$0xff] %v8099_v12  ;;  %3684 = vrot.lane.b32.xlu0 %v8027_v54, %s6675_s0  ;;  %v6202_v45 = vpop.f32.mrb[28].mxu0 }
 0x1a8   :  { %v8108_v13 = vadd.f32 %v6202_v45, %v7815_v31  ;;  %v2226_v16 = vpop.f32.mrb[29].mxu0  ;;  %v2903_v45 = vsel %vm2871_vm0, %v2788_v18, %v2816_v7 }
 0x1a9   :  { %v8112_v27 = vadd.f32 %v2226_v16, %v7818_v2  ;;  %v2875_v2 = vsel %vm2871_vm0, %v2816_v7, %v2844_v58 }
 0x1aa   :  { %11222 = vst [vmem:[#allocation15_spill] sm:$0xff] %v8108_v13  ;;  %3686 = vrot.lane.b32.xlu1 %v8024_v47, %s6675_s0 }
 0x1ab   :  { %11223 = vst [vmem:[#allocation36_spill] sm:$0xff] %v8112_v27  ;;  %3120 = vrot.lane.b32.xlu0 %v2959_v36, %s6676_s18  ;;  %v6205_v10 = vpop.f32.mrb[30].mxu0  ;;  %v2789_v36 = vrot.slane %v8036_v26, 7 }
 0x1ac   :  { %v8120_v40 = vadd.f32 %v6205_v10, %v7823_v3  ;;  %v2236_v31 = vpop.f32.mrb[31].mxu0 }
 0x1ad   :  { %v8123_v43 = vadd.f32 %v2236_v31, %v7826_v46  ;;  %v2761_v46 = vrot.slane %v8041_v0, 7 }
 0x1ae   :  { %11224 = vst [vmem:[#allocation37_spill] sm:$0xff] %v8120_v40  ;;  %3126 = vrot.lane.b32.xlu1 %v2875_v2, %s6676_s18 }
 0x1af   :  { %11225 = vst [vmem:[#allocation38_spill] sm:$0xff] %v8123_v43  ;;  %3124 = vrot.lane.b32.xlu0 %v2903_v45, %s6676_s18  ;;  %v6208_v11 = vpop.f32.mrb[32].mxu0  ;;  %v2932_v31 = vsel %vm2871_vm0, %v2761_v46, %v2789_v36 }
 0x1b0   :  { %v8132_v16 = vadd.f32 %v6208_v11, %v7831_v28  ;;  %v2246_v3 = vpop.f32.mrb[33].mxu0  ;;  %v2817_v11 = vrot.slane %v8051_v17, 7 }
 0x1b1   :  { %v8137_v10 = vadd.f32 %v2246_v3, %v7834_v14  ;;  %v2845_v14 = vrot.slane %v8048_v4, 7 }
 0x1b2   :  { %11226 = vst [vmem:[#allocation39_spill] sm:$0xff] %v8132_v16  ;;  %3690 = vrot.lane.b32.xlu1 %v8036_v26, %s6675_s0 }
 0x1b3   :  { %11227 = vst [vmem:[#allocation40_spill] sm:$0xff] %v8137_v10  ;;  %3688 = vrot.lane.b32.xlu0 %v8041_v0, %s6675_s0  ;;  %v6211_v18 = vpop.f32.mrb[34].mxu0  ;;  %v2960_v3 = vsel %vm2871_vm0, %v2845_v14, %v2761_v46  ;;  %v2765_v55 = vrot.slane %v8137_v10, 7 }
 0x1b4   :  { %v8144_v58 = vadd.f32 %v6211_v18, %v7839_v53  ;;  %v2256_v28 = vpop.f32.mrb[35].mxu0 }
 0x1b5   :  { %v8147_v7 = vadd.f32 %v2256_v28, %v7842_v35 }
 0x1b6   :  { %11228 = vst [vmem:[#allocation41_spill] sm:$0xff] %v8144_v58  ;;  %3130 = vrot.lane.b32.xlu1 %v2932_v31, %s6676_s18 }
 0x1b7   :  { %11229 = vst [vmem:[#allocation42_spill] sm:$0xff] %v8147_v7  ;;  %3692 = vrot.lane.b32.xlu0 %v8051_v17, %s6675_s0  ;;  %v6214_v2 = vpop.f32.mrb[36].mxu0 }
 0x1b8   :  { %v8156_v45 = vadd.f32 %v6214_v2, %v7847_v49  ;;  %v2266_v53 = vpop.f32.mrb[37].mxu0  ;;  %v2904_v2 = vsel %vm2871_vm0, %v2789_v36, %v2817_v11 }
 0x1b9   :  { %v8160_v35 = vadd.f32 %v2266_v53, %v7850_v15  ;;  %v2876_v15 = vsel %vm2871_vm0, %v2817_v11, %v2845_v14 }
 0x1ba   :  { %11230 = vst [vmem:[#allocation43_spill] sm:$0xff] %v8156_v45  ;;  %3694 = vrot.lane.b32.xlu1 %v8048_v4, %s6675_s0 }
 0x1bb   :  { %11231 = vst [vmem:[#allocation44_spill] sm:$0xff] %v8160_v35  ;;  %3128 = vrot.lane.b32.xlu0 %v2960_v3, %s6676_s18  ;;  %v6217_v18 = vpop.f32.mrb[38].mxu0  ;;  %v2790_v3 = vrot.slane %v8060_v39, 7 }
 0x1bc   :  { %v8168_v28 = vadd.f32 %v6217_v18, %v7855_v61  ;;  %v2276_v49 = vpop.f32.mrb[39].mxu0 }
 0x1bd   :  { %v8171_v31 = vadd.f32 %v2276_v49, %v7858_v42  ;;  %v2762_v42 = vrot.slane %v8064_v50, 7 }
 0x1be   :  { %11232 = vst [vmem:[#allocation45_spill] sm:$0xff] %v8168_v28  ;;  %3134 = vrot.lane.b32.xlu1 %v2876_v15, %s6676_s18 }
 0x1bf   :  { %11233 = vst [vmem:[#allocation46_spill] sm:$0xff] %v8171_v31  ;;  %3132 = vrot.lane.b32.xlu0 %v2904_v2, %s6676_s18  ;;  %v6220_v46 = vpop.f32.mrb[40].mxu0  ;;  %v2933_v49 = vsel %vm2871_vm0, %v2762_v42, %v2790_v3 }
 0x1c0   :  { %v8180_v53 = vadd.f32 %v6220_v46, %v7863_v9  ;;  %v2286_v61 = vpop.f32.mrb[41].mxu0  ;;  %v2818_v46 = vrot.slane %v8075_v24, 7 }
 0x1c1   :  { %v8185_v18 = vadd.f32 %v2286_v61, %v7866_v22  ;;  %v2846_v22 = vrot.slane %v8072_v30, 7 }
 0x1c2   :  { %11234 = vst [vmem:[#allocation47_spill] sm:$0xff] %v8180_v53  ;;  %3698 = vrot.lane.b32.xlu1 %v8060_v39, %s6675_s0 }
 0x1c3   :  { %11235 = vst [vmem:[#allocation48_spill] sm:$0xff] %v8185_v18  ;;  %3696 = vrot.lane.b32.xlu0 %v8064_v50, %s6675_s0  ;;  %v6223_v36 = vpop.f32.mrb[42].mxu0  ;;  %v2961_v61 = vsel %vm2871_vm0, %v2846_v22, %v2762_v42 }
 0x1c4   :  { %v8192_v14 = vadd.f32 %v6223_v36, %v7871_v5  ;;  %v2296_v9 = vpop.f32.mrb[43].mxu0 }
 0x1c5   :  { %v8195_v11 = vadd.f32 %v2296_v9, %v7874_v48 }
 0x1c6   :  { %11236 = vst [vmem:[#allocation49_spill] sm:$0xff] %v8192_v14  ;;  %3138 = vrot.lane.b32.xlu1 %v2933_v49, %s6676_s18 }
 0x1c7   :  { %11237 = vst [vmem:[#allocation50_spill] sm:$0xff] %v8195_v11  ;;  %3700 = vrot.lane.b32.xlu0 %v8075_v24, %s6675_s0  ;;  %v6226_v15 = vpop.f32.mrb[44].mxu0 }
 0x1c8   :  { %v8204_v2 = vadd.f32 %v6226_v15, %v7879_v34  ;;  %v2306_v5 = vpop.f32.mrb[45].mxu0  ;;  %v2905_v15 = vsel %vm2871_vm0, %v2790_v3, %v2818_v46 }
 0x1c9   :  { %v8208_v48 = vadd.f32 %v2306_v5, %v7882_v25  ;;  %v2877_v25 = vsel %vm2871_vm0, %v2818_v46, %v2846_v22  ;;  %v11245_v46 = vld [vmem:[#allocation16_spill] sm:$0xff] }
 0x1ca   :  { %11238 = vst [vmem:[#allocation51_spill] sm:$0xff] %v8204_v2  ;;  %3702 = vrot.lane.b32.xlu1 %v8072_v30, %s6675_s0 }
 0x1cb   :  { %11239 = vst [vmem:[#allocation52_spill] sm:$0xff] %v8208_v48  ;;  %3136 = vrot.lane.b32.xlu0 %v2961_v61, %s6676_s18  ;;  %v6229_v36 = vpop.f32.mrb[46].mxu0  ;;  %v2791_v61 = vrot.slane %v8084_v38, 7 }
 0x1cc   :  { %v8216_v9 = vadd.f32 %v6229_v36, %v7887_v59  ;;  %v2316_v34 = vpop.f32.mrb[47].mxu0 }
 0x1cd   :  { %v8219_v49 = vadd.f32 %v2316_v34, %v7890_v32  ;;  %v2763_v32 = vrot.slane %v8089_v60, 7 }
 0x1ce   :  { %11240 = vst [vmem:[#allocation53_spill] sm:$0xff] %v8216_v9  ;;  %3142 = vrot.lane.b32.xlu1 %v2877_v25, %s6676_s18 }
 0x1cf   :  { %11241 = vst [vmem:[#allocation54_spill] sm:$0xff] %v8219_v49  ;;  %3140 = vrot.lane.b32.xlu0 %v2905_v15, %s6676_s18  ;;  %v6232_v42 = vpop.f32.mrb[48].mxu0  ;;  %v2934_v25 = vsel %vm2871_vm0, %v2763_v32, %v2791_v61 }
 0x1d0   :  { %v8228_v5 = vadd.f32 %v6232_v42, %v7895_v41  ;;  %v2326_v59 = vpop.f32.mrb[49].mxu0  ;;  %v11247_v42 = vld [vmem:[#allocation17_spill] sm:$0xff] }
 0x1d1   :  { %v8233_v36 = vadd.f32 %v2326_v59, %v7898_v44  ;;  %v2847_v44 = vrot.slane %v8096_v63, 7 }
 0x1d2   :  { %11242 = vst [vmem:[#allocation55_spill] sm:$0xff] %v8228_v5  ;;  %3706 = vrot.lane.b32.xlu1 %v8084_v38, %s6675_s0  ;;  %v11251_v38 = vld [vmem:[#allocation18_spill] sm:$0xff] }
 0x1d3   :  { %11243 = vst [vmem:[#allocation56_spill] sm:$0xff] %v8233_v36  ;;  %3704 = vrot.lane.b32.xlu0 %v8089_v60, %s6675_s0  ;;  %v6235_v3 = vpop.f32.mrb[50].mxu0  ;;  %v11249_v60 = vld [vmem:[#allocation26_spill] sm:$0xff] }
 0x1d4   :  { %v8240_v22 = vadd.f32 %v6235_v3, %v7903_v51  ;;  %v2336_v41 = vpop.f32.mrb[51].mxu0  ;;  %v2819_v3 = vrot.slane %v8099_v12, 7 }
 0x1d5   :  { %v8243_v34 = vadd.f32 %v2336_v41, %v11245_v46  ;;  %v2962_v46 = vsel %vm2871_vm0, %v2847_v44, %v2763_v32 }
 0x1d6   :  { %11244 = vst [vmem:[#allocation57_spill] sm:$0xff] %v8240_v22  ;;  %3146 = vrot.lane.b32.xlu1 %v2934_v25, %s6676_s18 }
 0x1d7   :  { %11246 = vst [vmem:[#allocation16_spill] sm:$0xff] %v8243_v34  ;;  %3708 = vrot.lane.b32.xlu0 %v8099_v12, %s6675_s0  ;;  %v6238_v15 = vpop.f32.mrb[52].mxu0  ;;  %v2906_v12 = vsel %vm2871_vm0, %v2791_v61, %v2819_v3 }
 0x1d8   :  { %v8252_v59 = vadd.f32 %v6238_v15, %v11247_v42  ;;  %v2346_v51 = vpop.f32.mrb[53].mxu0 }
 0x1d9   :  { %v8256_v41 = vadd.f32 %v2346_v51, %v11249_v60  ;;  %v2878_v60 = vsel %vm2871_vm0, %v2819_v3, %v2847_v44 }
 0x1da   :  { %11248 = vst [vmem:[#allocation17_spill] sm:$0xff] %v8252_v59  ;;  %3710 = vrot.lane.b32.xlu1 %v8096_v63, %s6675_s0 }
 0x1db   :  { %11250 = vst [vmem:[#allocation26_spill] sm:$0xff] %v8256_v41  ;;  %3144 = vrot.lane.b32.xlu0 %v2962_v46, %s6676_s18  ;;  %v6241_v25 = vpop.f32.mrb[54].mxu0 }
 0x1dc   :  { %v8264_v24 = vadd.f32 %v6241_v25, %v11251_v38  ;;  %v2356_v15 = vpop.f32.mrb[55].mxu0  ;;  %v2792_v25 = vrot.slane %v8108_v13, 7 }
 0x1dd   :  { %v8267_v42 = vadd.f32 %v2356_v15, %v7923_v20  ;;  %v6044_v51 = vpop.f32.mrb[56].mxu1  ;;  %v2764_v20 = vrot.slane %v8112_v27, 7 }
 0x1de   :  { %11252 = vst [vmem:[#allocation18_spill] sm:$0xff] %v8264_v24  ;;  %3150 = vrot.lane.b32.xlu1 %v2878_v60, %s6676_s18  ;;  %v1612_v46 = vpop.f32.mrb[57].mxu1 }
 0x1df   :  { %11253 = vst [vmem:[#allocation58_spill] sm:$0xff] %v8267_v42  ;;  %3148 = vrot.lane.b32.xlu0 %v2906_v12, %s6676_s18  ;;  %v6244_v32 = vpop.f32.mrb[56].mxu0 }
 0x1e0   :  { %v8275_v63 = vadd.f32 %v6244_v32, %v6044_v51  ;;  %v2366_v38 = vpop.f32.mrb[57].mxu0 }
 0x1e1   :  { %v8279_v15 = vadd.f32 %v2366_v38, %v1612_v46  ;;  %v6047_v44 = vpop.f32.mrb[58].mxu1  ;;  %v2935_v46 = vsel %vm2871_vm0, %v2764_v20, %v2792_v25  ;;  %v2848_v38 = vrot.slane %v8120_v40, 7 }
 0x1e2   :  { %11254 = vst [vmem:[#allocation59_spill] sm:$0xff] %v8275_v63  ;;  %3714 = vrot.lane.b32.xlu1 %v8108_v13, %s6675_s0  ;;  %v1622_v12 = vpop.f32.mrb[59].mxu1 }
 0x1e3   :  { %11255 = vst [vmem:[#allocation60_spill] sm:$0xff] %v8279_v15  ;;  %3712 = vrot.lane.b32.xlu0 %v8112_v27, %s6675_s0  ;;  %v6247_v61 = vpop.f32.mrb[58].mxu0  ;;  %v2963_v4 = vsel %vm2871_vm0, %v2848_v38, %v2764_v20 }
 0x1e4   :  { %v8285_v3 = vadd.f32 %v6247_v61, %v6047_v44  ;;  %v8287_v60 = vpop.permute.xlu1 %3658  ;;  %v2376_v51 = vpop.f32.mrb[59].mxu0 }
 0x1e5   :  { %v8289_v32 = vadd.f32 %v2376_v51, %v1622_v12  ;;  %v8291_v30 = vpop.permute.xlu0 %3656  ;;  %v6050_v13 = vpop.f32.mrb[60].mxu1  ;;  %v2820_v51 = vrot.slane %v8123_v43, 7 }
 0x1e6   :  { %11256 = vst [vmem:[#allocation61_spill] sm:$0xff] %v8285_v3  ;;  %3154 = vrot.lane.b32.xlu1 %v2935_v46, %s6676_s18  ;;  %v1632_v61 = vpop.f32.mrb[61].mxu1 }
 0x1e7   :  { %11257 = vst [vmem:[#allocation62_spill] sm:$0xff] %v8289_v32  ;;  %3716 = vrot.lane.b32.xlu0 %v8123_v43, %s6675_s0  ;;  %v6250_v44 = vpop.f32.mrb[60].mxu0 }
 0x1e8   :  { %v8299_v27 = vadd.f32 %v6250_v44, %v6050_v13  ;;  %v8301_v50 = vpop.permute.xlu1 %3662  ;;  %v2386_v12 = vpop.f32.mrb[61].mxu0 }
 0x1e9   :  { %v8304_v39 = vadd.f32 %v2386_v12, %v1632_v61  ;;  %v8306_v17 = vpop.permute.xlu0 %3098  ;;  %v6053_v46 = vpop.f32.mrb[62].mxu1 }
 0x1ea   :  { %11258 = vst [vmem:[#allocation63_spill] sm:$0xff] %v8299_v27  ;;  %11260 = vst [vmem:[#allocation65_spill] sm:$0xff] %v8306_v17  ;;  %3718 = vrot.lane.b32.xlu1 %v8120_v40, %s6675_s0  ;;  %v1642_v44 = vpop.f32.mrb[63].mxu1  ;;  %v2879_v40 = vsel %vm2871_vm0, %v2820_v51, %v2848_v38 }
 0x1eb   :  { %11259 = vst [vmem:[#allocation64_spill] sm:$0xff] %v8304_v39  ;;  %3152 = vrot.lane.b32.xlu0 %v2963_v4, %s6676_s18  ;;  %v6253_v13 = vpop.f32.mrb[62].mxu0  ;;  %v2907_v4 = vsel %vm2871_vm0, %v2792_v25, %v2820_v51 }
 0x1ec   :  { %v8313_v0 = vadd.f32 %v6253_v13, %v6053_v46  ;;  %v8315_v26 = vpop.permute.xlu1 %3100  ;;  %v2396_v43 = vpop.f32.mrb[63].mxu0 }
 0x1ed   :  { %11262 = vst [vmem:[#allocation67_spill] sm:$0xff] %v8315_v26  ;;  %v8317_v61 = vadd.f32 %v2396_v43, %v1642_v44  ;;  %v8319_v12 = vpop.permute.xlu0 %3660  ;;  %v6056_v54 = vpop.f32.mrb[64].mxu1  ;;  %v2793_v44 = vrot.slane %v8132_v16, 7 }
 0x1ee   :  { %11261 = vst [vmem:[#allocation66_spill] sm:$0xff] %v8313_v0  ;;  %3158 = vrot.lane.b32.xlu1 %v2879_v40, %s6676_s18  ;;  %v1652_v46 = vpop.f32.mrb[65].mxu1 }
 0x1ef   :  { %11263 = vst [vmem:[#allocation68_spill] sm:$0xff] %v8317_v61  ;;  %3156 = vrot.lane.b32.xlu0 %v2907_v4, %s6676_s18  ;;  %v6256_v20 = vpop.f32.mrb[64].mxu0 }
 0x1f0   :  { %v8327_v13 = vadd.f32 %v6256_v20, %v6056_v54  ;;  %v8329_v56 = vpop.permute.xlu1 %3102  ;;  %v2406_v43 = vpop.f32.mrb[65].mxu0 }
 0x1f1   :  { %11265 = vst [vmem:[#allocation70_spill] sm:$0xff] %v8329_v56  ;;  %v8333_v38 = vadd.f32 %v2406_v43, %v1652_v46  ;;  %v8335_v40 = vpop.permute.xlu0 %3096  ;;  %v6059_v25 = vpop.f32.mrb[66].mxu1  ;;  %v2936_v43 = vsel %vm2871_vm0, %v2765_v55, %v2793_v44 }
 0x1f2   :  { %11264 = vst [vmem:[#allocation69_spill] sm:$0xff] %v8327_v13  ;;  %11267 = vst [vmem:[#allocation72_spill] sm:$0xff] %v8335_v40  ;;  %3722 = vrot.lane.b32.xlu1 %v8132_v16, %s6675_s0  ;;  %v1662_v51 = vpop.f32.mrb[67].mxu1  ;;  %v2849_v16 = vrot.slane %v8144_v58, 7 }
 0x1f3   :  { %11266 = vst [vmem:[#allocation71_spill] sm:$0xff] %v8333_v38  ;;  %3720 = vrot.lane.b32.xlu0 %v8137_v10, %s6675_s0  ;;  %v6259_v54 = vpop.f32.mrb[66].mxu0 }
 0x1f4   :  { %v8341_v4 = vadd.f32 %v6259_v54, %v6059_v25  ;;  %v8343_v20 = vpop.permute.xlu1 %3666  ;;  %v2416_v47 = vpop.f32.mrb[67].mxu0  ;;  %v2964_v21 = vsel %vm2871_vm0, %v2849_v16, %v2765_v55 }
 0x1f5   :  { %v8345_v23 = vadd.f32 %v2416_v47, %v1662_v51  ;;  %v8347_v46 = vpop.permute.xlu0 %3664  ;;  %v6062_v33 = vpop.f32.mrb[68].mxu1  ;;  %v2821_v51 = vrot.slane %v8147_v7, 7 }
 0x1f6   :  { %11268 = vst [vmem:[#allocation73_spill] sm:$0xff] %v8341_v4  ;;  %3162 = vrot.lane.b32.xlu1 %v2936_v43, %s6676_s18  ;;  %v1672_v54 = vpop.f32.mrb[69].mxu1 }
 0x1f7   :  { %11269 = vst [vmem:[#allocation74_spill] sm:$0xff] %v8345_v23  ;;  %3724 = vrot.lane.b32.xlu0 %v8147_v7, %s6675_s0  ;;  %v6262_v25 = vpop.f32.mrb[68].mxu0 }
 0x1f8   :  { %v8355_v10 = vadd.f32 %v6262_v25, %v6062_v33  ;;  %v8357_v37 = vpop.permute.xlu1 %3106  ;;  %v2426_v47 = vpop.f32.mrb[69].mxu0 }
 0x1f9   :  { %11271 = vst [vmem:[#allocation76_spill] sm:$0xff] %v8357_v37  ;;  %v8360_v1 = vadd.f32 %v2426_v47, %v1672_v54  ;;  %v8362_v62 = vpop.permute.xlu0 %3668  ;;  %v6065_v43 = vpop.f32.mrb[70].mxu1 }
 0x1fa   :  { %11270 = vst [vmem:[#allocation75_spill] sm:$0xff] %v8355_v10  ;;  %3726 = vrot.lane.b32.xlu1 %v8144_v58, %s6675_s0  ;;  %v1682_v25 = vpop.f32.mrb[71].mxu1  ;;  %v2880_v58 = vsel %vm2871_vm0, %v2821_v51, %v2849_v16 }
 0x1fb   :  { %11272 = vst [vmem:[#allocation77_spill] sm:$0xff] %v8360_v1  ;;  %3160 = vrot.lane.b32.xlu0 %v2964_v21, %s6676_s18  ;;  %v6265_v33 = vpop.f32.mrb[70].mxu0  ;;  %v2908_v21 = vsel %vm2871_vm0, %v2793_v44, %v2821_v51 }
 0x1fc   :  { %v8369_v19 = vadd.f32 %v6265_v33, %v6065_v43  ;;  %v8371_v37 = vpop.permute.xlu1 %3670  ;;  %v2436_v7 = vpop.f32.mrb[71].mxu0 }
 0x1fd   :  { %v8373_v54 = vadd.f32 %v2436_v7, %v1682_v25  ;;  %v8375_v47 = vpop.permute.xlu0 %3104  ;;  %v6068_v52 = vpop.f32.mrb[72].mxu1  ;;  %v2794_v25 = vrot.slane %v8156_v45, 7 }
 0x1fe   :  { %11273 = vst [vmem:[#allocation78_spill] sm:$0xff] %v8369_v19  ;;  %11275 = vst [vmem:[#allocation80_spill] sm:$0xff] %v8375_v47  ;;  %3166 = vrot.lane.b32.xlu1 %v2880_v58, %s6676_s18  ;;  %v1692_v43 = vpop.f32.mrb[73].mxu1  ;;  %v2766_v47 = vrot.slane %v8160_v35, 7 }
 0x1ff   :  { %11274 = vst [vmem:[#allocation79_spill] sm:$0xff] %v8373_v54  ;;  %3164 = vrot.lane.b32.xlu0 %v2908_v21, %s6676_s18  ;;  %v6268_v55 = vpop.f32.mrb[72].mxu0 }
 0x200   :  { %v8383_v33 = vadd.f32 %v6268_v55, %v6068_v52  ;;  %v8385_v29 = vpop.permute.xlu1 %3110  ;;  %v2446_v7 = vpop.f32.mrb[73].mxu0 }
 0x201   :  { %11277 = vst [vmem:[#allocation82_spill] sm:$0xff] %v8385_v29  ;;  %v8389_v16 = vadd.f32 %v2446_v7, %v1692_v43  ;;  %v8391_v58 = vpop.permute.xlu0 %3108  ;;  %v6071_v44 = vpop.f32.mrb[74].mxu1  ;;  %v2937_v7 = vsel %vm2871_vm0, %v2766_v47, %v2794_v25 }
 0x202   :  { %11276 = vst [vmem:[#allocation81_spill] sm:$0xff] %v8383_v33  ;;  %11279 = vst [vmem:[#allocation84_spill] sm:$0xff] %v8391_v58  ;;  %3730 = vrot.lane.b32.xlu1 %v8156_v45, %s6675_s0  ;;  %v1702_v51 = vpop.f32.mrb[75].mxu1  ;;  %v2850_v45 = vrot.slane %v8168_v28, 7 }
 0x203   :  { %11278 = vst [vmem:[#allocation83_spill] sm:$0xff] %v8389_v16  ;;  %3728 = vrot.lane.b32.xlu0 %v8160_v35, %s6675_s0  ;;  %v6271_v52 = vpop.f32.mrb[74].mxu0 }
 0x204   :  { %v8397_v21 = vadd.f32 %v6271_v52, %v6071_v44  ;;  %v8399_v55 = vpop.permute.xlu1 %3674  ;;  %v2456_v29 = vpop.f32.mrb[75].mxu0  ;;  %v2965_v57 = vsel %vm2871_vm0, %v2850_v45, %v2766_v47 }
 0x205   :  { %v8401_v26 = vadd.f32 %v2456_v29, %v1702_v51  ;;  %v8403_v43 = vpop.permute.xlu0 %3672  ;;  %v6074_v58 = vpop.f32.mrb[76].mxu1  ;;  %v2822_v51 = vrot.slane %v8171_v31, 7 }
 0x206   :  { %11280 = vst [vmem:[#allocation85_spill] sm:$0xff] %v8397_v21  ;;  %3170 = vrot.lane.b32.xlu1 %v2937_v7, %s6676_s18  ;;  %v1712_v52 = vpop.f32.mrb[77].mxu1 }
 0x207   :  { %11281 = vst [vmem:[#allocation86_spill] sm:$0xff] %v8401_v26  ;;  %3732 = vrot.lane.b32.xlu0 %v8171_v31, %s6675_s0  ;;  %v6274_v44 = vpop.f32.mrb[76].mxu0 }
 0x208   :  { %v8411_v35 = vadd.f32 %v6274_v44, %v6074_v58  ;;  %v8413_v17 = vpop.permute.xlu1 %3114  ;;  %v2466_v29 = vpop.f32.mrb[77].mxu0 }
 0x209   :  { %11283 = vst [vmem:[#allocation88_spill] sm:$0xff] %v8413_v17  ;;  %v8416_v8 = vadd.f32 %v2466_v29, %v1712_v52  ;;  %v8418_v40 = vpop.permute.xlu0 %3676  ;;  %v6077_v7 = vpop.f32.mrb[78].mxu1 }
 0x20a   :  { %11282 = vst [vmem:[#allocation87_spill] sm:$0xff] %v8411_v35  ;;  %3734 = vrot.lane.b32.xlu1 %v8168_v28, %s6675_s0  ;;  %v1722_v44 = vpop.f32.mrb[79].mxu1  ;;  %v2881_v28 = vsel %vm2871_vm0, %v2822_v51, %v2850_v45 }
 0x20b   :  { %11284 = vst [vmem:[#allocation89_spill] sm:$0xff] %v8416_v8  ;;  %3168 = vrot.lane.b32.xlu0 %v2965_v57, %s6676_s18  ;;  %v6277_v58 = vpop.f32.mrb[78].mxu0  ;;  %v2909_v57 = vsel %vm2871_vm0, %v2794_v25, %v2822_v51 }
 0x20c   :  { %v8425_v56 = vadd.f32 %v6277_v58, %v6077_v7  ;;  %v8427_v17 = vpop.permute.xlu1 %3678  ;;  %v2476_v31 = vpop.f32.mrb[79].mxu0 }
 0x20d   :  { %v8429_v52 = vadd.f32 %v2476_v31, %v1722_v44  ;;  %v8431_v29 = vpop.permute.xlu0 %3112  ;;  %v6080_v8 = vpop.f32.mrb[80].mxu1  ;;  %v2795_v44 = vrot.slane %v8180_v53, 7 }
 0x20e   :  { %11285 = vst [vmem:[#allocation90_spill] sm:$0xff] %v8425_v56  ;;  %11287 = vst [vmem:[#allocation92_spill] sm:$0xff] %v8431_v29  ;;  %3174 = vrot.lane.b32.xlu1 %v2881_v28, %s6676_s18  ;;  %v1732_v7 = vpop.f32.mrb[81].mxu1  ;;  %v2767_v29 = vrot.slane %v8185_v18, 7 }
 0x20f   :  { %11286 = vst [vmem:[#allocation91_spill] sm:$0xff] %v8429_v52  ;;  %3172 = vrot.lane.b32.xlu0 %v2909_v57, %s6676_s18  ;;  %v6280_v47 = vpop.f32.mrb[80].mxu0 }
 0x210   :  { %v8439_v58 = vadd.f32 %v6280_v47, %v6080_v8  ;;  %v8441_v56 = vpop.permute.xlu1 %3118  ;;  %v2486_v31 = vpop.f32.mrb[81].mxu0 }
 0x211   :  { %11289 = vst [vmem:[#allocation94_spill] sm:$0xff] %v8441_v56  ;;  %v8445_v45 = vadd.f32 %v2486_v31, %v1732_v7  ;;  %v8447_v28 = vpop.permute.xlu0 %3116  ;;  %v6083_v25 = vpop.f32.mrb[82].mxu1  ;;  %v2938_v31 = vsel %vm2871_vm0, %v2767_v29, %v2795_v44 }
 0x212   :  { %11288 = vst [vmem:[#allocation93_spill] sm:$0xff] %v8439_v58  ;;  %11291 = vst [vmem:[#allocation96_spill] sm:$0xff] %v8447_v28  ;;  %3738 = vrot.lane.b32.xlu1 %v8180_v53, %s6675_s0  ;;  %v1742_v51 = vpop.f32.mrb[83].mxu1  ;;  %v2851_v53 = vrot.slane %v8192_v14, 7 }
 0x213   :  { %11290 = vst [vmem:[#allocation95_spill] sm:$0xff] %v8445_v45  ;;  %3736 = vrot.lane.b32.xlu0 %v8185_v18, %s6675_s0  ;;  %v6283_v8 = vpop.f32.mrb[82].mxu0 }
 0x214   :  { %v8453_v57 = vadd.f32 %v6283_v8, %v6083_v25  ;;  %v8455_v47 = vpop.permute.xlu1 %3682  ;;  %v2496_v56 = vpop.f32.mrb[83].mxu0  ;;  %v2966_v52 = vsel %vm2871_vm0, %v2851_v53, %v2767_v29 }
 0x215   :  { %v8457_v58 = vadd.f32 %v2496_v56, %v1742_v51  ;;  %v8459_v7 = vpop.permute.xlu0 %3680  ;;  %v6086_v28 = vpop.f32.mrb[84].mxu1  ;;  %v2823_v51 = vrot.slane %v8195_v11, 7 }
 0x216   :  { %11292 = vst [vmem:[#allocation97_spill] sm:$0xff] %v8453_v57  ;;  %3178 = vrot.lane.b32.xlu1 %v2938_v31, %s6676_s18  ;;  %v1752_v8 = vpop.f32.mrb[85].mxu1 }
 0x217   :  { %11293 = vst [vmem:[#allocation98_spill] sm:$0xff] %v8457_v58  ;;  %3740 = vrot.lane.b32.xlu0 %v8195_v11, %s6675_s0  ;;  %v6286_v25 = vpop.f32.mrb[84].mxu0 }
 0x218   :  { %v8467_v18 = vadd.f32 %v6286_v25, %v6086_v28  ;;  %v8469_v57 = vpop.permute.xlu1 %3122  ;;  %v2506_v56 = vpop.f32.mrb[85].mxu0 }
 0x219   :  { %11295 = vst [vmem:[#allocation100_spill] sm:$0xff] %v8469_v57  ;;  %v8472_v58 = vadd.f32 %v2506_v56, %v1752_v8  ;;  %v8474_v45 = vpop.permute.xlu0 %3684  ;;  %v6089_v31 = vpop.f32.mrb[86].mxu1 }
 0x21a   :  { %11294 = vst [vmem:[#allocation99_spill] sm:$0xff] %v8467_v18  ;;  %3742 = vrot.lane.b32.xlu1 %v8192_v14, %s6675_s0  ;;  %v1762_v25 = vpop.f32.mrb[87].mxu1  ;;  %v2882_v14 = vsel %vm2871_vm0, %v2823_v51, %v2851_v53 }
 0x21b   :  { %11296 = vst [vmem:[#allocation101_spill] sm:$0xff] %v8472_v58  ;;  %3176 = vrot.lane.b32.xlu0 %v2966_v52, %s6676_s18  ;;  %v6289_v28 = vpop.f32.mrb[86].mxu0  ;;  %v2910_v52 = vsel %vm2871_vm0, %v2795_v44, %v2823_v51 }
 0x21c   :  { %v8481_v18 = vadd.f32 %v6289_v28, %v6089_v31  ;;  %v8483_v57 = vpop.permute.xlu1 %3686  ;;  %v2516_v11 = vpop.f32.mrb[87].mxu0 }
 0x21d   :  { %v8485_v8 = vadd.f32 %v2516_v11, %v1762_v25  ;;  %v8487_v56 = vpop.permute.xlu0 %3120  ;;  %v6092_v58 = vpop.f32.mrb[88].mxu1  ;;  %v2796_v25 = vrot.slane %v8204_v2, 7 }
 0x21e   :  { %11297 = vst [vmem:[#allocation102_spill] sm:$0xff] %v8481_v18  ;;  %11299 = vst [vmem:[#allocation104_spill] sm:$0xff] %v8487_v56  ;;  %3182 = vrot.lane.b32.xlu1 %v2882_v14, %s6676_s18  ;;  %v1772_v31 = vpop.f32.mrb[89].mxu1  ;;  %v2768_v56 = vrot.slane %v8208_v48, 7 }
 0x21f   :  { %11298 = vst [vmem:[#allocation103_spill] sm:$0xff] %v8485_v8  ;;  %3180 = vrot.lane.b32.xlu0 %v2910_v52, %s6676_s18  ;;  %v6292_v29 = vpop.f32.mrb[88].mxu0 }
 0x220   :  { %v8495_v28 = vadd.f32 %v6292_v29, %v6092_v58  ;;  %v8497_v18 = vpop.permute.xlu1 %3126  ;;  %v2526_v11 = vpop.f32.mrb[89].mxu0 }
 0x221   :  { %11301 = vst [vmem:[#allocation106_spill] sm:$0xff] %v8497_v18  ;;  %v8501_v53 = vadd.f32 %v2526_v11, %v1772_v31  ;;  %v8503_v14 = vpop.permute.xlu0 %3124  ;;  %v6095_v44 = vpop.f32.mrb[90].mxu1  ;;  %v2939_v11 = vsel %vm2871_vm0, %v2768_v56, %v2796_v25 }
 0x222   :  { %11300 = vst [vmem:[#allocation105_spill] sm:$0xff] %v8495_v28  ;;  %11303 = vst [vmem:[#allocation108_spill] sm:$0xff] %v8503_v14  ;;  %3746 = vrot.lane.b32.xlu1 %v8204_v2, %s6675_s0  ;;  %v1782_v51 = vpop.f32.mrb[91].mxu1  ;;  %v2852_v2 = vrot.slane %v8216_v9, 7 }
 0x223   :  { %11302 = vst [vmem:[#allocation107_spill] sm:$0xff] %v8501_v53  ;;  %3744 = vrot.lane.b32.xlu0 %v8208_v48, %s6675_s0  ;;  %v6295_v58 = vpop.f32.mrb[90].mxu0 }
 0x224   :  { %v8509_v52 = vadd.f32 %v6295_v58, %v6095_v44  ;;  %v8511_v29 = vpop.permute.xlu1 %3690  ;;  %v2536_v18 = vpop.f32.mrb[91].mxu0  ;;  %v2967_v8 = vsel %vm2871_vm0, %v2852_v2, %v2768_v56 }
 0x225   :  { %v8513_v28 = vadd.f32 %v2536_v18, %v1782_v51  ;;  %v8515_v31 = vpop.permute.xlu0 %3688  ;;  %v6098_v14 = vpop.f32.mrb[92].mxu1  ;;  %v2824_v51 = vrot.slane %v8219_v49, 7 }
 0x226   :  { %11304 = vst [vmem:[#allocation109_spill] sm:$0xff] %v8509_v52  ;;  %3186 = vrot.lane.b32.xlu1 %v2939_v11, %s6676_s18  ;;  %v1792_v58 = vpop.f32.mrb[93].mxu1 }
 0x227   :  { %11305 = vst [vmem:[#allocation110_spill] sm:$0xff] %v8513_v28  ;;  %3748 = vrot.lane.b32.xlu0 %v8219_v49, %s6675_s0  ;;  %v6298_v44 = vpop.f32.mrb[92].mxu0 }
 0x228   :  { %v8523_v48 = vadd.f32 %v6298_v44, %v6098_v14  ;;  %v8525_v52 = vpop.permute.xlu1 %3130  ;;  %v2546_v18 = vpop.f32.mrb[93].mxu0 }
 0x229   :  { %11307 = vst [vmem:[#allocation112_spill] sm:$0xff] %v8525_v52  ;;  %v8528_v28 = vadd.f32 %v2546_v18, %v1792_v58  ;;  %v8530_v53 = vpop.permute.xlu0 %3692  ;;  %v6101_v11 = vpop.f32.mrb[94].mxu1 }
 0x22a   :  { %11306 = vst [vmem:[#allocation111_spill] sm:$0xff] %v8523_v48  ;;  %3750 = vrot.lane.b32.xlu1 %v8216_v9, %s6675_s0  ;;  %v1802_v44 = vpop.f32.mrb[95].mxu1  ;;  %v2883_v9 = vsel %vm2871_vm0, %v2824_v51, %v2852_v2 }
 0x22b   :  { %11308 = vst [vmem:[#allocation113_spill] sm:$0xff] %v8528_v28  ;;  %3184 = vrot.lane.b32.xlu0 %v2967_v8, %s6676_s18  ;;  %v6301_v14 = vpop.f32.mrb[94].mxu0  ;;  %v2911_v8 = vsel %vm2871_vm0, %v2796_v25, %v2824_v51 }
 0x22c   :  { %v8537_v48 = vadd.f32 %v6301_v14, %v6101_v11  ;;  %v8539_v52 = vpop.permute.xlu1 %3694  ;;  %v2556_v49 = vpop.f32.mrb[95].mxu0 }
 0x22d   :  { %v8541_v58 = vadd.f32 %v2556_v49, %v1802_v44  ;;  %v8543_v18 = vpop.permute.xlu0 %3128  ;;  %v6104_v28 = vpop.f32.mrb[96].mxu1  ;;  %v2797_v44 = vrot.slane %v8228_v5, 7 }
 0x22e   :  { %11309 = vst [vmem:[#allocation114_spill] sm:$0xff] %v8537_v48  ;;  %11311 = vst [vmem:[#allocation116_spill] sm:$0xff] %v8543_v18  ;;  %3190 = vrot.lane.b32.xlu1 %v2883_v9, %s6676_s18  ;;  %v1812_v11 = vpop.f32.mrb[97].mxu1  ;;  %v2769_v18 = vrot.slane %v8233_v36, 7 }
 0x22f   :  { %11310 = vst [vmem:[#allocation115_spill] sm:$0xff] %v8541_v58  ;;  %3188 = vrot.lane.b32.xlu0 %v2911_v8, %s6676_s18  ;;  %v6304_v56 = vpop.f32.mrb[96].mxu0 }
 0x230   :  { %v8551_v14 = vadd.f32 %v6304_v56, %v6104_v28  ;;  %v8553_v48 = vpop.permute.xlu1 %3134  ;;  %v2566_v49 = vpop.f32.mrb[97].mxu0 }
 0x231   :  { %11313 = vst [vmem:[#allocation118_spill] sm:$0xff] %v8553_v48  ;;  %v8557_v2 = vadd.f32 %v2566_v49, %v1812_v11  ;;  %v8559_v9 = vpop.permute.xlu0 %3132  ;;  %v6107_v25 = vpop.f32.mrb[98].mxu1  ;;  %v2940_v49 = vsel %vm2871_vm0, %v2769_v18, %v2797_v44 }
 0x232   :  { %11312 = vst [vmem:[#allocation117_spill] sm:$0xff] %v8551_v14  ;;  %11315 = vst [vmem:[#allocation120_spill] sm:$0xff] %v8559_v9  ;;  %3754 = vrot.lane.b32.xlu1 %v8228_v5, %s6675_s0  ;;  %v1822_v51 = vpop.f32.mrb[99].mxu1  ;;  %v2853_v5 = vrot.slane %v8240_v22, 7 }
 0x233   :  { %11314 = vst [vmem:[#allocation119_spill] sm:$0xff] %v8557_v2  ;;  %3752 = vrot.lane.b32.xlu0 %v8233_v36, %s6675_s0  ;;  %v6307_v28 = vpop.f32.mrb[98].mxu0 }
 0x234   :  { %v8565_v8 = vadd.f32 %v6307_v28, %v6107_v25  ;;  %v8567_v56 = vpop.permute.xlu1 %3698  ;;  %v2576_v48 = vpop.f32.mrb[99].mxu0  ;;  %v2968_v58 = vsel %vm2871_vm0, %v2853_v5, %v2769_v18 }
 0x235   :  { %v8569_v14 = vadd.f32 %v2576_v48, %v1822_v51  ;;  %v8571_v11 = vpop.permute.xlu0 %3696  ;;  %v6110_v9 = vpop.f32.mrb[100].mxu1  ;;  %v2825_v51 = vrot.slane %v8243_v34, 7 }
 0x236   :  { %11316 = vst [vmem:[#allocation121_spill] sm:$0xff] %v8565_v8  ;;  %3194 = vrot.lane.b32.xlu1 %v2940_v49, %s6676_s18  ;;  %v1832_v28 = vpop.f32.mrb[101].mxu1 }
 0x237   :  { %11317 = vst [vmem:[#allocation122_spill] sm:$0xff] %v8569_v14  ;;  %3756 = vrot.lane.b32.xlu0 %v8243_v34, %s6675_s0  ;;  %v6310_v25 = vpop.f32.mrb[100].mxu0 }
 0x238   :  { %v8579_v36 = vadd.f32 %v6310_v25, %v6110_v9  ;;  %v8581_v8 = vpop.permute.xlu1 %3138  ;;  %v2586_v48 = vpop.f32.mrb[101].mxu0 }
 0x239   :  { %11319 = vst [vmem:[#allocation124_spill] sm:$0xff] %v8581_v8  ;;  %v8584_v14 = vadd.f32 %v2586_v48, %v1832_v28  ;;  %v8586_v2 = vpop.permute.xlu0 %3700  ;;  %v6113_v49 = vpop.f32.mrb[102].mxu1 }
 0x23a   :  { %11318 = vst [vmem:[#allocation123_spill] sm:$0xff] %v8579_v36  ;;  %3758 = vrot.lane.b32.xlu1 %v8240_v22, %s6675_s0  ;;  %v1842_v25 = vpop.f32.mrb[103].mxu1  ;;  %v2884_v22 = vsel %vm2871_vm0, %v2825_v51, %v2853_v5 }
 0x23b   :  { %11320 = vst [vmem:[#allocation125_spill] sm:$0xff] %v8584_v14  ;;  %3192 = vrot.lane.b32.xlu0 %v2968_v58, %s6676_s18  ;;  %v6313_v9 = vpop.f32.mrb[102].mxu0  ;;  %v2912_v58 = vsel %vm2871_vm0, %v2797_v44, %v2825_v51 }
 0x23c   :  { %v8593_v36 = vadd.f32 %v6313_v9, %v6113_v49  ;;  %v8595_v8 = vpop.permute.xlu1 %3702  ;;  %v2596_v34 = vpop.f32.mrb[103].mxu0 }
 0x23d   :  { %v8597_v28 = vadd.f32 %v2596_v34, %v1842_v25  ;;  %v8599_v48 = vpop.permute.xlu0 %3136  ;;  %v6116_v14 = vpop.f32.mrb[104].mxu1  ;;  %v2798_v25 = vrot.slane %v8252_v59, 7 }
 0x23e   :  { %11321 = vst [vmem:[#allocation126_spill] sm:$0xff] %v8593_v36  ;;  %11323 = vst [vmem:[#allocation128_spill] sm:$0xff] %v8599_v48  ;;  %3198 = vrot.lane.b32.xlu1 %v2884_v22, %s6676_s18  ;;  %v1852_v49 = vpop.f32.mrb[105].mxu1  ;;  %v2770_v48 = vrot.slane %v8256_v41, 7 }
 0x23f   :  { %11322 = vst [vmem:[#allocation127_spill] sm:$0xff] %v8597_v28  ;;  %3196 = vrot.lane.b32.xlu0 %v2912_v58, %s6676_s18  ;;  %v6316_v18 = vpop.f32.mrb[104].mxu0 }
 0x240   :  { %v8607_v9 = vadd.f32 %v6316_v18, %v6116_v14  ;;  %v8609_v36 = vpop.permute.xlu1 %3142  ;;  %v2606_v34 = vpop.f32.mrb[105].mxu0 }
 0x241   :  { %11325 = vst [vmem:[#allocation130_spill] sm:$0xff] %v8609_v36  ;;  %v8613_v5 = vadd.f32 %v2606_v34, %v1852_v49  ;;  %v8615_v22 = vpop.permute.xlu0 %3140  ;;  %v6119_v44 = vpop.f32.mrb[106].mxu1  ;;  %v2941_v34 = vsel %vm2871_vm0, %v2770_v48, %v2798_v25 }
 0x242   :  { %11324 = vst [vmem:[#allocation129_spill] sm:$0xff] %v8607_v9  ;;  %11327 = vst [vmem:[#allocation132_spill] sm:$0xff] %v8615_v22  ;;  %3762 = vrot.lane.b32.xlu1 %v8252_v59, %s6675_s0  ;;  %v1862_v51 = vpop.f32.mrb[107].mxu1  ;;  %v2854_v59 = vrot.slane %v8264_v24, 7 }
 0x243   :  { %11326 = vst [vmem:[#allocation131_spill] sm:$0xff] %v8613_v5  ;;  %3760 = vrot.lane.b32.xlu0 %v8256_v41, %s6675_s0  ;;  %v6319_v14 = vpop.f32.mrb[106].mxu0 }
 0x244   :  { %v8621_v58 = vadd.f32 %v6319_v14, %v6119_v44  ;;  %v8623_v18 = vpop.permute.xlu1 %3706  ;;  %v2616_v36 = vpop.f32.mrb[107].mxu0  ;;  %v2969_v28 = vsel %vm2871_vm0, %v2854_v59, %v2770_v48 }
 0x245   :  { %v8625_v9 = vadd.f32 %v2616_v36, %v1862_v51  ;;  %v8627_v49 = vpop.permute.xlu0 %3704  ;;  %v6122_v22 = vpop.f32.mrb[108].mxu1  ;;  %v2826_v51 = vrot.slane %v8267_v42, 7 }
 0x246   :  { %11328 = vst [vmem:[#allocation133_spill] sm:$0xff] %v8621_v58  ;;  %3202 = vrot.lane.b32.xlu1 %v2941_v34, %s6676_s18  ;;  %v1872_v14 = vpop.f32.mrb[109].mxu1 }
 0x247   :  { %11329 = vst [vmem:[#allocation134_spill] sm:$0xff] %v8625_v9  ;;  %3764 = vrot.lane.b32.xlu0 %v8267_v42, %s6675_s0  ;;  %v6322_v44 = vpop.f32.mrb[108].mxu0  ;;  %v2913_v48 = vsel %vm2871_vm0, %v2798_v25, %v2826_v51 }
 0x248   :  { %v8635_v41 = vadd.f32 %v6322_v44, %v6122_v22  ;;  %v8637_v58 = vpop.permute.xlu1 %3146  ;;  %v2626_v36 = vpop.f32.mrb[109].mxu0 }
 0x249   :  { %11331 = vst [vmem:[#allocation136_spill] sm:$0xff] %v8637_v58  ;;  %v8640_v9 = vadd.f32 %v2626_v36, %v1872_v14  ;;  %v8642_v5 = vpop.permute.xlu0 %3708  ;;  %v6125_v34 = vpop.f32.mrb[110].mxu1 }
 0x24a   :  { %11330 = vst [vmem:[#allocation135_spill] sm:$0xff] %v8635_v41  ;;  %3766 = vrot.lane.b32.xlu1 %v8264_v24, %s6675_s0  ;;  %v1882_v44 = vpop.f32.mrb[111].mxu1  ;;  %v2885_v24 = vsel %vm2871_vm0, %v2826_v51, %v2854_v59  ;;  %v2855_v51 = vrot.slane %v8285_v3, 7 }
 0x24b   :  { %11332 = vst [vmem:[#allocation137_spill] sm:$0xff] %v8640_v9  ;;  %3200 = vrot.lane.b32.xlu0 %v2969_v28, %s6676_s18  ;;  %v6325_v22 = vpop.f32.mrb[110].mxu0 }
 0x24c   :  { %v8649_v41 = vadd.f32 %v6325_v22, %v6125_v34  ;;  %v8651_v58 = vpop.permute.xlu1 %3710  ;;  %v2636_v42 = vpop.f32.mrb[111].mxu0  ;;  %v2799_v34 = vrot.slane %v8275_v63, 7  ;;  %v2771_v22 = vrot.slane %v8279_v15, 7 }
 0x24d   :  { %v8653_v14 = vadd.f32 %v2636_v42, %v1882_v44  ;;  %v8655_v36 = vpop.permute.xlu0 %3144 }
 0x24e   :  { %11333 = vst [vmem:[#allocation138_spill] sm:$0xff] %v8649_v41  ;;  %11335 = vst [vmem:[#allocation140_spill] sm:$0xff] %v8655_v36  ;;  %3206 = vrot.lane.b32.xlu1 %v2885_v24, %s6676_s18  ;;  %v2942_v25 = vsel %vm2871_vm0, %v2771_v22, %v2799_v34 }
 0x24f   :  { %11334 = vst [vmem:[#allocation139_spill] sm:$0xff] %v8653_v14  ;;  %3204 = vrot.lane.b32.xlu0 %v2913_v48, %s6676_s18  ;;  %v2827_v48 = vrot.slane %v8289_v32, 7 }
 0x250   :  { %v8663_v28 = vpop.permute.xlu1 %3150 }
 0x251   :  { %11336 = vst [vmem:[#allocation141_spill] sm:$0xff] %v8663_v28  ;;  %v8667_v42 = vpop.permute.xlu0 %3148  ;;  %v2970_v28 = vsel %vm2871_vm0, %v2855_v51, %v2771_v22 }
 0x252   :  { %11337 = vst [vmem:[#allocation142_spill] sm:$0xff] %v8667_v42  ;;  %3770 = vrot.lane.b32.xlu1 %v8275_v63, %s6675_s0  ;;  %v3992_v42 = vrot.slane %v8291_v30, 1 }
 0x253   :  { %3768 = vrot.lane.b32.xlu0 %v8279_v15, %s6675_s0  ;;  %v4020_v15 = vrot.slane %v8287_v60, 1 }
 0x254   :  { %v8673_v24 = vpop.permute.xlu1 %3714 }
 0x255   :  { %v8675_v59 = vpop.permute.xlu0 %3712  ;;  %v4161_v30 = vsel %vm4104_vm1, %v3992_v42, %v4020_v15 }
 0x256   :  { %3210 = vrot.lane.b32.xlu1 %v2942_v25, %s6676_s18 }
 0x257   :  { %3772 = vrot.lane.b32.xlu0 %v8289_v32, %s6675_s0  ;;  %v2886_v32 = vsel %vm2871_vm0, %v2827_v48, %v2855_v51  ;;  %v4048_v51 = vrot.slane %v8319_v12, 1 }
 0x258   :  { %v8683_v44 = vpop.permute.xlu1 %3154 }
 0x259   :  { %11338 = vst [vmem:[#allocation143_spill] sm:$0xff] %v8683_v44  ;;  %v8686_v63 = vpop.permute.xlu0 %3716  ;;  %v4133_v12 = vsel %vm4104_vm1, %v4020_v15, %v4048_v51 }
 0x25a   :  { %3774 = vrot.lane.b32.xlu1 %v8285_v3, %s6675_s0  ;;  %v2914_v3 = vsel %vm2871_vm0, %v2799_v34, %v2827_v48  ;;  %v2800_v34 = vrot.slane %v8299_v27, 7 }
 0x25b   :  { %3208 = vrot.lane.b32.xlu0 %v2970_v28, %s6676_s18  ;;  %v4076_v28 = vrot.slane %v8301_v50, 1 }
 0x25c   :  { %v8696_v25 = vpop.permute.xlu1 %3718 }
 0x25d   :  { %v8698_v44 = vpop.permute.xlu0 %3152 }
 0x25e   :  { %11339 = vst [vmem:[#allocation144_spill] sm:$0xff] %v8698_v44  ;;  %3214 = vrot.lane.b32.xlu1 %v2886_v32, %s6676_s18 }
 0x25f   :  { %4329 = vrot.lane.b32.xlu0 %v4161_v30, %s6676_s18  ;;  %v4189_v30 = vsel %vm4104_vm1, %v4076_v28, %v3992_v42  ;;  %v4105_v42 = vsel %vm4104_vm1, %v4048_v51, %v4076_v28  ;;  %v2828_v28 = vrot.slane %v8317_v61, 7 }
 0x260   :  { %v8706_v60 = vpop.permute.xlu1 %3158 }
 0x261   :  { %11340 = vst [vmem:[#allocation145_spill] sm:$0xff] %v8706_v60  ;;  %v8709_v22 = vpop.permute.xlu0 %3156 }
 0x262   :  { %11341 = vst [vmem:[#allocation146_spill] sm:$0xff] %v8709_v22  ;;  %3778 = vrot.lane.b32.xlu1 %v8299_v27, %s6675_s0 }
 0x263   :  { %3212 = vrot.lane.b32.xlu0 %v2914_v3, %s6676_s18  ;;  %v2772_v3 = vrot.slane %v8304_v39, 7 }
 0x264   :  { %v8716_v32 = vpop.permute.xlu1 %3722 }
 0x265   :  { %v8719_v44 = vpop.permute.xlu0 %3720  ;;  %v2943_v27 = vsel %vm2871_vm0, %v2772_v3, %v2800_v34 }
 0x266   :  { %4335 = vrot.lane.b32.xlu1 %v4189_v30, %s6676_s18 }
 0x267   :  { %3776 = vrot.lane.b32.xlu0 %v8304_v39, %s6675_s0  ;;  %v2856_v39 = vrot.slane %v8313_v0, 7 }
 0x268   :  { %v8726_v50 = vpop.permute.xlu1 %3162 }
 0x269   :  { %11342 = vst [vmem:[#allocation147_spill] sm:$0xff] %v8726_v50  ;;  %v8730_v48 = vpop.permute.xlu0 %3724 }
 0x26a   :  { %4331 = vrot.lane.b32.xlu1 %v4133_v12, %s6676_s18  ;;  %v4021_v12 = vrot.slane %v8343_v20, 1 }
 0x26b   :  { %4333 = vrot.lane.b32.xlu0 %v4105_v42, %s6676_s18  ;;  %v3993_v42 = vrot.slane %v8347_v46, 1 }
 0x26c   :  { %v8738_v30 = vpop.permute.xlu1 %3726 }
 0x26d   :  { %v8740_v22 = vpop.permute.xlu0 %3160  ;;  %v4162_v20 = vsel %vm4104_vm1, %v3993_v42, %v4021_v12 }
 0x26e   :  { %11343 = vst [vmem:[#allocation148_spill] sm:$0xff] %v8740_v22  ;;  %3218 = vrot.lane.b32.xlu1 %v2943_v27, %s6676_s18  ;;  %v2971_v22 = vsel %vm2871_vm0, %v2856_v39, %v2772_v3  ;;  %v4077_v3 = vrot.slane %v8371_v37, 1 }
 0x26f   :  { %3780 = vrot.lane.b32.xlu0 %v8317_v61, %s6675_s0  ;;  %v2887_v61 = vsel %vm2871_vm0, %v2828_v28, %v2856_v39 }
 0x270   :  { %v8748_v15 = vpop.permute.xlu1 %3166 }
 0x271   :  { %11344 = vst [vmem:[#allocation149_spill] sm:$0xff] %v8748_v15  ;;  %v8751_v51 = vpop.permute.xlu0 %3164 }
 0x272   :  { %11345 = vst [vmem:[#allocation150_spill] sm:$0xff] %v8751_v51  ;;  %3782 = vrot.lane.b32.xlu1 %v8313_v0, %s6675_s0 }
 0x273   :  { %3216 = vrot.lane.b32.xlu0 %v2971_v22, %s6676_s18  ;;  %v2915_v22 = vsel %vm2871_vm0, %v2800_v34, %v2828_v28  ;;  %v2801_v34 = vrot.slane %v8327_v13, 7  ;;  %v2773_v28 = vrot.slane %v8333_v38, 7 }
 0x274   :  { %v8760_v27 = vpop.permute.xlu1 %3730 }
 0x275   :  { %v8762_v50 = vpop.permute.xlu0 %3728 }
 0x276   :  { %3222 = vrot.lane.b32.xlu1 %v2887_v61, %s6676_s18  ;;  %v4049_v61 = vrot.slane %v8362_v62, 1 }
 0x277   :  { %4337 = vrot.lane.b32.xlu0 %v4162_v20, %s6676_s18  ;;  %v4190_v20 = vsel %vm4104_vm1, %v4077_v3, %v3993_v42 }
 0x278   :  { %v8770_v46 = vpop.permute.xlu1 %3170  ;;  %v4134_v62 = vsel %vm4104_vm1, %v4021_v12, %v4049_v61  ;;  %v4106_v42 = vsel %vm4104_vm1, %v4049_v61, %v4077_v3  ;;  %v2829_v3 = vrot.slane %v8345_v23, 7 }
 0x279   :  { %11346 = vst [vmem:[#allocation151_spill] sm:$0xff] %v8770_v46  ;;  %v8773_v0 = vpop.permute.xlu0 %3732 }
 0x27a   :  { %3786 = vrot.lane.b32.xlu1 %v8327_v13, %s6675_s0  ;;  %v2944_v13 = vsel %vm2871_vm0, %v2773_v28, %v2801_v34 }
 0x27b   :  { %3220 = vrot.lane.b32.xlu0 %v2915_v22, %s6676_s18 }
 0x27c   :  { %v8780_v39 = vpop.permute.xlu1 %3734 }
 0x27d   :  { %v8783_v51 = vpop.permute.xlu0 %3168 }
 0x27e   :  { %11347 = vst [vmem:[#allocation152_spill] sm:$0xff] %v8783_v51  ;;  %4343 = vrot.lane.b32.xlu1 %v4190_v20, %s6676_s18 }
 0x27f   :  { %3784 = vrot.lane.b32.xlu0 %v8333_v38, %s6675_s0  ;;  %v2857_v38 = vrot.slane %v8341_v4, 7 }
 0x280   :  { %v8790_v37 = vpop.permute.xlu1 %3174 }
 0x281   :  { %11348 = vst [vmem:[#allocation153_spill] sm:$0xff] %v8790_v37  ;;  %v8794_v22 = vpop.permute.xlu0 %3172 }
 0x282   :  { %11349 = vst [vmem:[#allocation154_spill] sm:$0xff] %v8794_v22  ;;  %4339 = vrot.lane.b32.xlu1 %v4134_v62, %s6676_s18  ;;  %v4022_v62 = vrot.slane %v8399_v55, 1  ;;  %v2972_v22 = vsel %vm2871_vm0, %v2857_v38, %v2773_v28  ;;  %v4078_v28 = vrot.slane %v8427_v17, 1 }
 0x283   :  { %4341 = vrot.lane.b32.xlu0 %v4106_v42, %s6676_s18  ;;  %v3994_v42 = vrot.slane %v8403_v43, 1 }
 0x284   :  { %v8802_v20 = vpop.permute.xlu1 %3738 }
 0x285   :  { %v8804_v51 = vpop.permute.xlu0 %3736  ;;  %v4163_v55 = vsel %vm4104_vm1, %v3994_v42, %v4022_v62 }
 0x286   :  { %3226 = vrot.lane.b32.xlu1 %v2944_v13, %s6676_s18 }
 0x287   :  { %3788 = vrot.lane.b32.xlu0 %v8345_v23, %s6675_s0  ;;  %v2888_v23 = vsel %vm2871_vm0, %v2829_v3, %v2857_v38  ;;  %v4050_v38 = vrot.slane %v8418_v40, 1 }
 0x288   :  { %v8812_v12 = vpop.permute.xlu1 %3178 }
 0x289   :  { %11350 = vst [vmem:[#allocation155_spill] sm:$0xff] %v8812_v12  ;;  %v8815_v61 = vpop.permute.xlu0 %3740  ;;  %v4135_v40 = vsel %vm4104_vm1, %v4022_v62, %v4050_v38 }
 0x28a   :  { %3790 = vrot.lane.b32.xlu1 %v8341_v4, %s6675_s0 }
 0x28b   :  { %3224 = vrot.lane.b32.xlu0 %v2972_v22, %s6676_s18  ;;  %v2916_v22 = vsel %vm2871_vm0, %v2801_v34, %v2829_v3  ;;  %v2802_v34 = vrot.slane %v8355_v10, 7  ;;  %v2774_v3 = vrot.slane %v8360_v1, 7 }
 0x28c   :  { %v8824_v13 = vpop.permute.xlu1 %3742 }
 0x28d   :  { %v8826_v37 = vpop.permute.xlu0 %3176 }
 0x28e   :  { %11351 = vst [vmem:[#allocation156_spill] sm:$0xff] %v8826_v37  ;;  %3230 = vrot.lane.b32.xlu1 %v2888_v23, %s6676_s18 }
 0x28f   :  { %4345 = vrot.lane.b32.xlu0 %v4163_v55, %s6676_s18  ;;  %v4191_v55 = vsel %vm4104_vm1, %v4078_v28, %v3994_v42  ;;  %v4107_v42 = vsel %vm4104_vm1, %v4050_v38, %v4078_v28  ;;  %v2830_v28 = vrot.slane %v8373_v54, 7 }
 0x290   :  { %v8834_v43 = vpop.permute.xlu1 %3182 }
 0x291   :  { %11352 = vst [vmem:[#allocation157_spill] sm:$0xff] %v8834_v43  ;;  %v8837_v4 = vpop.permute.xlu0 %3180 }
 0x292   :  { %11353 = vst [vmem:[#allocation158_spill] sm:$0xff] %v8837_v4  ;;  %3794 = vrot.lane.b32.xlu1 %v8355_v10, %s6675_s0  ;;  %v2945_v10 = vsel %vm2871_vm0, %v2774_v3, %v2802_v34 }
 0x293   :  { %3228 = vrot.lane.b32.xlu0 %v2916_v22, %s6676_s18 }
 0x294   :  { %v8844_v23 = vpop.permute.xlu1 %3746 }
 0x295   :  { %v8847_v37 = vpop.permute.xlu0 %3744 }
 0x296   :  { %4351 = vrot.lane.b32.xlu1 %v4191_v55, %s6676_s18 }
 0x297   :  { %3792 = vrot.lane.b32.xlu0 %v8360_v1, %s6675_s0  ;;  %v2858_v1 = vrot.slane %v8369_v19, 7 }
 0x298   :  { %v8854_v17 = vpop.permute.xlu1 %3186 }
 0x299   :  { %11354 = vst [vmem:[#allocation159_spill] sm:$0xff] %v8854_v17  ;;  %v8858_v22 = vpop.permute.xlu0 %3748 }
 0x29a   :  { %4347 = vrot.lane.b32.xlu1 %v4135_v40, %s6676_s18  ;;  %v4023_v40 = vrot.slane %v8455_v47, 1 }
 0x29b   :  { %4349 = vrot.lane.b32.xlu0 %v4107_v42, %s6676_s18  ;;  %v3995_v42 = vrot.slane %v8459_v7, 1 }
 0x29c   :  { %v8866_v55 = vpop.permute.xlu1 %3750 }
 0x29d   :  { %v8868_v4 = vpop.permute.xlu0 %3184  ;;  %v4164_v47 = vsel %vm4104_vm1, %v3995_v42, %v4023_v40 }
 0x29e   :  { %11355 = vst [vmem:[#allocation160_spill] sm:$0xff] %v8868_v4  ;;  %3234 = vrot.lane.b32.xlu1 %v2945_v10, %s6676_s18  ;;  %v2973_v4 = vsel %vm2871_vm0, %v2858_v1, %v2774_v3  ;;  %v4079_v3 = vrot.slane %v8483_v57, 1 }
 0x29f   :  { %3796 = vrot.lane.b32.xlu0 %v8373_v54, %s6675_s0  ;;  %v2889_v54 = vsel %vm2871_vm0, %v2830_v28, %v2858_v1 }
 0x2a0   :  { %v8876_v62 = vpop.permute.xlu1 %3190 }
 0x2a1   :  { %11356 = vst [vmem:[#allocation161_spill] sm:$0xff] %v8876_v62  ;;  %v8879_v38 = vpop.permute.xlu0 %3188 }
 0x2a2   :  { %11357 = vst [vmem:[#allocation162_spill] sm:$0xff] %v8879_v38  ;;  %3798 = vrot.lane.b32.xlu1 %v8369_v19, %s6675_s0 }
 0x2a3   :  { %3232 = vrot.lane.b32.xlu0 %v2973_v4, %s6676_s18  ;;  %v2917_v4 = vsel %vm2871_vm0, %v2802_v34, %v2830_v28  ;;  %v2803_v34 = vrot.slane %v8383_v33, 7  ;;  %v2775_v28 = vrot.slane %v8389_v16, 7 }
 0x2a4   :  { %v8888_v10 = vpop.permute.xlu1 %3754 }
 0x2a5   :  { %v8890_v17 = vpop.permute.xlu0 %3752 }
 0x2a6   :  { %3238 = vrot.lane.b32.xlu1 %v2889_v54, %s6676_s18  ;;  %v4051_v54 = vrot.slane %v8474_v45, 1 }
 0x2a7   :  { %4353 = vrot.lane.b32.xlu0 %v4164_v47, %s6676_s18  ;;  %v4192_v47 = vsel %vm4104_vm1, %v4079_v3, %v3995_v42 }
 0x2a8   :  { %v8898_v7 = vpop.permute.xlu1 %3194  ;;  %v4136_v45 = vsel %vm4104_vm1, %v4023_v40, %v4051_v54  ;;  %v4108_v42 = vsel %vm4104_vm1, %v4051_v54, %v4079_v3  ;;  %v2831_v3 = vrot.slane %v8401_v26, 7 }
 0x2a9   :  { %11358 = vst [vmem:[#allocation163_spill] sm:$0xff] %v8898_v7  ;;  %v8901_v19 = vpop.permute.xlu0 %3756 }
 0x2aa   :  { %3802 = vrot.lane.b32.xlu1 %v8383_v33, %s6675_s0  ;;  %v2946_v33 = vsel %vm2871_vm0, %v2775_v28, %v2803_v34 }
 0x2ab   :  { %3236 = vrot.lane.b32.xlu0 %v2917_v4, %s6676_s18 }
 0x2ac   :  { %v8908_v1 = vpop.permute.xlu1 %3758 }
 0x2ad   :  { %v8911_v38 = vpop.permute.xlu0 %3192 }
 0x2ae   :  { %11359 = vst [vmem:[#allocation164_spill] sm:$0xff] %v8911_v38  ;;  %4359 = vrot.lane.b32.xlu1 %v4192_v47, %s6676_s18 }
 0x2af   :  { %3800 = vrot.lane.b32.xlu0 %v8389_v16, %s6675_s0  ;;  %v2859_v16 = vrot.slane %v8397_v21, 7 }
 0x2b0   :  { %v8918_v57 = vpop.permute.xlu1 %3198 }
 0x2b1   :  { %11360 = vst [vmem:[#allocation165_spill] sm:$0xff] %v8918_v57  ;;  %v8922_v4 = vpop.permute.xlu0 %3196 }
 0x2b2   :  { %11361 = vst [vmem:[#allocation166_spill] sm:$0xff] %v8922_v4  ;;  %4355 = vrot.lane.b32.xlu1 %v4136_v45, %s6676_s18  ;;  %v4024_v45 = vrot.slane %v8511_v29, 1  ;;  %v2974_v4 = vsel %vm2871_vm0, %v2859_v16, %v2775_v28  ;;  %v4080_v28 = vrot.slane %v8539_v52, 1  ;;  %v11366_v52 = vld [vmem:[#allocation89_spill] sm:$0xff] }
 0x2b3   :  { %4357 = vrot.lane.b32.xlu0 %v4108_v42, %s6676_s18  ;;  %v3996_v42 = vrot.slane %v8515_v31, 1 }
 0x2b4   :  { %v8930_v47 = vpop.permute.xlu1 %3762 }
 0x2b5   :  { %v8932_v38 = vpop.permute.xlu0 %3760  ;;  %v4165_v29 = vsel %vm4104_vm1, %v3996_v42, %v4024_v45 }
 0x2b6   :  { %3242 = vrot.lane.b32.xlu1 %v2946_v33, %s6676_s18 }
 0x2b7   :  { %3804 = vrot.lane.b32.xlu0 %v8401_v26, %s6675_s0  ;;  %v2890_v26 = vsel %vm2871_vm0, %v2831_v3, %v2859_v16  ;;  %v4052_v16 = vrot.slane %v8530_v53, 1 }
 0x2b8   :  { %v8940_v40 = vpop.permute.xlu1 %3202 }
 0x2b9   :  { %11362 = vst [vmem:[#allocation167_spill] sm:$0xff] %v8940_v40  ;;  %v8943_v54 = vpop.permute.xlu0 %3764  ;;  %v4137_v53 = vsel %vm4104_vm1, %v4024_v45, %v4052_v16  ;;  %v11370_v45 = vld [vmem:[#allocation91_spill] sm:$0xff] }
 0x2ba   :  { %3806 = vrot.lane.b32.xlu1 %v8397_v21, %s6675_s0 }
 0x2bb   :  { %3240 = vrot.lane.b32.xlu0 %v2974_v4, %s6676_s18  ;;  %v2918_v4 = vsel %vm2871_vm0, %v2803_v34, %v2831_v3  ;;  %v2804_v34 = vrot.slane %v8411_v35, 7  ;;  %v2776_v3 = vrot.slane %v11366_v52, 7 }
 0x2bc   :  { %v8952_v33 = vpop.permute.xlu1 %3766 }
 0x2bd   :  { %v8954_v57 = vpop.permute.xlu0 %3200 }
 0x2be   :  { %11363 = vst [vmem:[#allocation168_spill] sm:$0xff] %v8954_v57  ;;  %3246 = vrot.lane.b32.xlu1 %v2890_v26, %s6676_s18 }
 0x2bf   :  { %4361 = vrot.lane.b32.xlu0 %v4165_v29, %s6676_s18  ;;  %v4193_v29 = vsel %vm4104_vm1, %v4080_v28, %v3996_v42  ;;  %v4109_v42 = vsel %vm4104_vm1, %v4052_v16, %v4080_v28  ;;  %v2832_v28 = vrot.slane %v11370_v45, 7 }
 0x2c0   :  { %v8962_v31 = vpop.permute.xlu1 %3206 }
 0x2c1   :  { %11364 = vst [vmem:[#allocation169_spill] sm:$0xff] %v8962_v31  ;;  %v8965_v21 = vpop.permute.xlu0 %3204 }
 0x2c2   :  { %11365 = vst [vmem:[#allocation170_spill] sm:$0xff] %v8965_v21  ;;  %3810 = vrot.lane.b32.xlu1 %v8411_v35, %s6675_s0  ;;  %v2947_v35 = vsel %vm2871_vm0, %v2776_v3, %v2804_v34 }
 0x2c3   :  { %3244 = vrot.lane.b32.xlu0 %v2918_v4, %s6676_s18 }
 0x2c4   :  { %v8972_v26 = vpop.permute.xlu1 %3770 }
 0x2c5   :  { %v8975_v57 = vpop.permute.xlu0 %3768 }
 0x2c6   :  { %4367 = vrot.lane.b32.xlu1 %v4193_v29, %s6676_s18 }
 0x2c7   :  { %3808 = vrot.lane.b32.xlu0 %v11366_v52, %s6675_s0  ;;  %v11369_v52 = vld [vmem:[#allocation90_spill] sm:$0xff] }
 0x2c8   :  { %v8982_v21 = vpop.permute.xlu1 %3210 }
 0x2c9   :  { %11367 = vst [vmem:[#allocation171_spill] sm:$0xff] %v8982_v21  ;;  %v8986_v4 = vpop.permute.xlu0 %3772  ;;  %v2860_v21 = vrot.slane %v11369_v52, 7 }
 0x2ca   :  { %4363 = vrot.lane.b32.xlu1 %v4137_v53, %s6676_s18 }
 0x2cb   :  { %4365 = vrot.lane.b32.xlu0 %v4109_v42, %s6676_s18  ;;  %v4025_v42 = vrot.slane %v8567_v56, 1  ;;  %v2975_v40 = vsel %vm2871_vm0, %v2860_v21, %v2776_v3  ;;  %v4081_v3 = vrot.slane %v8595_v8, 1  ;;  %v11374_v8 = vld [vmem:[#allocation95_spill] sm:$0xff] }
 0x2cc   :  { %v8994_v29 = vpop.permute.xlu1 %3774 }
 0x2cd   :  { %v8996_v31 = vpop.permute.xlu0 %3208 }
 0x2ce   :  { %11368 = vst [vmem:[#allocation172_spill] sm:$0xff] %v8996_v31  ;;  %3250 = vrot.lane.b32.xlu1 %v2947_v35, %s6676_s18  ;;  %v3997_v31 = vrot.slane %v8571_v11, 1 }
 0x2cf   :  { %3812 = vrot.lane.b32.xlu0 %v11370_v45, %s6675_s0  ;;  %v2891_v45 = vsel %vm2871_vm0, %v2832_v28, %v2860_v21 }
 0x2d0   :  { %v9004_v53 = vpop.permute.xlu1 %3214  ;;  %v4166_v56 = vsel %vm4104_vm1, %v3997_v31, %v4025_v42 }
 0x2d1   :  { %11371 = vst [vmem:[#allocation173_spill] sm:$0xff] %v9004_v53  ;;  %v9007_v16 = vpop.permute.xlu0 %4329 }
 0x2d2   :  { %3814 = vrot.lane.b32.xlu1 %v11369_v52, %s6675_s0 }
 0x2d3   :  { %3248 = vrot.lane.b32.xlu0 %v2975_v40, %s6676_s18  ;;  %v11373_v40 = vld [vmem:[#allocation93_spill] sm:$0xff] }
 0x2d4   :  { %v9016_v35 = vpop.permute.xlu1 %3778 }
 0x2d5   :  { %v9018_v7 = vpop.permute.xlu0 %3212 }
 0x2d6   :  { %11372 = vst [vmem:[#allocation174_spill] sm:$0xff] %v9018_v7  ;;  %3254 = vrot.lane.b32.xlu1 %v2891_v45, %s6676_s18  ;;  %v2919_v7 = vsel %vm2871_vm0, %v2804_v34, %v2832_v28  ;;  %v4053_v45 = vrot.slane %v8586_v2, 1  ;;  %v2805_v34 = vrot.slane %v11373_v40, 7 }
 0x2d7   :  { %4369 = vrot.lane.b32.xlu0 %v4166_v56, %s6676_s18  ;;  %v4194_v56 = vsel %vm4104_vm1, %v4081_v3, %v3997_v31 }
 0x2d8   :  { %v9026_v11 = vpop.permute.xlu1 %4335  ;;  %v4138_v2 = vsel %vm4104_vm1, %v4025_v42, %v4053_v45  ;;  %v4110_v31 = vsel %vm4104_vm1, %v4053_v45, %v4081_v3  ;;  %v11378_v42 = vld [vmem:[#allocation98_spill] sm:$0xff] }
 0x2d9   :  { %v9029_v52 = vpop.permute.xlu0 %3776  ;;  %v2833_v3 = vrot.slane %v11378_v42, 7 }
 0x2da   :  { %3818 = vrot.lane.b32.xlu1 %v11373_v40, %s6675_s0 }
 0x2db   :  { %3252 = vrot.lane.b32.xlu0 %v2919_v7, %s6676_s18  ;;  %v2777_v7 = vrot.slane %v11374_v8, 7 }
 0x2dc   :  { %v9036_v21 = vpop.permute.xlu1 %4331 }
 0x2dd   :  { %v9039_v53 = vpop.permute.xlu0 %4333  ;;  %v2948_v40 = vsel %vm2871_vm0, %v2777_v7, %v2805_v34 }
 0x2de   :  { %4375 = vrot.lane.b32.xlu1 %v4194_v56, %s6676_s18 }
 0x2df   :  { %3816 = vrot.lane.b32.xlu0 %v11374_v8, %s6675_s0  ;;  %v11377_v8 = vld [vmem:[#allocation97_spill] sm:$0xff] }
 0x2e0   :  { %v9046_v62 = vpop.permute.xlu1 %3218 }
 0x2e1   :  { %11375 = vst [vmem:[#allocation175_spill] sm:$0xff] %v9046_v62  ;;  %v9050_v28 = vpop.permute.xlu0 %3780  ;;  %v2861_v62 = vrot.slane %v11377_v8, 7 }
 0x2e2   :  { %4371 = vrot.lane.b32.xlu1 %v4138_v2, %s6676_s18 }
 0x2e3   :  { %4373 = vrot.lane.b32.xlu0 %v4110_v31, %s6676_s18  ;;  %v4026_v31 = vrot.slane %v8623_v18, 1  ;;  %v2976_v12 = vsel %vm2871_vm0, %v2861_v62, %v2777_v7  ;;  %v4082_v7 = vrot.slane %v8651_v58, 1  ;;  %v11382_v58 = vld [vmem:[#allocation101_spill] sm:$0xff] }
 0x2e4   :  { %v9058_v56 = vpop.permute.xlu1 %3782 }
 0x2e5   :  { %v9060_v43 = vpop.permute.xlu0 %3216 }
 0x2e6   :  { %11376 = vst [vmem:[#allocation176_spill] sm:$0xff] %v9060_v43  ;;  %3258 = vrot.lane.b32.xlu1 %v2948_v40, %s6676_s18  ;;  %v3998_v43 = vrot.slane %v8627_v49, 1 }
 0x2e7   :  { %3820 = vrot.lane.b32.xlu0 %v11378_v42, %s6675_s0  ;;  %v2892_v42 = vsel %vm2871_vm0, %v2833_v3, %v2861_v62 }
 0x2e8   :  { %v9068_v2 = vpop.permute.xlu1 %3222  ;;  %v4167_v18 = vsel %vm4104_vm1, %v3998_v43, %v4026_v31 }
 0x2e9   :  { %11379 = vst [vmem:[#allocation177_spill] sm:$0xff] %v9068_v2  ;;  %v9071_v45 = vpop.permute.xlu0 %4337 }
 0x2ea   :  { %3822 = vrot.lane.b32.xlu1 %v11377_v8, %s6675_s0 }
 0x2eb   :  { %3256 = vrot.lane.b32.xlu0 %v2976_v12, %s6676_s18  ;;  %v11381_v12 = vld [vmem:[#allocation99_spill] sm:$0xff] }
 0x2ec   :  { %v9080_v40 = vpop.permute.xlu1 %3786 }
 0x2ed   :  { %v9082_v46 = vpop.permute.xlu0 %3220 }
 0x2ee   :  { %11380 = vst [vmem:[#allocation178_spill] sm:$0xff] %v9082_v46  ;;  %3262 = vrot.lane.b32.xlu1 %v2892_v42, %s6676_s18  ;;  %v2920_v46 = vsel %vm2871_vm0, %v2805_v34, %v2833_v3  ;;  %v4054_v42 = vrot.slane %v8642_v5, 1  ;;  %v2806_v34 = vrot.slane %v11381_v12, 7 }
 0x2ef   :  { %4377 = vrot.lane.b32.xlu0 %v4167_v18, %s6676_s18  ;;  %v4195_v18 = vsel %vm4104_vm1, %v4082_v7, %v3998_v43 }
 0x2f0   :  { %v9090_v49 = vpop.permute.xlu1 %4343  ;;  %v4139_v5 = vsel %vm4104_vm1, %v4026_v31, %v4054_v42  ;;  %v4111_v43 = vsel %vm4104_vm1, %v4054_v42, %v4082_v7  ;;  %v11387_v31 = vld [vmem:[#allocation103_spill] sm:$0xff] }
 0x2f1   :  { %v9093_v8 = vpop.permute.xlu0 %3784  ;;  %v2834_v7 = vrot.slane %v11387_v31, 7 }
 0x2f2   :  { %3826 = vrot.lane.b32.xlu1 %v11381_v12, %s6675_s0 }
 0x2f3   :  { %3260 = vrot.lane.b32.xlu0 %v2920_v46, %s6676_s18  ;;  %v2778_v46 = vrot.slane %v11382_v58, 7 }
 0x2f4   :  { %v9100_v62 = vpop.permute.xlu1 %4339 }
 0x2f5   :  { %v9103_v2 = vpop.permute.xlu0 %4341  ;;  %v2949_v12 = vsel %vm2871_vm0, %v2778_v46, %v2806_v34 }
 0x2f6   :  { %4383 = vrot.lane.b32.xlu1 %v4195_v18, %s6676_s18 }
 0x2f7   :  { %3824 = vrot.lane.b32.xlu0 %v11382_v58, %s6675_s0  ;;  %v11386_v58 = vld [vmem:[#allocation102_spill] sm:$0xff] }
 0x2f8   :  { %v9110_v15 = vpop.permute.xlu1 %3226 }
 0x2f9   :  { %11383 = vst [vmem:[#allocation179_spill] sm:$0xff] %v9110_v15  ;;  %v9114_v3 = vpop.permute.xlu0 %3788  ;;  %v2862_v15 = vrot.slane %v11386_v58, 7 }
 0x2fa   :  { %11384 = vst [vmem:[#allocation180_spill] sm:$0xff] %v9114_v3  ;;  %4379 = vrot.lane.b32.xlu1 %v4139_v5, %s6676_s18 }
 0x2fb   :  { %4381 = vrot.lane.b32.xlu0 %v4111_v43, %s6676_s18  ;;  %v4027_v43 = vrot.slane %v8673_v24, 1  ;;  %v2977_v36 = vsel %vm2871_vm0, %v2862_v15, %v2778_v46  ;;  %v4083_v46 = vrot.slane %v8696_v25, 1  ;;  %v11393_v25 = vld [vmem:[#allocation107_spill] sm:$0xff] }
 0x2fc   :  { %v9122_v18 = vpop.permute.xlu1 %3790 }
 0x2fd   :  { %v9124_v60 = vpop.permute.xlu0 %3224 }
 0x2fe   :  { %11385 = vst [vmem:[#allocation181_spill] sm:$0xff] %v9124_v60  ;;  %3266 = vrot.lane.b32.xlu1 %v2949_v12, %s6676_s18  ;;  %v3999_v60 = vrot.slane %v8675_v59, 1 }
 0x2ff   :  { %3828 = vrot.lane.b32.xlu0 %v11387_v31, %s6675_s0  ;;  %v2893_v31 = vsel %vm2871_vm0, %v2834_v7, %v2862_v15 }
 0x300   :  { %v9132_v5 = vpop.permute.xlu1 %3230  ;;  %v4168_v24 = vsel %vm4104_vm1, %v3999_v60, %v4027_v43 }
 0x301   :  { %11388 = vst [vmem:[#allocation182_spill] sm:$0xff] %v9132_v5  ;;  %v9135_v42 = vpop.permute.xlu0 %4345 }
 0x302   :  { %3830 = vrot.lane.b32.xlu1 %v11386_v58, %s6675_s0 }
 0x303   :  { %3264 = vrot.lane.b32.xlu0 %v2977_v36, %s6676_s18  ;;  %v11391_v36 = vld [vmem:[#allocation105_spill] sm:$0xff] }
 0x304   :  { %v9144_v12 = vpop.permute.xlu1 %3794 }
 0x305   :  { %11389 = vst [vmem:[#allocation183_spill] sm:$0xff] %v9144_v12  ;;  %v9146_v3 = vpop.permute.xlu0 %3228 }
 0x306   :  { %11390 = vst [vmem:[#allocation184_spill] sm:$0xff] %v9146_v3  ;;  %3270 = vrot.lane.b32.xlu1 %v2893_v31, %s6676_s18  ;;  %v2921_v3 = vsel %vm2871_vm0, %v2806_v34, %v2834_v7  ;;  %v4055_v31 = vrot.slane %v8686_v63, 1  ;;  %v2807_v34 = vrot.slane %v11391_v36, 7 }
 0x307   :  { %4385 = vrot.lane.b32.xlu0 %v4168_v24, %s6676_s18  ;;  %v4196_v24 = vsel %vm4104_vm1, %v4083_v46, %v3999_v60 }
 0x308   :  { %v9154_v59 = vpop.permute.xlu1 %4351  ;;  %v4140_v63 = vsel %vm4104_vm1, %v4027_v43, %v4055_v31  ;;  %v4112_v60 = vsel %vm4104_vm1, %v4055_v31, %v4083_v46  ;;  %v11399_v43 = vld [vmem:[#allocation110_spill] sm:$0xff] }
 0x309   :  { %v9157_v58 = vpop.permute.xlu0 %3792  ;;  %v2835_v46 = vrot.slane %v11399_v43, 7 }
 0x30a   :  { %3834 = vrot.lane.b32.xlu1 %v11391_v36, %s6675_s0 }
 0x30b   :  { %3268 = vrot.lane.b32.xlu0 %v2921_v3, %s6676_s18  ;;  %v2779_v3 = vrot.slane %v11393_v25, 7 }
 0x30c   :  { %v9164_v15 = vpop.permute.xlu1 %4347 }
 0x30d   :  { %v9167_v5 = vpop.permute.xlu0 %4349  ;;  %v2950_v36 = vsel %vm2871_vm0, %v2779_v3, %v2807_v34 }
 0x30e   :  { %11392 = vst [vmem:[#allocation185_spill] sm:$0xff] %v9167_v5  ;;  %4391 = vrot.lane.b32.xlu1 %v4196_v24, %s6676_s18 }
 0x30f   :  { %3832 = vrot.lane.b32.xlu0 %v11393_v25, %s6675_s0  ;;  %v11398_v25 = vld [vmem:[#allocation109_spill] sm:$0xff] }
 0x310   :  { %v9174_v12 = vpop.permute.xlu1 %3234 }
 0x311   :  { %11394 = vst [vmem:[#allocation186_spill] sm:$0xff] %v9174_v12  ;;  %v9178_v7 = vpop.permute.xlu0 %3796  ;;  %v2863_v12 = vrot.slane %v11398_v25, 7 }
 0x312   :  { %11395 = vst [vmem:[#allocation187_spill] sm:$0xff] %v9178_v7  ;;  %4387 = vrot.lane.b32.xlu1 %v4140_v63, %s6676_s18 }
 0x313   :  { %4389 = vrot.lane.b32.xlu0 %v4112_v60, %s6676_s18  ;;  %v4028_v60 = vrot.slane %v8716_v32, 1  ;;  %v2978_v7 = vsel %vm2871_vm0, %v2863_v12, %v2779_v3  ;;  %v4084_v3 = vrot.slane %v8738_v30, 1  ;;  %v11405_v30 = vld [vmem:[#allocation113_spill] sm:$0xff] }
 0x314   :  { %v9186_v24 = vpop.permute.xlu1 %3798 }
 0x315   :  { %11396 = vst [vmem:[#allocation188_spill] sm:$0xff] %v9186_v24  ;;  %v9188_v5 = vpop.permute.xlu0 %3232 }
 0x316   :  { %11397 = vst [vmem:[#allocation189_spill] sm:$0xff] %v9188_v5  ;;  %3274 = vrot.lane.b32.xlu1 %v2950_v36, %s6676_s18  ;;  %v4000_v5 = vrot.slane %v8719_v44, 1 }
 0x317   :  { %3836 = vrot.lane.b32.xlu0 %v11399_v43, %s6675_s0  ;;  %v2894_v43 = vsel %vm2871_vm0, %v2835_v46, %v2863_v12 }
 0x318   :  { %v9196_v63 = vpop.permute.xlu1 %3238  ;;  %v4169_v44 = vsel %vm4104_vm1, %v4000_v5, %v4028_v60 }
 0x319   :  { %11400 = vst [vmem:[#allocation190_spill] sm:$0xff] %v9196_v63  ;;  %v9199_v31 = vpop.permute.xlu0 %4353 }
 0x31a   :  { %3838 = vrot.lane.b32.xlu1 %v11398_v25, %s6675_s0 }
 0x31b   :  { %3272 = vrot.lane.b32.xlu0 %v2978_v7, %s6676_s18  ;;  %v11403_v7 = vld [vmem:[#allocation111_spill] sm:$0xff] }
 0x31c   :  { %v9208_v36 = vpop.permute.xlu1 %3802 }
 0x31d   :  { %11401 = vst [vmem:[#allocation191_spill] sm:$0xff] %v9208_v36  ;;  %v9210_v24 = vpop.permute.xlu0 %3236 }
 0x31e   :  { %11402 = vst [vmem:[#allocation192_spill] sm:$0xff] %v9210_v24  ;;  %3278 = vrot.lane.b32.xlu1 %v2894_v43, %s6676_s18  ;;  %v2922_v24 = vsel %vm2871_vm0, %v2807_v34, %v2835_v46  ;;  %v4056_v43 = vrot.slane %v8730_v48, 1  ;;  %v2808_v34 = vrot.slane %v11403_v7, 7 }
 0x31f   :  { %4393 = vrot.lane.b32.xlu0 %v4169_v44, %s6676_s18  ;;  %v4197_v44 = vsel %vm4104_vm1, %v4084_v3, %v4000_v5 }
 0x320   :  { %v9218_v32 = vpop.permute.xlu1 %4359  ;;  %v4141_v48 = vsel %vm4104_vm1, %v4028_v60, %v4056_v43  ;;  %v4113_v5 = vsel %vm4104_vm1, %v4056_v43, %v4084_v3  ;;  %v11411_v60 = vld [vmem:[#allocation115_spill] sm:$0xff] }
 0x321   :  { %v9221_v25 = vpop.permute.xlu0 %3800  ;;  %v2836_v3 = vrot.slane %v11411_v60, 7 }
 0x322   :  { %3842 = vrot.lane.b32.xlu1 %v11403_v7, %s6675_s0 }
 0x323   :  { %3276 = vrot.lane.b32.xlu0 %v2922_v24, %s6676_s18  ;;  %v2780_v24 = vrot.slane %v11405_v30, 7 }
 0x324   :  { %v9228_v12 = vpop.permute.xlu1 %4355 }
 0x325   :  { %v9231_v63 = vpop.permute.xlu0 %4357  ;;  %v2951_v7 = vsel %vm2871_vm0, %v2780_v24, %v2808_v34 }
 0x326   :  { %11404 = vst [vmem:[#allocation193_spill] sm:$0xff] %v9231_v63  ;;  %4399 = vrot.lane.b32.xlu1 %v4197_v44, %s6676_s18 }
 0x327   :  { %3840 = vrot.lane.b32.xlu0 %v11405_v30, %s6675_s0  ;;  %v11410_v30 = vld [vmem:[#allocation114_spill] sm:$0xff] }
 0x328   :  { %v9238_v36 = vpop.permute.xlu1 %3242 }
 0x329   :  { %11406 = vst [vmem:[#allocation194_spill] sm:$0xff] %v9238_v36  ;;  %v9242_v46 = vpop.permute.xlu0 %3804  ;;  %v2864_v36 = vrot.slane %v11410_v30, 7 }
 0x32a   :  { %11407 = vst [vmem:[#allocation195_spill] sm:$0xff] %v9242_v46  ;;  %4395 = vrot.lane.b32.xlu1 %v4141_v48, %s6676_s18 }
 0x32b   :  { %4397 = vrot.lane.b32.xlu0 %v4113_v5, %s6676_s18  ;;  %v4029_v5 = vrot.slane %v8760_v27, 1  ;;  %v2979_v46 = vsel %vm2871_vm0, %v2864_v36, %v2780_v24  ;;  %v4085_v24 = vrot.slane %v8780_v39, 1  ;;  %v11419_v39 = vld [vmem:[#allocation119_spill] sm:$0xff] }
 0x32c   :  { %v9250_v44 = vpop.permute.xlu1 %3806 }
 0x32d   :  { %11408 = vst [vmem:[#allocation196_spill] sm:$0xff] %v9250_v44  ;;  %v9252_v63 = vpop.permute.xlu0 %3240 }
 0x32e   :  { %11409 = vst [vmem:[#allocation197_spill] sm:$0xff] %v9252_v63  ;;  %3282 = vrot.lane.b32.xlu1 %v2951_v7, %s6676_s18  ;;  %v4001_v63 = vrot.slane %v8762_v50, 1 }
 0x32f   :  { %3844 = vrot.lane.b32.xlu0 %v11411_v60, %s6675_s0  ;;  %v2895_v60 = vsel %vm2871_vm0, %v2836_v3, %v2864_v36 }
 0x330   :  { %v9260_v48 = vpop.permute.xlu1 %3246  ;;  %v4170_v50 = vsel %vm4104_vm1, %v4001_v63, %v4029_v5 }
 0x331   :  { %11412 = vst [vmem:[#allocation198_spill] sm:$0xff] %v9260_v48  ;;  %v9263_v43 = vpop.permute.xlu0 %4361 }
 0x332   :  { %11413 = vst [vmem:[#allocation199_spill] sm:$0xff] %v9263_v43  ;;  %3846 = vrot.lane.b32.xlu1 %v11410_v30, %s6675_s0 }
 0x333   :  { %3280 = vrot.lane.b32.xlu0 %v2979_v46, %s6676_s18  ;;  %v11416_v46 = vld [vmem:[#allocation117_spill] sm:$0xff] }
 0x334   :  { %v9272_v7 = vpop.permute.xlu1 %3810 }
 0x335   :  { %v9274_v44 = vpop.permute.xlu0 %3244 }
 0x336   :  { %11414 = vst [vmem:[#allocation200_spill] sm:$0xff] %v9274_v44  ;;  %3286 = vrot.lane.b32.xlu1 %v2895_v60, %s6676_s18  ;;  %v2923_v44 = vsel %vm2871_vm0, %v2808_v34, %v2836_v3  ;;  %v4057_v60 = vrot.slane %v8773_v0, 1  ;;  %v2809_v34 = vrot.slane %v11416_v46, 7 }
 0x337   :  { %4401 = vrot.lane.b32.xlu0 %v4170_v50, %s6676_s18  ;;  %v4198_v50 = vsel %vm4104_vm1, %v4085_v24, %v4001_v63 }
 0x338   :  { %v9282_v27 = vpop.permute.xlu1 %4367  ;;  %v4142_v0 = vsel %vm4104_vm1, %v4029_v5, %v4057_v60  ;;  %v4114_v63 = vsel %vm4104_vm1, %v4057_v60, %v4085_v24  ;;  %v11423_v5 = vld [vmem:[#allocation122_spill] sm:$0xff] }
 0x339   :  { %11415 = vst [vmem:[#allocation201_spill] sm:$0xff] %v9282_v27  ;;  %v9285_v30 = vpop.permute.xlu0 %3808  ;;  %v2837_v24 = vrot.slane %v11423_v5, 7 }
 0x33a   :  { %3850 = vrot.lane.b32.xlu1 %v11416_v46, %s6675_s0 }
 0x33b   :  { %3284 = vrot.lane.b32.xlu0 %v2923_v44, %s6676_s18  ;;  %v2781_v44 = vrot.slane %v11419_v39, 7 }
 0x33c   :  { %v9292_v36 = vpop.permute.xlu1 %4363 }
 0x33d   :  { %11417 = vst [vmem:[#allocation202_spill] sm:$0xff] %v9292_v36  ;;  %v9295_v48 = vpop.permute.xlu0 %4365  ;;  %v2952_v46 = vsel %vm2871_vm0, %v2781_v44, %v2809_v34 }
 0x33e   :  { %11418 = vst [vmem:[#allocation203_spill] sm:$0xff] %v9295_v48  ;;  %4407 = vrot.lane.b32.xlu1 %v4198_v50, %s6676_s18 }
 0x33f   :  { %3848 = vrot.lane.b32.xlu0 %v11419_v39, %s6675_s0  ;;  %v11422_v39 = vld [vmem:[#allocation121_spill] sm:$0xff] }
 0x340   :  { %v9302_v27 = vpop.permute.xlu1 %3250 }
 0x341   :  { %11420 = vst [vmem:[#allocation204_spill] sm:$0xff] %v9302_v27  ;;  %v9306_v3 = vpop.permute.xlu0 %3812  ;;  %v2865_v27 = vrot.slane %v11422_v39, 7 }
 0x342   :  { %4403 = vrot.lane.b32.xlu1 %v4142_v0, %s6676_s18 }
 0x343   :  { %4405 = vrot.lane.b32.xlu0 %v4114_v63, %s6676_s18  ;;  %v4030_v63 = vrot.slane %v8802_v20, 1  ;;  %v2980_v43 = vsel %vm2871_vm0, %v2865_v27, %v2781_v44  ;;  %v4086_v44 = vrot.slane %v8824_v13, 1  ;;  %v11431_v13 = vld [vmem:[#allocation125_spill] sm:$0xff] }
 0x344   :  { %v9314_v50 = vpop.permute.xlu1 %3814 }
 0x345   :  { %v9316_v48 = vpop.permute.xlu0 %3248 }
 0x346   :  { %11421 = vst [vmem:[#allocation205_spill] sm:$0xff] %v9316_v48  ;;  %3290 = vrot.lane.b32.xlu1 %v2952_v46, %s6676_s18  ;;  %v4002_v48 = vrot.slane %v8804_v51, 1 }
 0x347   :  { %3852 = vrot.lane.b32.xlu0 %v11423_v5, %s6675_s0  ;;  %v2896_v5 = vsel %vm2871_vm0, %v2837_v24, %v2865_v27 }
 0x348   :  { %v9324_v0 = vpop.permute.xlu1 %3254  ;;  %v4171_v51 = vsel %vm4104_vm1, %v4002_v48, %v4030_v63 }
 0x349   :  { %11424 = vst [vmem:[#allocation206_spill] sm:$0xff] %v9324_v0  ;;  %v9327_v60 = vpop.permute.xlu0 %4369 }
 0x34a   :  { %11425 = vst [vmem:[#allocation207_spill] sm:$0xff] %v9327_v60  ;;  %3854 = vrot.lane.b32.xlu1 %v11422_v39, %s6675_s0 }
 0x34b   :  { %3288 = vrot.lane.b32.xlu0 %v2980_v43, %s6676_s18  ;;  %v11428_v43 = vld [vmem:[#allocation123_spill] sm:$0xff] }
 0x34c   :  { %v9336_v46 = vpop.permute.xlu1 %3818 }
 0x34d   :  { %v9338_v36 = vpop.permute.xlu0 %3252 }
 0x34e   :  { %11426 = vst [vmem:[#allocation208_spill] sm:$0xff] %v9338_v36  ;;  %3294 = vrot.lane.b32.xlu1 %v2896_v5, %s6676_s18  ;;  %v2924_v36 = vsel %vm2871_vm0, %v2809_v34, %v2837_v24  ;;  %v4058_v5 = vrot.slane %v8815_v61, 1  ;;  %v2810_v34 = vrot.slane %v11428_v43, 7 }
 0x34f   :  { %4409 = vrot.lane.b32.xlu0 %v4171_v51, %s6676_s18  ;;  %v4199_v51 = vsel %vm4104_vm1, %v4086_v44, %v4002_v48 }
 0x350   :  { %v9346_v20 = vpop.permute.xlu1 %4375  ;;  %v4143_v61 = vsel %vm4104_vm1, %v4030_v63, %v4058_v5  ;;  %v4115_v48 = vsel %vm4104_vm1, %v4058_v5, %v4086_v44  ;;  %v11435_v63 = vld [vmem:[#allocation127_spill] sm:$0xff] }
 0x351   :  { %11427 = vst [vmem:[#allocation209_spill] sm:$0xff] %v9346_v20  ;;  %v9349_v39 = vpop.permute.xlu0 %3816  ;;  %v2838_v44 = vrot.slane %v11435_v63, 7 }
 0x352   :  { %3858 = vrot.lane.b32.xlu1 %v11428_v43, %s6675_s0 }
 0x353   :  { %3292 = vrot.lane.b32.xlu0 %v2924_v36, %s6676_s18  ;;  %v2782_v36 = vrot.slane %v11431_v13, 7 }
 0x354   :  { %v9356_v27 = vpop.permute.xlu1 %4371 }
 0x355   :  { %11429 = vst [vmem:[#allocation210_spill] sm:$0xff] %v9356_v27  ;;  %v9359_v0 = vpop.permute.xlu0 %4373  ;;  %v2953_v43 = vsel %vm2871_vm0, %v2782_v36, %v2810_v34 }
 0x356   :  { %11430 = vst [vmem:[#allocation211_spill] sm:$0xff] %v9359_v0  ;;  %4415 = vrot.lane.b32.xlu1 %v4199_v51, %s6676_s18 }
 0x357   :  { %3856 = vrot.lane.b32.xlu0 %v11431_v13, %s6675_s0  ;;  %v11434_v13 = vld [vmem:[#allocation126_spill] sm:$0xff] }
 0x358   :  { %v9366_v20 = vpop.permute.xlu1 %3258 }
 0x359   :  { %11432 = vst [vmem:[#allocation212_spill] sm:$0xff] %v9366_v20  ;;  %v9370_v24 = vpop.permute.xlu0 %3820  ;;  %v2866_v20 = vrot.slane %v11434_v13, 7 }
 0x35a   :  { %4411 = vrot.lane.b32.xlu1 %v4143_v61, %s6676_s18 }
 0x35b   :  { %4413 = vrot.lane.b32.xlu0 %v4115_v48, %s6676_s18  ;;  %v4031_v48 = vrot.slane %v8844_v23, 1  ;;  %v2981_v60 = vsel %vm2871_vm0, %v2866_v20, %v2782_v36  ;;  %v4087_v36 = vrot.slane %v8866_v55, 1  ;;  %v11443_v55 = vld [vmem:[#allocation131_spill] sm:$0xff] }
 0x35c   :  { %v9378_v51 = vpop.permute.xlu1 %3822 }
 0x35d   :  { %v9380_v0 = vpop.permute.xlu0 %3256 }
 0x35e   :  { %11433 = vst [vmem:[#allocation213_spill] sm:$0xff] %v9380_v0  ;;  %3298 = vrot.lane.b32.xlu1 %v2953_v43, %s6676_s18  ;;  %v4003_v0 = vrot.slane %v8847_v37, 1 }
 0x35f   :  { %3860 = vrot.lane.b32.xlu0 %v11435_v63, %s6675_s0  ;;  %v2897_v63 = vsel %vm2871_vm0, %v2838_v44, %v2866_v20 }
 0x360   :  { %v9388_v61 = vpop.permute.xlu1 %3262  ;;  %v4172_v37 = vsel %vm4104_vm1, %v4003_v0, %v4031_v48 }
 0x361   :  { %11436 = vst [vmem:[#allocation214_spill] sm:$0xff] %v9388_v61  ;;  %v9391_v5 = vpop.permute.xlu0 %4377 }
 0x362   :  { %11437 = vst [vmem:[#allocation215_spill] sm:$0xff] %v9391_v5  ;;  %3862 = vrot.lane.b32.xlu1 %v11434_v13, %s6675_s0 }
 0x363   :  { %3296 = vrot.lane.b32.xlu0 %v2981_v60, %s6676_s18  ;;  %v11440_v60 = vld [vmem:[#allocation129_spill] sm:$0xff] }
 0x364   :  { %v9400_v43 = vpop.permute.xlu1 %3826 }
 0x365   :  { %v9402_v27 = vpop.permute.xlu0 %3260 }
 0x366   :  { %11438 = vst [vmem:[#allocation216_spill] sm:$0xff] %v9402_v27  ;;  %3302 = vrot.lane.b32.xlu1 %v2897_v63, %s6676_s18  ;;  %v2925_v27 = vsel %vm2871_vm0, %v2810_v34, %v2838_v44  ;;  %v4059_v63 = vrot.slane %v8858_v22, 1  ;;  %v2811_v34 = vrot.slane %v11440_v60, 7 }
 0x367   :  { %4417 = vrot.lane.b32.xlu0 %v4172_v37, %s6676_s18  ;;  %v4200_v37 = vsel %vm4104_vm1, %v4087_v36, %v4003_v0 }
 0x368   :  { %v9410_v23 = vpop.permute.xlu1 %4383  ;;  %v4144_v22 = vsel %vm4104_vm1, %v4031_v48, %v4059_v63  ;;  %v4116_v0 = vsel %vm4104_vm1, %v4059_v63, %v4087_v36  ;;  %v11447_v48 = vld [vmem:[#allocation134_spill] sm:$0xff] }
 0x369   :  { %11439 = vst [vmem:[#allocation217_spill] sm:$0xff] %v9410_v23  ;;  %v9413_v13 = vpop.permute.xlu0 %3824  ;;  %v2839_v36 = vrot.slane %v11447_v48, 7 }
 0x36a   :  { %3866 = vrot.lane.b32.xlu1 %v11440_v60, %s6675_s0 }
 0x36b   :  { %3300 = vrot.lane.b32.xlu0 %v2925_v27, %s6676_s18  ;;  %v2783_v27 = vrot.slane %v11443_v55, 7 }
 0x36c   :  { %v9420_v20 = vpop.permute.xlu1 %4379 }
 0x36d   :  { %11441 = vst [vmem:[#allocation218_spill] sm:$0xff] %v9420_v20  ;;  %v9423_v61 = vpop.permute.xlu0 %4381  ;;  %v2954_v60 = vsel %vm2871_vm0, %v2783_v27, %v2811_v34 }
 0x36e   :  { %11442 = vst [vmem:[#allocation219_spill] sm:$0xff] %v9423_v61  ;;  %4423 = vrot.lane.b32.xlu1 %v4200_v37, %s6676_s18 }
 0x36f   :  { %3864 = vrot.lane.b32.xlu0 %v11443_v55, %s6675_s0  ;;  %v11446_v55 = vld [vmem:[#allocation133_spill] sm:$0xff] }
 0x370   :  { %v9430_v23 = vpop.permute.xlu1 %3266 }
 0x371   :  { %11444 = vst [vmem:[#allocation220_spill] sm:$0xff] %v9430_v23  ;;  %v9434_v44 = vpop.permute.xlu0 %3828  ;;  %v2867_v23 = vrot.slane %v11446_v55, 7 }
 0x372   :  { %4419 = vrot.lane.b32.xlu1 %v4144_v22, %s6676_s18 }
 0x373   :  { %4421 = vrot.lane.b32.xlu0 %v4116_v0, %s6676_s18  ;;  %v4032_v0 = vrot.slane %v8888_v10, 1  ;;  %v2982_v5 = vsel %vm2871_vm0, %v2867_v23, %v2783_v27  ;;  %v4088_v27 = vrot.slane %v8908_v1, 1 }
 0x374   :  { %v9442_v37 = vpop.permute.xlu1 %3830 }
 0x375   :  { %v9444_v61 = vpop.permute.xlu0 %3264 }
 0x376   :  { %11445 = vst [vmem:[#allocation221_spill] sm:$0xff] %v9444_v61  ;;  %3306 = vrot.lane.b32.xlu1 %v2954_v60, %s6676_s18  ;;  %v4004_v61 = vrot.slane %v8890_v17, 1 }
 0x377   :  { %3868 = vrot.lane.b32.xlu0 %v11447_v48, %s6675_s0  ;;  %v2898_v48 = vsel %vm2871_vm0, %v2839_v36, %v2867_v23 }
 0x378   :  { %v9452_v22 = vpop.permute.xlu1 %3270  ;;  %v4173_v17 = vsel %vm4104_vm1, %v4004_v61, %v4032_v0 }
 0x379   :  { %11448 = vst [vmem:[#allocation222_spill] sm:$0xff] %v9452_v22  ;;  %v9455_v63 = vpop.permute.xlu0 %4385 }
 0x37a   :  { %3870 = vrot.lane.b32.xlu1 %v11446_v55, %s6675_s0 }
 0x37b   :  { %3304 = vrot.lane.b32.xlu0 %v2982_v5, %s6676_s18  ;;  %v11450_v5 = vld [vmem:[#allocation135_spill] sm:$0xff] }
 0x37c   :  { %v9464_v60 = vpop.permute.xlu1 %3834 }
 0x37d   :  { %v9466_v20 = vpop.permute.xlu0 %3268 }
 0x37e   :  { %11449 = vst [vmem:[#allocation223_spill] sm:$0xff] %v9466_v20  ;;  %3310 = vrot.lane.b32.xlu1 %v2898_v48, %s6676_s18  ;;  %v2926_v20 = vsel %vm2871_vm0, %v2811_v34, %v2839_v36  ;;  %v4060_v48 = vrot.slane %v8901_v19, 1  ;;  %v2812_v34 = vrot.slane %v11450_v5, 7 }
 0x37f   :  { %4425 = vrot.lane.b32.xlu0 %v4173_v17, %s6676_s18  ;;  %v4201_v17 = vsel %vm4104_vm1, %v4088_v27, %v4004_v61 }
 0x380   :  { %v9474_v10 = vpop.permute.xlu1 %4391  ;;  %v4145_v19 = vsel %vm4104_vm1, %v4032_v0, %v4060_v48  ;;  %v4117_v61 = vsel %vm4104_vm1, %v4060_v48, %v4088_v27  ;;  %v2840_v27 = vrot.slane %v8653_v14, 7 }
 0x381   :  { %v9477_v55 = vpop.permute.xlu0 %3832 }
 0x382   :  { %3874 = vrot.lane.b32.xlu1 %v11450_v5, %s6675_s0 }
 0x383   :  { %3308 = vrot.lane.b32.xlu0 %v2926_v20, %s6676_s18  ;;  %v2784_v20 = vrot.slane %v8640_v9, 7 }
 0x384   :  { %v9484_v23 = vpop.permute.xlu1 %4387 }
 0x385   :  { %v9487_v22 = vpop.permute.xlu0 %4389  ;;  %v2955_v5 = vsel %vm2871_vm0, %v2784_v20, %v2812_v34 }
 0x386   :  { %11451 = vst [vmem:[#allocation224_spill] sm:$0xff] %v9487_v22  ;;  %4431 = vrot.lane.b32.xlu1 %v4201_v17, %s6676_s18 }
 0x387   :  { %3872 = vrot.lane.b32.xlu0 %v8640_v9, %s6675_s0  ;;  %v2868_v9 = vrot.slane %v8649_v41, 7 }
 0x388   :  { %v9494_v1 = vpop.permute.xlu1 %3274 }
 0x389   :  { %11452 = vst [vmem:[#allocation225_spill] sm:$0xff] %v9494_v1  ;;  %v9498_v36 = vpop.permute.xlu0 %3836 }
 0x38a   :  { %4427 = vrot.lane.b32.xlu1 %v4145_v19, %s6676_s18  ;;  %v4033_v19 = vrot.slane %v8930_v47, 1 }
 0x38b   :  { %4429 = vrot.lane.b32.xlu0 %v4117_v61, %s6676_s18  ;;  %v4005_v61 = vrot.slane %v8932_v38, 1 }
 0x38c   :  { %v9506_v17 = vpop.permute.xlu1 %3838 }
 0x38d   :  { %v9508_v22 = vpop.permute.xlu0 %3272  ;;  %v4174_v38 = vsel %vm4104_vm1, %v4005_v61, %v4033_v19 }
 0x38e   :  { %11453 = vst [vmem:[#allocation226_spill] sm:$0xff] %v9508_v22  ;;  %3314 = vrot.lane.b32.xlu1 %v2955_v5, %s6676_s18  ;;  %v2983_v22 = vsel %vm2871_vm0, %v2868_v9, %v2784_v20 }
 0x38f   :  { %3876 = vrot.lane.b32.xlu0 %v8653_v14, %s6675_s0  ;;  %v2899_v14 = vsel %vm2871_vm0, %v2840_v27, %v2868_v9  ;;  %v2927_v9 = vsel %vm2871_vm0, %v2812_v34, %v2840_v27 }
 0x390   :  { %v9516_v0 = vpop.permute.xlu1 %3278 }
 0x391   :  { %11454 = vst [vmem:[#allocation227_spill] sm:$0xff] %v9516_v0  ;;  %v9519_v48 = vpop.permute.xlu0 %4393  ;;  %v4089_v0 = vrot.slane %v8952_v33, 1 }
 0x392   :  { %3878 = vrot.lane.b32.xlu1 %v8649_v41, %s6675_s0 }
 0x393   :  { %3312 = vrot.lane.b32.xlu0 %v2983_v22, %s6676_s18  ;;  %v4061_v22 = vrot.slane %v8943_v54, 1  ;;  %v4202_v33 = vsel %vm4104_vm1, %v4089_v0, %v4005_v61  ;;  %v4006_v61 = vrot.slane %v8975_v57, 1 }
 0x394   :  { %v9528_v5 = vpop.permute.xlu1 %3842 }
 0x395   :  { %v9531_v1 = vpop.permute.xlu0 %3276  ;;  %v4146_v54 = vsel %vm4104_vm1, %v4033_v19, %v4061_v22  ;;  %v4118_v34 = vsel %vm4104_vm1, %v4061_v22, %v4089_v0 }
 0x396   :  { %11455 = vst [vmem:[#allocation228_spill] sm:$0xff] %v9531_v1  ;;  %3318 = vrot.lane.b32.xlu1 %v2899_v14, %s6676_s18  ;;  %v4034_v1 = vrot.slane %v8972_v26, 1 }
 0x397   :  { %4433 = vrot.lane.b32.xlu0 %v4174_v38, %s6676_s18  ;;  %v4090_v38 = vrot.slane %v8994_v29, 1  ;;  %v4062_v29 = vrot.slane %v8986_v4, 1  ;;  %v11460_v4 = vld [vmem:[#allocation70_spill] sm:$0xff] }
 0x398   :  { %v9539_v47 = vpop.permute.xlu1 %4399  ;;  %v4175_v57 = vsel %vm4104_vm1, %v4006_v61, %v4034_v1 }
 0x399   :  { %11456 = vst [vmem:[#allocation229_spill] sm:$0xff] %v9539_v47  ;;  %v9542_v20 = vpop.permute.xlu0 %3840  ;;  %v4203_v19 = vsel %vm4104_vm1, %v4090_v38, %v4006_v61  ;;  %v4147_v22 = vsel %vm4104_vm1, %v4034_v1, %v4062_v29  ;;  %v11464_v47 = vld [vmem:[#allocation65_spill] sm:$0xff] }
 0x39a   :  { %4439 = vrot.lane.b32.xlu1 %v4202_v33, %s6676_s18 }
 0x39b   :  { %3316 = vrot.lane.b32.xlu0 %v2927_v9, %s6676_s18  ;;  %v11461_v9 = vld [vmem:[#allocation21_spill] sm:$0xff] }
 0x39c   :  { %v9550_v14 = vpop.permute.xlu1 %4395 }
 0x39d   :  { %v9553_v41 = vpop.permute.xlu0 %4397 }
 0x39e   :  { %11457 = vst [vmem:[#allocation230_spill] sm:$0xff] %v9553_v41  ;;  %4435 = vrot.lane.b32.xlu1 %v4146_v54, %s6676_s18  ;;  %v3435_v54 = vadd.f32 %v11461_v9, %v11460_v4  ;;  %v11465_v4 = vld [vmem:[#allocation19_spill] sm:$0xff] }
 0x39f   :  { %4437 = vrot.lane.b32.xlu0 %v4118_v34, %s6676_s18  ;;  %v4119_v34 = vsel %vm4104_vm1, %v4062_v29, %v4090_v38  ;;  %v3433_v9 = vadd.f32 %v11465_v4, %v11464_v47  ;;  %v4035_v38 = vrot.slane %v9016_v35, 1  ;;  %v11466_v47 = vld [vmem:[#allocation67_spill] sm:$0xff] }
 0x3a0   :  { %v9563_v27 = vpop.permute.xlu1 %3282 }
 0x3a1   :  { %11458 = vst [vmem:[#allocation231_spill] sm:$0xff] %v9563_v27  ;;  %v9566_v33 = vpop.permute.xlu0 %3844  ;;  %v11463_v27 = vld [vmem:[#allocation20_spill] sm:$0xff] }
 0x3a2   :  { %4447 = vrot.lane.b32.xlu1 %v4203_v19, %s6676_s18  ;;  %v11462_v19 = vld [vmem:[#allocation72_spill] sm:$0xff] }
 0x3a3   :  { %4441 = vrot.lane.b32.xlu0 %v4175_v57, %s6676_s18  ;;  %v3432_v61 = vadd.f32 %v11463_v27, %v11462_v19  ;;  %v4668_v57 = vadd.f32 %v9026_v11, %v3435_v54  ;;  %v4666_v11 = vadd.f32 %v9036_v21, %v3433_v9  ;;  %v11467_v54 = vld [vmem:[#allocation22_spill] sm:$0xff]  ;;  %v4063_v21 = vrot.slane %v9050_v28, 1 }
 0x3a4   :  { %v9574_v26 = vpop.permute.xlu1 %3846  ;;  %v11468_v9 = vld [vmem:[#allocation82_spill] sm:$0xff] }
 0x3a5   :  { %v9576_v0 = vpop.permute.xlu0 %3280  ;;  %v4148_v4 = vsel %vm4104_vm1, %v4035_v38, %v4063_v21 }
 0x3a6   :  { %11459 = vst [vmem:[#allocation232_spill] sm:$0xff] %v9576_v0  ;;  %4443 = vrot.lane.b32.xlu1 %v4147_v22, %s6676_s18  ;;  %v4665_v0 = vadd.f32 %v9007_v16, %v3432_v61  ;;  %v4007_v22 = vrot.slane %v9029_v52, 1  ;;  %v4091_v16 = vrot.slane %v9058_v56, 1 }
 0x3a7   :  { %4445 = vrot.lane.b32.xlu0 %v4119_v34, %s6676_s18  ;;  %v3434_v34 = vadd.f32 %v11467_v54, %v11466_v47 }
 0x3a8   :  { %v9589_v41 = vpop.permute.xlu1 %3286  ;;  %v4176_v52 = vsel %vm4104_vm1, %v4007_v22, %v4035_v38  ;;  %v4204_v56 = vsel %vm4104_vm1, %v4091_v16, %v4007_v22  ;;  %v4120_v28 = vsel %vm4104_vm1, %v4063_v21, %v4091_v16  ;;  %v11470_v22 = vld [vmem:[#allocation80_spill] sm:$0xff]  ;;  %v4036_v16 = vrot.slane %v9080_v40, 1 }
 0x3a9   :  { %v9592_v1 = vpop.permute.xlu0 %4401  ;;  %v4667_v35 = vadd.f32 %v9039_v53, %v3434_v34  ;;  %v11469_v53 = vld [vmem:[#allocation25_spill] sm:$0xff] }
 0x3aa   :  { %4895 = vrot.lane.b32.xlu1 %v4668_v57, %s6677_s19 }
 0x3ab   :  { %4889 = vrot.lane.b32.xlu0 %v4665_v0, %s6677_s19 }
 0x3ac   :  { %v9601_v27 = vpop.permute.xlu1 %3850 }
 0x3ad   :  { %v9604_v29 = vpop.permute.xlu0 %3284 }
 0x3ae   :  { %4891 = vrot.lane.b32.xlu1 %v4666_v11, %s6677_s19  ;;  %v3439_v11 = vadd.f32 %v11469_v53, %v11468_v9  ;;  %v11473_v9 = vld [vmem:[#allocation23_spill] sm:$0xff] }
 0x3af   :  { %4449 = vrot.lane.b32.xlu0 %v4176_v52, %s6676_s18  ;;  %v11471_v52 = vld [vmem:[#allocation24_spill] sm:$0xff] }
 0x3b0   :  { %v9612_v0 = vpop.permute.xlu1 %4407  ;;  %v3436_v47 = vadd.f32 %v11471_v52, %v11470_v22  ;;  %v4672_v54 = vadd.f32 %v9090_v49, %v3439_v11  ;;  %v4092_v11 = vrot.slane %v9122_v18, 1  ;;  %v11476_v22 = vld [vmem:[#allocation3_spill] sm:$0xff] }
 0x3b1   :  { %v9616_v19 = vpop.permute.xlu0 %3848 }
 0x3b2   :  { %4455 = vrot.lane.b32.xlu1 %v4204_v56, %s6676_s18  ;;  %v11472_v56 = vld [vmem:[#allocation76_spill] sm:$0xff] }
 0x3b3   :  { %4893 = vrot.lane.b32.xlu0 %v4667_v35, %s6677_s19  ;;  %v4669_v35 = vadd.f32 %v9071_v45, %v3436_v47  ;;  %v3437_v53 = vadd.f32 %v11473_v9, %v11472_v56 }
 0x3b4   :  { %v9622_v61 = vpop.permute.xlu1 %4403 }
 0x3b5   :  { %v9624_v57 = vpop.permute.xlu0 %4405  ;;  %v4670_v21 = vadd.f32 %v9100_v62, %v3437_v53  ;;  %v11478_v62 = vld [vmem:[#allocation180_spill] sm:$0xff] }
 0x3b6   :  { %4451 = vrot.lane.b32.xlu1 %v4148_v4, %s6676_s18  ;;  %v4008_v4 = vrot.slane %v9093_v8, 1  ;;  %v11475_v8 = vld [vmem:[#allocation84_spill] sm:$0xff] }
 0x3b7   :  { %4453 = vrot.lane.b32.xlu0 %v4120_v28, %s6676_s18  ;;  %v3438_v52 = vadd.f32 %v11476_v22, %v11475_v8  ;;  %v11483_v22 = vld [vmem:[#allocation34_spill] sm:$0xff] }
 0x3b8   :  { %v9637_v34 = vpop.permute.xlu1 %3290  ;;  %v4177_v28 = vsel %vm4104_vm1, %v4008_v4, %v4036_v16  ;;  %v4205_v18 = vsel %vm4104_vm1, %v4092_v11, %v4008_v4  ;;  %v11482_v4 = vld [vmem:[#allocation92_spill] sm:$0xff] }
 0x3b9   :  { %v9640_v38 = vpop.permute.xlu0 %3852  ;;  %v4671_v40 = vadd.f32 %v9103_v2, %v3438_v52  ;;  %v11481_v2 = vld [vmem:[#allocation28_spill] sm:$0xff]  ;;  %v3440_v52 = vadd.f32 %v11483_v22, %v11482_v4 }
 0x3ba   :  { %4903 = vrot.lane.b32.xlu1 %v4672_v54, %s6677_s19  ;;  %v4064_v54 = vrot.slane %v11478_v62, 1  ;;  %v11489_v22 = vld [vmem:[#allocation4_spill] sm:$0xff] }
 0x3bb   :  { %4897 = vrot.lane.b32.xlu0 %v4669_v35, %s6677_s19 }
 0x3bc   :  { %v9649_v49 = vpop.permute.xlu1 %3854  ;;  %v4149_v53 = vsel %vm4104_vm1, %v4036_v16, %v4064_v54  ;;  %v4121_v8 = vsel %vm4104_vm1, %v4064_v54, %v4092_v11  ;;  %v11486_v11 = vld [vmem:[#allocation183_spill] sm:$0xff] }
 0x3bd   :  { %v9652_v45 = vpop.permute.xlu0 %3288  ;;  %v4037_v54 = vrot.slane %v11486_v11, 1 }
 0x3be   :  { %11474 = vst [vmem:[#allocation70_spill] sm:$0xff] %v9652_v45  ;;  %4899 = vrot.lane.b32.xlu1 %v4670_v21, %s6677_s19  ;;  %v11480_v21 = vld [vmem:[#allocation94_spill] sm:$0xff]  ;;  %v11498_v45 = vld [vmem:[#allocation100_spill] sm:$0xff] }
 0x3bf   :  { %4457 = vrot.lane.b32.xlu0 %v4177_v28, %s6676_s18  ;;  %v3443_v28 = vadd.f32 %v11481_v2, %v11480_v21  ;;  %v11485_v21 = vld [vmem:[#allocation27_spill] sm:$0xff] }
 0x3c0   :  { %v9660_v47 = vpop.permute.xlu1 %3294 }
 0x3c1   :  { %11477 = vst [vmem:[#allocation21_spill] sm:$0xff] %v9660_v47  ;;  %v9664_v35 = vpop.permute.xlu0 %4409 }
 0x3c2   :  { %4463 = vrot.lane.b32.xlu1 %v4205_v18, %s6676_s18  ;;  %v4673_v18 = vadd.f32 %v9135_v42, %v3440_v52 }
 0x3c3   :  { %4901 = vrot.lane.b32.xlu0 %v4671_v40, %s6677_s19  ;;  %v4676_v40 = vadd.f32 %v9154_v59, %v3443_v28  ;;  %v11487_v28 = vld [vmem:[#allocation188_spill] sm:$0xff] }
 0x3c4   :  { %v9670_v56 = vpop.permute.xlu1 %3858  ;;  %v4093_v4 = vrot.slane %v11487_v28, 1 }
 0x3c5   :  { %v9672_v9 = vpop.permute.xlu0 %3292 }
 0x3c6   :  { %11479 = vst [vmem:[#allocation72_spill] sm:$0xff] %v9672_v9  ;;  %4459 = vrot.lane.b32.xlu1 %v4149_v53, %s6676_s18  ;;  %v11484_v9 = vld [vmem:[#allocation88_spill] sm:$0xff]  ;;  %v4009_v53 = vrot.slane %v9157_v58, 1 }
 0x3c7   :  { %4461 = vrot.lane.b32.xlu0 %v4121_v8, %s6676_s18  ;;  %v3441_v2 = vadd.f32 %v11485_v21, %v11484_v9  ;;  %v11488_v58 = vld [vmem:[#allocation96_spill] sm:$0xff]  ;;  %v11492_v21 = vld [vmem:[#allocation187_spill] sm:$0xff] }
 0x3c8   :  { %v9685_v62 = vpop.permute.xlu1 %4415  ;;  %v4178_v9 = vsel %vm4104_vm1, %v4009_v53, %v4037_v54  ;;  %v3442_v52 = vadd.f32 %v11489_v22, %v11488_v58  ;;  %v4206_v28 = vsel %vm4104_vm1, %v4093_v4, %v4009_v53  ;;  %v11494_v22 = vld [vmem:[#allocation106_spill] sm:$0xff]  ;;  %v11496_v53 = vld [vmem:[#allocation104_spill] sm:$0xff] }
 0x3c9   :  { %v9688_v16 = vpop.permute.xlu0 %3856  ;;  %v4674_v8 = vadd.f32 %v9164_v15, %v3441_v2  ;;  %v4065_v2 = vrot.slane %v11492_v21, 1 }
 0x3ca   :  { %4911 = vrot.lane.b32.xlu1 %v4676_v40, %s6677_s19 }
 0x3cb   :  { %4905 = vrot.lane.b32.xlu0 %v4673_v18, %s6677_s19  ;;  %v11491_v18 = vld [vmem:[#allocation185_spill] sm:$0xff]  ;;  %v4122_v21 = vsel %vm4104_vm1, %v4065_v2, %v4093_v4  ;;  %v11500_v4 = vld [vmem:[#allocation191_spill] sm:$0xff] }
 0x3cc   :  { %v9697_v59 = vpop.permute.xlu1 %4411  ;;  %v4675_v15 = vadd.f32 %v11491_v18, %v3442_v52  ;;  %v11495_v52 = vld [vmem:[#allocation30_spill] sm:$0xff] }
 0x3cd   :  { %v9700_v42 = vpop.permute.xlu0 %4413  ;;  %v3447_v18 = vadd.f32 %v11495_v52, %v11494_v22  ;;  %v11499_v22 = vld [vmem:[#allocation29_spill] sm:$0xff] }
 0x3ce   :  { %4907 = vrot.lane.b32.xlu1 %v4674_v8, %s6677_s19  ;;  %v3445_v52 = vadd.f32 %v11499_v22, %v11498_v45  ;;  %v11505_v22 = vld [vmem:[#allocation195_spill] sm:$0xff] }
 0x3cf   :  { %4465 = vrot.lane.b32.xlu0 %v4178_v9, %s6676_s18  ;;  %v4150_v9 = vsel %vm4104_vm1, %v4037_v54, %v4065_v2 }
 0x3d0   :  { %v9708_v40 = vpop.permute.xlu1 %3298  ;;  %v4678_v2 = vadd.f32 %v9228_v12, %v3445_v52  ;;  %v4066_v52 = vrot.slane %v11505_v22, 1 }
 0x3d1   :  { %11490 = vst [vmem:[#allocation20_spill] sm:$0xff] %v9708_v40  ;;  %v9712_v11 = vpop.permute.xlu0 %3860  ;;  %v11497_v40 = vld [vmem:[#allocation5_spill] sm:$0xff] }
 0x3d2   :  { %4471 = vrot.lane.b32.xlu1 %v4206_v28, %s6676_s18  ;;  %v3444_v28 = vadd.f32 %v11497_v40, %v11496_v53  ;;  %v4038_v40 = vrot.slane %v11500_v4, 1  ;;  %v11503_v53 = vld [vmem:[#allocation6_spill] sm:$0xff] }
 0x3d3   :  { %4909 = vrot.lane.b32.xlu0 %v4675_v15, %s6677_s19  ;;  %v4680_v15 = vadd.f32 %v9218_v32, %v3447_v18  ;;  %v11501_v18 = vld [vmem:[#allocation196_spill] sm:$0xff] }
 0x3d4   :  { %v9718_v8 = vpop.permute.xlu1 %3862 }
 0x3d5   :  { %v9720_v58 = vpop.permute.xlu0 %3296 }
 0x3d6   :  { %11493 = vst [vmem:[#allocation65_spill] sm:$0xff] %v9720_v58  ;;  %4467 = vrot.lane.b32.xlu1 %v4150_v9, %s6676_s18  ;;  %v4677_v58 = vadd.f32 %v9199_v31, %v3444_v28  ;;  %v4010_v9 = vrot.slane %v9221_v25, 1  ;;  %v11502_v25 = vld [vmem:[#allocation108_spill] sm:$0xff] }
 0x3d7   :  { %4469 = vrot.lane.b32.xlu0 %v4122_v21, %s6676_s18  ;;  %v4094_v21 = vrot.slane %v11501_v18, 1  ;;  %v3446_v28 = vadd.f32 %v11503_v53, %v11502_v25  ;;  %v4095_v25 = vrot.slane %v9314_v50, 1  ;;  %v4151_v53 = vsel %vm4104_vm1, %v4038_v40, %v4066_v52 }
 0x3d8   :  { %v9733_v47 = vpop.permute.xlu1 %3302  ;;  %v4179_v45 = vsel %vm4104_vm1, %v4010_v9, %v4038_v40  ;;  %v4067_v50 = vrot.slane %v9306_v3, 1 }
 0x3d9   :  { %v9736_v54 = vpop.permute.xlu0 %4417  ;;  %v4207_v18 = vsel %vm4104_vm1, %v4094_v21, %v4010_v9  ;;  %v4123_v9 = vsel %vm4104_vm1, %v4066_v52, %v4094_v21 }
 0x3da   :  { %4919 = vrot.lane.b32.xlu1 %v4680_v15, %s6677_s19  ;;  %v11504_v15 = vld [vmem:[#allocation193_spill] sm:$0xff] }
 0x3db   :  { %4913 = vrot.lane.b32.xlu0 %v4677_v58, %s6677_s19  ;;  %v4679_v12 = vadd.f32 %v11504_v15, %v3446_v28  ;;  %v4011_v28 = vrot.slane %v9285_v30, 1  ;;  %v4039_v15 = vrot.slane %v9272_v7, 1  ;;  %v4096_v7 = vrot.slane %v9378_v51, 1 }
 0x3dc   :  { %v9745_v32 = vpop.permute.xlu1 %3866  ;;  %v4068_v51 = vrot.slane %v9370_v24, 1 }
 0x3dd   :  { %v9748_v31 = vpop.permute.xlu0 %3300  ;;  %v4208_v40 = vsel %vm4104_vm1, %v4095_v25, %v4011_v28  ;;  %v4180_v30 = vsel %vm4104_vm1, %v4011_v28, %v4039_v15  ;;  %v4152_v3 = vsel %vm4104_vm1, %v4039_v15, %v4067_v50  ;;  %v4040_v28 = vrot.slane %v9336_v46, 1 }
 0x3de   :  { %4915 = vrot.lane.b32.xlu1 %v4678_v2, %s6677_s19  ;;  %v4097_v46 = vrot.slane %v9442_v37, 1  ;;  %v4069_v37 = vrot.slane %v9434_v44, 1 }
 0x3df   :  { %4473 = vrot.lane.b32.xlu0 %v4179_v45, %s6676_s18  ;;  %v4153_v24 = vsel %vm4104_vm1, %v4040_v28, %v4068_v51 }
 0x3e0   :  { %v9756_v58 = vpop.permute.xlu1 %4423 }
 0x3e1   :  { %v9760_v4 = vpop.permute.xlu0 %3864 }
 0x3e2   :  { %4479 = vrot.lane.b32.xlu1 %v4207_v18, %s6676_s18  ;;  %v4012_v18 = vrot.slane %v9349_v39, 1 }
 0x3e3   :  { %4917 = vrot.lane.b32.xlu0 %v4679_v12, %s6677_s19 }
 0x3e4   :  { %v9766_v2 = vpop.permute.xlu1 %4419  ;;  %v4209_v15 = vsel %vm4104_vm1, %v4096_v7, %v4012_v18  ;;  %v4181_v39 = vsel %vm4104_vm1, %v4012_v18, %v4040_v28  ;;  %v4041_v18 = vrot.slane %v9400_v43, 1  ;;  %v4098_v43 = vrot.slane %v9506_v17, 1 }
 0x3e5   :  { %v9769_v45 = vpop.permute.xlu0 %4421  ;;  %v4070_v17 = vrot.slane %v9498_v36, 1 }
 0x3e6   :  { %4475 = vrot.lane.b32.xlu1 %v4151_v53, %s6676_s18  ;;  %v4124_v53 = vsel %vm4104_vm1, %v4067_v50, %v4095_v25  ;;  %v4154_v44 = vsel %vm4104_vm1, %v4041_v18, %v4069_v37 }
 0x3e7   :  { %4477 = vrot.lane.b32.xlu0 %v4123_v9, %s6676_s18 }
 0x3e8   :  { %v9779_v12 = vpop.permute.xlu1 %3306 }
 0x3e9   :  { %v9782_v22 = vpop.permute.xlu0 %3868 }
 0x3ea   :  { %4487 = vrot.lane.b32.xlu1 %v4208_v40, %s6676_s18 }
 0x3eb   :  { %4481 = vrot.lane.b32.xlu0 %v4180_v30, %s6676_s18  ;;  %v4013_v30 = vrot.slane %v9413_v13, 1 }
 0x3ec   :  { %v9790_v21 = vpop.permute.xlu1 %3870 }
 0x3ed   :  { %v9793_v52 = vpop.permute.xlu0 %3304  ;;  %v4210_v28 = vsel %vm4104_vm1, %v4097_v46, %v4013_v30  ;;  %v4182_v13 = vsel %vm4104_vm1, %v4013_v30, %v4041_v18  ;;  %v4042_v30 = vrot.slane %v9464_v60, 1  ;;  %v4099_v60 = vrot.slane %v9574_v26, 1 }
 0x3ee   :  { %4483 = vrot.lane.b32.xlu1 %v4152_v3, %s6676_s18  ;;  %v4125_v3 = vsel %vm4104_vm1, %v4068_v51, %v4096_v7  ;;  %v4071_v26 = vrot.slane %v9566_v33, 1 }
 0x3ef   :  { %4485 = vrot.lane.b32.xlu0 %v4124_v53, %s6676_s18  ;;  %v4155_v36 = vsel %vm4104_vm1, %v4042_v30, %v4070_v17 }
 0x3f0   :  { %v9803_v9 = vpop.permute.xlu1 %3310 }
 0x3f1   :  { %v9806_v40 = vpop.permute.xlu0 %4425 }
 0x3f2   :  { %4495 = vrot.lane.b32.xlu1 %v4209_v15, %s6676_s18 }
 0x3f3   :  { %4489 = vrot.lane.b32.xlu0 %v4181_v39, %s6676_s18  ;;  %v4014_v39 = vrot.slane %v9477_v55, 1 }
 0x3f4   :  { %v9814_v25 = vpop.permute.xlu1 %3874 }
 0x3f5   :  { %v9817_v50 = vpop.permute.xlu0 %3308  ;;  %v4211_v18 = vsel %vm4104_vm1, %v4098_v43, %v4014_v39  ;;  %v4183_v55 = vsel %vm4104_vm1, %v4014_v39, %v4042_v30  ;;  %v4043_v39 = vrot.slane %v9528_v5, 1  ;;  %v4100_v5 = vrot.slane %v9649_v49, 1 }
 0x3f6   :  { %4491 = vrot.lane.b32.xlu1 %v4153_v24, %s6676_s18  ;;  %v4126_v24 = vsel %vm4104_vm1, %v4069_v37, %v4097_v46  ;;  %v4072_v49 = vrot.slane %v9640_v38, 1 }
 0x3f7   :  { %4493 = vrot.lane.b32.xlu0 %v4125_v3, %s6676_s18  ;;  %v4156_v33 = vsel %vm4104_vm1, %v4043_v39, %v4071_v26 }
 0x3f8   :  { %v9827_v53 = vpop.permute.xlu1 %4431 }
 0x3f9   :  { %v9830_v15 = vpop.permute.xlu0 %3872 }
 0x3fa   :  { %4503 = vrot.lane.b32.xlu1 %v4210_v28, %s6676_s18 }
 0x3fb   :  { %4497 = vrot.lane.b32.xlu0 %v4182_v13, %s6676_s18  ;;  %v4015_v13 = vrot.slane %v9542_v20, 1 }
 0x3fc   :  { %v9838_v7 = vpop.permute.xlu1 %4427 }
 0x3fd   :  { %v9841_v51 = vpop.permute.xlu0 %4429  ;;  %v4212_v30 = vsel %vm4104_vm1, %v4099_v60, %v4015_v13  ;;  %v4184_v20 = vsel %vm4104_vm1, %v4015_v13, %v4043_v39  ;;  %v4044_v13 = vrot.slane %v9601_v27, 1  ;;  %v4101_v27 = vrot.slane %v9718_v8, 1 }
 0x3fe   :  { %4499 = vrot.lane.b32.xlu1 %v4154_v44, %s6676_s18  ;;  %v4127_v44 = vsel %vm4104_vm1, %v4070_v17, %v4098_v43  ;;  %v4073_v8 = vrot.slane %v9712_v11, 1 }
 0x3ff   :  { %4501 = vrot.lane.b32.xlu0 %v4126_v24, %s6676_s18  ;;  %v4157_v38 = vsel %vm4104_vm1, %v4044_v13, %v4072_v49 }
 0x400   :  { %v9851_v3 = vpop.permute.xlu1 %3314 }
 0x401   :  { %11506 = vst [vmem:[#allocation19_spill] sm:$0xff] %v9851_v3  ;;  %v9854_v28 = vpop.permute.xlu0 %3876 }
 0x402   :  { %4511 = vrot.lane.b32.xlu1 %v4211_v18, %s6676_s18 }
 0x403   :  { %4505 = vrot.lane.b32.xlu0 %v4183_v55, %s6676_s18  ;;  %v4016_v55 = vrot.slane %v9616_v19, 1 }
 0x404   :  { %v9862_v46 = vpop.permute.xlu1 %3878 }
 0x405   :  { %v9865_v37 = vpop.permute.xlu0 %3312  ;;  %v4213_v39 = vsel %vm4104_vm1, %v4100_v5, %v4016_v55  ;;  %v4185_v19 = vsel %vm4104_vm1, %v4016_v55, %v4044_v13  ;;  %v4045_v55 = vrot.slane %v9670_v56, 1  ;;  %v4102_v56 = vrot.slane %v9790_v21, 1 }
 0x406   :  { %11507 = vst [vmem:[#allocation67_spill] sm:$0xff] %v9865_v37  ;;  %4507 = vrot.lane.b32.xlu1 %v4155_v36, %s6676_s18  ;;  %v4128_v36 = vsel %vm4104_vm1, %v4071_v26, %v4099_v60  ;;  %v4130_v21 = vsel %vm4104_vm1, %v4073_v8, %v4101_v27  ;;  %v11547_v37 = vld [vmem:[#allocation15_spill] sm:$0xff] }
 0x407   :  { %4509 = vrot.lane.b32.xlu0 %v4127_v44, %s6676_s18 }
 0x408   :  { %v9875_v24 = vpop.permute.xlu1 %3318 }
 0x409   :  { %11508 = vst [vmem:[#allocation22_spill] sm:$0xff] %v9875_v24  ;;  %v9878_v18 = vpop.permute.xlu0 %4433 }
 0x40a   :  { %4519 = vrot.lane.b32.xlu1 %v4212_v30, %s6676_s18 }
 0x40b   :  { %4513 = vrot.lane.b32.xlu0 %v4184_v20, %s6676_s18  ;;  %v4017_v20 = vrot.slane %v9688_v16, 1 }
 0x40c   :  { %v9886_v43 = vpop.permute.xlu1 %4439 }
 0x40d   :  { %v9889_v17 = vpop.permute.xlu0 %3316  ;;  %v4214_v13 = vsel %vm4104_vm1, %v4101_v27, %v4017_v20  ;;  %v4186_v16 = vsel %vm4104_vm1, %v4017_v20, %v4045_v55 }
 0x40e   :  { %11509 = vst [vmem:[#allocation82_spill] sm:$0xff] %v9889_v17  ;;  %4515 = vrot.lane.b32.xlu1 %v4156_v33, %s6676_s18  ;;  %v4129_v33 = vsel %vm4104_vm1, %v4072_v49, %v4100_v5  ;;  %v4158_v49 = vsel %vm4104_vm1, %v4045_v55, %v4073_v8 }
 0x40f   :  { %4517 = vrot.lane.b32.xlu0 %v4128_v36, %s6676_s18 }
 0x410   :  { %v9899_v44 = vpop.permute.xlu1 %4435 }
 0x411   :  { %v9902_v30 = vpop.permute.xlu0 %4437 }
 0x412   :  { %4527 = vrot.lane.b32.xlu1 %v4213_v39, %s6676_s18 }
 0x413   :  { %4521 = vrot.lane.b32.xlu0 %v4185_v19, %s6676_s18  ;;  %v4018_v19 = vrot.slane %v9760_v4, 1 }
 0x414   :  { %v9910_v60 = vpop.permute.xlu1 %4447 }
 0x415   :  { %v9913_v26 = vpop.permute.xlu0 %4441  ;;  %v4215_v55 = vsel %vm4104_vm1, %v4102_v56, %v4018_v19 }
 0x416   :  { %4523 = vrot.lane.b32.xlu1 %v4157_v38, %s6676_s18  ;;  %v4046_v38 = vrot.slane %v9745_v32, 1 }
 0x417   :  { %4525 = vrot.lane.b32.xlu0 %v4129_v33, %s6676_s18  ;;  %v4074_v33 = vrot.slane %v9782_v22, 1  ;;  %v4103_v22 = vrot.slane %v9862_v46, 1  ;;  %v4047_v46 = vrot.slane %v9814_v25, 1 }
 0x418   :  { %v9923_v36 = vpop.permute.xlu1 %4443  ;;  %v4187_v27 = vsel %vm4104_vm1, %v4018_v19, %v4046_v38 }
 0x419   :  { %v9926_v39 = vpop.permute.xlu0 %4445 }
 0x41a   :  { %4535 = vrot.lane.b32.xlu1 %v4214_v13, %s6676_s18  ;;  %v4159_v13 = vsel %vm4104_vm1, %v4046_v38, %v4074_v33  ;;  %v11510_v38 = vld [vmem:[#allocation112_spill] sm:$0xff] }
 0x41b   :  { %4529 = vrot.lane.b32.xlu0 %v4186_v16, %s6676_s18  ;;  %v4019_v16 = vrot.slane %v9830_v15, 1 }
 0x41c   :  { %v4896_v5 = vpop.permute.xlu1 %4895 }
 0x41d   :  { %5229 = vst.msk [vmem:[%s10910_s2 + $0x18] sm:$0xff] %vm5225_vm2, %v4896_v5  ;;  %v4890_v11 = vpop.permute.xlu0 %4889  ;;  %v4131_v5 = vsel %vm4104_vm1, %v4074_v33, %v4102_v56  ;;  %v4216_v15 = vsel %vm4104_vm1, %v4103_v22, %v4019_v16 }
 0x41e   :  { %5226 = vst.msk [vmem:[%s10910_s2] sm:$0xff] %vm5225_vm2, %v4890_v11  ;;  %4531 = vrot.lane.b32.xlu1 %v4158_v49, %s6676_s18  ;;  %v4075_v49 = vrot.slane %v9854_v28, 1 }
 0x41f   :  { %4533 = vrot.lane.b32.xlu0 %v4130_v21, %s6676_s18  ;;  %v4188_v21 = vsel %vm4104_vm1, %v4019_v16, %v4047_v46  ;;  %v11514_v16 = vld [vmem:[#allocation202_spill] sm:$0xff] }
 0x420   :  { %v4892_v20 = vpop.permute.xlu1 %4891  ;;  %v4160_v28 = vsel %vm4104_vm1, %v4047_v46, %v4075_v49 }
 0x421   :  { %5227 = vst.msk [vmem:[%s10910_s2 + $0x8] sm:$0xff] %vm5225_vm2, %v4892_v20  ;;  %v9956_v4 = vpop.permute.xlu0 %4449  ;;  %v11511_v20 = vld [vmem:[#allocation35_spill] sm:$0xff] }
 0x422   :  { %4543 = vrot.lane.b32.xlu1 %v4215_v55, %s6676_s18  ;;  %v3449_v33 = vadd.f32 %v11511_v20, %v11510_v38  ;;  %v4132_v55 = vsel %vm4104_vm1, %v4075_v49, %v4103_v22  ;;  %v11518_v49 = vld [vmem:[#allocation120_spill] sm:$0xff]  ;;  %v11520_v20 = vld [vmem:[#allocation201_spill] sm:$0xff] }
 0x423   :  { %4537 = vrot.lane.b32.xlu0 %v4187_v27, %s6676_s18  ;;  %v11512_v27 = vld [vmem:[#allocation116_spill] sm:$0xff] }
 0x424   :  { %v9964_v32 = vpop.permute.xlu1 %4455 }
 0x425   :  { %v4894_v8 = vpop.permute.xlu0 %4893 }
 0x426   :  { %5228 = vst.msk [vmem:[%s10910_s2 + $0x10] sm:$0xff] %vm5225_vm2, %v4894_v8  ;;  %4539 = vrot.lane.b32.xlu1 %v4159_v13, %s6676_s18  ;;  %v11513_v8 = vld [vmem:[#allocation31_spill] sm:$0xff] }
 0x427   :  { %4541 = vrot.lane.b32.xlu0 %v4131_v5, %s6676_s18  ;;  %v3448_v13 = vadd.f32 %v11513_v8, %v11512_v27  ;;  %v4682_v5 = vadd.f32 %v11514_v16, %v3449_v33  ;;  %v11521_v27 = vld [vmem:[#allocation203_spill] sm:$0xff]  ;;  %v11522_v16 = vld [vmem:[#allocation124_spill] sm:$0xff] }
 0x428   :  { %v9979_v11 = vpop.permute.xlu1 %4451 }
 0x429   :  { %v9982_v19 = vpop.permute.xlu0 %4453 }
 0x42a   :  { %4551 = vrot.lane.b32.xlu1 %v4216_v15, %s6676_s18  ;;  %v11515_v15 = vld [vmem:[#allocation199_spill] sm:$0xff] }
 0x42b   :  { %4545 = vrot.lane.b32.xlu0 %v4188_v21, %s6676_s18  ;;  %v4681_v21 = vadd.f32 %v11515_v15, %v3448_v13 }
 0x42c   :  { %v4904_v56 = vpop.permute.xlu1 %4903 }
 0x42d   :  { %5233 = vst.msk [vmem:[%s10910_s2 + $0x38] sm:$0xff] %vm5225_vm2, %v4904_v56  ;;  %v4898_v25 = vpop.permute.xlu0 %4897 }
 0x42e   :  { %5230 = vst.msk [vmem:[%s10910_s2 + $0x20] sm:$0xff] %vm5225_vm2, %v4898_v25  ;;  %4547 = vrot.lane.b32.xlu1 %v4160_v28, %s6676_s18  ;;  %v11516_v25 = vld [vmem:[#allocation118_spill] sm:$0xff]  ;;  %v11519_v28 = vld [vmem:[#allocation32_spill] sm:$0xff] }
 0x42f   :  { %4549 = vrot.lane.b32.xlu0 %v4132_v55, %s6676_s18  ;;  %v3451_v22 = vadd.f32 %v11517_v6, %v11516_v25  ;;  %v3450_v38 = vadd.f32 %v11519_v28, %v11518_v49  ;;  %v11525_v25 = vld [vmem:[#allocation11_spill] sm:$0xff]  ;;  %v11526_v6 = vld [vmem:[#allocation210_spill] sm:$0xff] }
 0x430   :  { %v4900_v46 = vpop.permute.xlu1 %4899  ;;  %v11527_v28 = vld [vmem:[#allocation207_spill] sm:$0xff] }
 0x431   :  { %5231 = vst.msk [vmem:[%s10910_s2 + $0x28] sm:$0xff] %vm5225_vm2, %v4900_v46  ;;  %v10014_v56 = vpop.permute.xlu0 %4457  ;;  %v4684_v33 = vadd.f32 %v11520_v20, %v3451_v22  ;;  %v4683_v8 = vadd.f32 %v11521_v27, %v3450_v38  ;;  %v11523_v46 = vld [vmem:[#allocation33_spill] sm:$0xff]  ;;  %v11528_v27 = vld [vmem:[#allocation130_spill] sm:$0xff] }
 0x432   :  { %4923 = vrot.lane.b32.xlu1 %v4682_v5, %s6677_s19  ;;  %v3453_v15 = vadd.f32 %v11523_v46, %v11522_v16  ;;  %v11524_v5 = vld [vmem:[#allocation128_spill] sm:$0xff] }
 0x433   :  { %4921 = vrot.lane.b32.xlu0 %v4681_v21, %s6677_s19  ;;  %v3452_v21 = vadd.f32 %v11525_v25, %v11524_v5  ;;  %v11529_v16 = vld [vmem:[#allocation12_spill] sm:$0xff]  ;;  %v11532_v5 = vld [vmem:[#allocation209_spill] sm:$0xff] }
 0x434   :  { %v10023_v55 = vpop.permute.xlu1 %4463  ;;  %v4686_v22 = vadd.f32 %v11526_v6, %v3453_v15  ;;  %v3455_v46 = vadd.f32 %v11529_v16, %v11528_v27  ;;  %v11533_v15 = vld [vmem:[#allocation211_spill] sm:$0xff]  ;;  %v11535_v27 = vld [vmem:[#allocation9_spill] sm:$0xff] }
 0x435   :  { %v4902_v13 = vpop.permute.xlu0 %4901  ;;  %v4685_v38 = vadd.f32 %v11527_v28, %v3452_v21  ;;  %v11534_v28 = vld [vmem:[#allocation136_spill] sm:$0xff] }
 0x436   :  { %5232 = vst.msk [vmem:[%s10910_s2 + $0x30] sm:$0xff] %vm5225_vm2, %v4902_v13  ;;  %4927 = vrot.lane.b32.xlu1 %v4684_v33, %s6677_s19  ;;  %v11530_v13 = vld [vmem:[#allocation132_spill] sm:$0xff]  ;;  %v3457_v16 = vadd.f32 %v11535_v27, %v11534_v28  ;;  %v11541_v28 = vld [vmem:[#allocation13_spill] sm:$0xff]  ;;  %v11542_v27 = vld [vmem:[#allocation142_spill] sm:$0xff] }
 0x437   :  { %4925 = vrot.lane.b32.xlu0 %v4683_v8, %s6677_s19  ;;  %v11531_v33 = vld [vmem:[#allocation8_spill] sm:$0xff]  ;;  %v4688_v8 = vadd.f32 %v11532_v5, %v3455_v46  ;;  %v11539_v5 = vld [vmem:[#allocation215_spill] sm:$0xff] }
 0x438   :  { %v10037_v49 = vpop.permute.xlu1 %4459  ;;  %v3454_v17 = vadd.f32 %v11531_v33, %v11530_v13 }
 0x439   :  { %v10040_v20 = vpop.permute.xlu0 %4461 }
 0x43a   :  { %4931 = vrot.lane.b32.xlu1 %v4686_v22, %s6677_s19  ;;  %v4687_v6 = vadd.f32 %v11533_v15, %v3454_v17  ;;  %v11536_v22 = vld [vmem:[#allocation140_spill] sm:$0xff]  ;;  %v11538_v17 = vld [vmem:[#allocation218_spill] sm:$0xff] }
 0x43b   :  { %4929 = vrot.lane.b32.xlu0 %v4685_v38, %s6677_s19  ;;  %v11537_v38 = vld [vmem:[#allocation10_spill] sm:$0xff]  ;;  %v4690_v13 = vadd.f32 %v11538_v17, %v3457_v16  ;;  %v11544_v16 = vld [vmem:[#allocation217_spill] sm:$0xff]  ;;  %v11545_v17 = vld [vmem:[#allocation219_spill] sm:$0xff] }
 0x43c   :  { %v4912_v25 = vpop.permute.xlu1 %4911  ;;  %v3456_v46 = vadd.f32 %v11537_v38, %v11536_v22  ;;  %v11543_v22 = vld [vmem:[#allocation14_spill] sm:$0xff] }
 0x43d   :  { %5237 = vst.msk [vmem:[%s10910_s2 + $0x58] sm:$0xff] %vm5225_vm2, %v4912_v25  ;;  %v4906_v21 = vpop.permute.xlu0 %4905 }
 0x43e   :  { %5234 = vst.msk [vmem:[%s10910_s2 + $0x40] sm:$0xff] %vm5225_vm2, %v4906_v21  ;;  %4935 = vrot.lane.b32.xlu1 %v4688_v8, %s6677_s19  ;;  %v4689_v25 = vadd.f32 %v11539_v5, %v3456_v46  ;;  %v11540_v21 = vld [vmem:[#allocation141_spill] sm:$0xff] }
 0x43f   :  { %4933 = vrot.lane.b32.xlu0 %v4687_v6, %s6677_s19  ;;  %v3459_v8 = vadd.f32 %v11541_v28, %v11540_v21  ;;  %v3458_v6 = vadd.f32 %v11543_v22, %v11542_v27  ;;  %v11549_v21 = vld [vmem:[#allocation36_spill] sm:$0xff] }
 0x440   :  { %v4908_v33 = vpop.permute.xlu1 %4907 }
 0x441   :  { %5235 = vst.msk [vmem:[%s10910_s2 + $0x48] sm:$0xff] %vm5225_vm2, %v4908_v33  ;;  %v10070_v15 = vpop.permute.xlu0 %4465  ;;  %v4692_v38 = vadd.f32 %v11544_v16, %v3459_v8  ;;  %v4691_v5 = vadd.f32 %v11545_v17, %v3458_v6  ;;  %v11546_v33 = vld [vmem:[#allocation143_spill] sm:$0xff]  ;;  %v11551_v6 = vld [vmem:[#allocation37_spill] sm:$0xff] }
 0x442   :  { %4939 = vrot.lane.b32.xlu1 %v4690_v13, %s6677_s19  ;;  %v3461_v3 = vadd.f32 %v11547_v37, %v11546_v33  ;;  %v11548_v13 = vld [vmem:[#allocation144_spill] sm:$0xff]  ;;  %v11550_v37 = vld [vmem:[#allocation145_spill] sm:$0xff] }
 0x443   :  { %4937 = vrot.lane.b32.xlu0 %v4689_v25, %s6677_s19  ;;  %v3460_v25 = vadd.f32 %v11549_v21, %v11548_v13  ;;  %v3463_v16 = vadd.f32 %v11551_v6, %v11550_v37  ;;  %v11555_v13 = vld [vmem:[#allocation147_spill] sm:$0xff] }
 0x444   :  { %v10079_v46 = vpop.permute.xlu1 %4471  ;;  %v4694_v28 = vadd.f32 %v9484_v23, %v3461_v3  ;;  %v11554_v23 = vld [vmem:[#allocation224_spill] sm:$0xff]  ;;  %v11556_v21 = vld [vmem:[#allocation39_spill] sm:$0xff] }
 0x445   :  { %v4910_v24 = vpop.permute.xlu0 %4909  ;;  %v4693_v27 = vadd.f32 %v9455_v63, %v3460_v25  ;;  %v3465_v25 = vadd.f32 %v11556_v21, %v11555_v13  ;;  %v11564_v13 = vld [vmem:[#allocation230_spill] sm:$0xff] }
 0x446   :  { %5236 = vst.msk [vmem:[%s10910_s2 + $0x50] sm:$0xff] %vm5225_vm2, %v4910_v24  ;;  %4943 = vrot.lane.b32.xlu1 %v4692_v38, %s6677_s19  ;;  %v11552_v24 = vld [vmem:[#allocation146_spill] sm:$0xff] }
 0x447   :  { %4941 = vrot.lane.b32.xlu0 %v4691_v5, %s6677_s19  ;;  %v11553_v38 = vld [vmem:[#allocation38_spill] sm:$0xff]  ;;  %v4696_v5 = vadd.f32 %v9474_v10, %v3463_v16  ;;  %v11557_v10 = vld [vmem:[#allocation148_spill] sm:$0xff]  ;;  %v4698_v37 = vadd.f32 %v9550_v14, %v3465_v25  ;;  %v11563_v14 = vld [vmem:[#allocation229_spill] sm:$0xff] }
 0x448   :  { %v10093_v8 = vpop.permute.xlu1 %4467  ;;  %v3462_v17 = vadd.f32 %v11553_v38, %v11552_v24  ;;  %v11559_v38 = vld [vmem:[#allocation149_spill] sm:$0xff] }
 0x449   :  { %v10096_v22 = vpop.permute.xlu0 %4469 }
 0x44a   :  { %4947 = vrot.lane.b32.xlu1 %v4694_v28, %s6677_s19  ;;  %v4695_v3 = vadd.f32 %v11554_v23, %v3462_v17  ;;  %v11558_v28 = vld [vmem:[#allocation40_spill] sm:$0xff]  ;;  %v11560_v17 = vld [vmem:[#allocation41_spill] sm:$0xff]  ;;  %v11562_v23 = vld [vmem:[#allocation42_spill] sm:$0xff] }
 0x44b   :  { %4945 = vrot.lane.b32.xlu0 %v4693_v27, %s6677_s19  ;;  %v3464_v27 = vadd.f32 %v11558_v28, %v11557_v10  ;;  %v11565_v10 = vld [vmem:[#allocation151_spill] sm:$0xff] }
 0x44c   :  { %v4920_v33 = vpop.permute.xlu1 %4919  ;;  %v11566_v28 = vld [vmem:[#allocation43_spill] sm:$0xff] }
 0x44d   :  { %5241 = vst.msk [vmem:[%s10910_s2 + $0x78] sm:$0xff] %vm5225_vm2, %v4920_v33  ;;  %v4914_v63 = vpop.permute.xlu0 %4913  ;;  %v4697_v16 = vadd.f32 %v9519_v48, %v3464_v27  ;;  %v11561_v33 = vld [vmem:[#allocation150_spill] sm:$0xff]  ;;  %v3469_v27 = vadd.f32 %v11566_v28, %v11565_v10 }
 0x44e   :  { %5238 = vst.msk [vmem:[%s10910_s2 + $0x60] sm:$0xff] %vm5225_vm2, %v4914_v63  ;;  %4951 = vrot.lane.b32.xlu1 %v4696_v5, %s6677_s19  ;;  %v3467_v5 = vadd.f32 %v11560_v17, %v11559_v38 }
 0x44f   :  { %4949 = vrot.lane.b32.xlu0 %v4695_v3, %s6677_s19  ;;  %v3466_v3 = vadd.f32 %v11562_v23, %v11561_v33  ;;  %v4702_v38 = vadd.f32 %v9622_v61, %v3469_v27  ;;  %v11569_v23 = vld [vmem:[#allocation153_spill] sm:$0xff]  ;;  %v11574_v27 = vld [vmem:[#allocation47_spill] sm:$0xff] }
 0x450   :  { %v4916_v6 = vpop.permute.xlu1 %4915  ;;  %v4700_v63 = vadd.f32 %v11563_v14, %v3467_v5 }
 0x451   :  { %5239 = vst.msk [vmem:[%s10910_s2 + $0x68] sm:$0xff] %vm5225_vm2, %v4916_v6  ;;  %v10126_v24 = vpop.permute.xlu0 %4473  ;;  %v4699_v21 = vadd.f32 %v11564_v13, %v3466_v3  ;;  %v11568_v6 = vld [vmem:[#allocation44_spill] sm:$0xff]  ;;  %v11570_v3 = vld [vmem:[#allocation45_spill] sm:$0xff]  ;;  %v11571_v13 = vld [vmem:[#allocation154_spill] sm:$0xff] }
 0x452   :  { %4955 = vrot.lane.b32.xlu1 %v4698_v37, %s6677_s19  ;;  %v11567_v37 = vld [vmem:[#allocation152_spill] sm:$0xff]  ;;  %v3471_v14 = vadd.f32 %v11570_v3, %v11569_v23 }
 0x453   :  { %4953 = vrot.lane.b32.xlu0 %v4697_v16, %s6677_s19  ;;  %v3468_v16 = vadd.f32 %v11568_v6, %v11567_v37  ;;  %v11575_v6 = vld [vmem:[#allocation156_spill] sm:$0xff] }
 0x454   :  { %v10135_v48 = vpop.permute.xlu1 %4479 }
 0x455   :  { %v4918_v25 = vpop.permute.xlu0 %4917  ;;  %v4701_v5 = vadd.f32 %v9592_v1, %v3468_v16  ;;  %v11573_v1 = vld [vmem:[#allocation155_spill] sm:$0xff]  ;;  %v11576_v16 = vld [vmem:[#allocation48_spill] sm:$0xff] }
 0x456   :  { %5240 = vst.msk [vmem:[%s10910_s2 + $0x70] sm:$0xff] %vm5225_vm2, %v4918_v25  ;;  %4959 = vrot.lane.b32.xlu1 %v4700_v63, %s6677_s19  ;;  %v11572_v63 = vld [vmem:[#allocation46_spill] sm:$0xff]  ;;  %v3473_v37 = vadd.f32 %v11574_v27, %v11573_v1 }
 0x457   :  { %4957 = vrot.lane.b32.xlu0 %v4699_v21, %s6677_s19  ;;  %v3470_v25 = vadd.f32 %v11572_v63, %v11571_v13  ;;  %v4704_v21 = vadd.f32 %v9612_v0, %v3471_v14  ;;  %v11578_v14 = vld [vmem:[#allocation49_spill] sm:$0xff]  ;;  %v11579_v63 = vld [vmem:[#allocation158_spill] sm:$0xff] }
 0x458   :  { %v10149_v17 = vpop.permute.xlu1 %4475 }
 0x459   :  { %v10152_v33 = vpop.permute.xlu0 %4477  ;;  %v4703_v61 = vadd.f32 %v9624_v57, %v3470_v25  ;;  %v11577_v57 = vld [vmem:[#allocation157_spill] sm:$0xff]  ;;  %v11580_v25 = vld [vmem:[#allocation50_spill] sm:$0xff] }
 0x45a   :  { %4963 = vrot.lane.b32.xlu1 %v4702_v38, %s6677_s19  ;;  %v3472_v38 = vadd.f32 %v11576_v16, %v11575_v6  ;;  %v3475_v13 = vadd.f32 %v11578_v14, %v11577_v57  ;;  %v11583_v16 = vld [vmem:[#allocation160_spill] sm:$0xff] }
 0x45b   :  { %4961 = vrot.lane.b32.xlu0 %v4701_v5, %s6677_s19  ;;  %v4706_v5 = vadd.f32 %v9697_v59, %v3473_v37  ;;  %v11582_v37 = vld [vmem:[#allocation51_spill] sm:$0xff] }
 0x45c   :  { %v10161_v10 = vpop.permute.xlu1 %4487  ;;  %v4705_v0 = vadd.f32 %v9664_v35, %v3472_v38  ;;  %v11581_v35 = vld [vmem:[#allocation159_spill] sm:$0xff]  ;;  %v11584_v38 = vld [vmem:[#allocation52_spill] sm:$0xff] }
 0x45d   :  { %v10164_v28 = vpop.permute.xlu0 %4481  ;;  %v3477_v6 = vadd.f32 %v11582_v37, %v11581_v35 }
 0x45e   :  { %4967 = vrot.lane.b32.xlu1 %v4704_v21, %s6677_s19  ;;  %v3474_v21 = vadd.f32 %v11580_v25, %v11579_v63  ;;  %v11587_v25 = vld [vmem:[#allocation162_spill] sm:$0xff] }
 0x45f   :  { %4965 = vrot.lane.b32.xlu0 %v4703_v61, %s6677_s19  ;;  %v4708_v61 = vadd.f32 %v9685_v62, %v3475_v13  ;;  %v11586_v13 = vld [vmem:[#allocation53_spill] sm:$0xff] }
 0x460   :  { %v10173_v23 = vpop.permute.xlu1 %4483  ;;  %v4707_v59 = vadd.f32 %v9700_v42, %v3474_v21  ;;  %v11585_v42 = vld [vmem:[#allocation161_spill] sm:$0xff]  ;;  %v11588_v21 = vld [vmem:[#allocation54_spill] sm:$0xff] }
 0x461   :  { %v10176_v3 = vpop.permute.xlu0 %4485  ;;  %v3479_v63 = vadd.f32 %v11586_v13, %v11585_v42 }
 0x462   :  { %4971 = vrot.lane.b32.xlu1 %v4706_v5, %s6677_s19  ;;  %v3476_v5 = vadd.f32 %v11584_v38, %v11583_v16  ;;  %v11591_v38 = vld [vmem:[#allocation164_spill] sm:$0xff] }
 0x463   :  { %4969 = vrot.lane.b32.xlu0 %v4705_v0, %s6677_s19  ;;  %v4710_v0 = vadd.f32 %v9766_v2, %v3477_v6  ;;  %v11590_v6 = vld [vmem:[#allocation55_spill] sm:$0xff] }
 0x464   :  { %v10185_v1 = vpop.permute.xlu1 %4495  ;;  %v4709_v62 = vadd.f32 %v9736_v54, %v3476_v5  ;;  %v11589_v54 = vld [vmem:[#allocation163_spill] sm:$0xff]  ;;  %v11592_v5 = vld [vmem:[#allocation56_spill] sm:$0xff] }
 0x465   :  { %v10188_v27 = vpop.permute.xlu0 %4489  ;;  %v3481_v16 = vadd.f32 %v11590_v6, %v11589_v54 }
 0x466   :  { %4975 = vrot.lane.b32.xlu1 %v4708_v61, %s6677_s19  ;;  %v3478_v61 = vadd.f32 %v11588_v21, %v11587_v25  ;;  %v11595_v21 = vld [vmem:[#allocation166_spill] sm:$0xff] }
 0x467   :  { %4973 = vrot.lane.b32.xlu0 %v4707_v59, %s6677_s19  ;;  %v4712_v59 = vadd.f32 %v9756_v58, %v3479_v63  ;;  %v11594_v63 = vld [vmem:[#allocation57_spill] sm:$0xff] }
 0x468   :  { %v10197_v57 = vpop.permute.xlu1 %4491  ;;  %v4711_v2 = vadd.f32 %v9769_v45, %v3478_v61  ;;  %v11593_v45 = vld [vmem:[#allocation165_spill] sm:$0xff]  ;;  %v11596_v61 = vld [vmem:[#allocation16_spill] sm:$0xff] }
 0x469   :  { %v10200_v14 = vpop.permute.xlu0 %4493  ;;  %v3483_v25 = vadd.f32 %v11594_v63, %v11593_v45 }
 0x46a   :  { %4979 = vrot.lane.b32.xlu1 %v4710_v0, %s6677_s19  ;;  %v3480_v0 = vadd.f32 %v11592_v5, %v11591_v38  ;;  %v11599_v5 = vld [vmem:[#allocation168_spill] sm:$0xff] }
 0x46b   :  { %4977 = vrot.lane.b32.xlu0 %v4709_v62, %s6677_s19  ;;  %v4714_v62 = vadd.f32 %v9838_v7, %v3481_v16  ;;  %v11598_v16 = vld [vmem:[#allocation17_spill] sm:$0xff] }
 0x46c   :  { %v10209_v35 = vpop.permute.xlu1 %4503  ;;  %v4713_v58 = vadd.f32 %v9806_v40, %v3480_v0  ;;  %v11597_v40 = vld [vmem:[#allocation167_spill] sm:$0xff]  ;;  %v11600_v0 = vld [vmem:[#allocation26_spill] sm:$0xff] }
 0x46d   :  { %v10212_v37 = vpop.permute.xlu0 %4497  ;;  %v3485_v38 = vadd.f32 %v11598_v16, %v11597_v40 }
 0x46e   :  { %4983 = vrot.lane.b32.xlu1 %v4712_v59, %s6677_s19  ;;  %v3482_v59 = vadd.f32 %v11596_v61, %v11595_v21  ;;  %v11603_v61 = vld [vmem:[#allocation170_spill] sm:$0xff] }
 0x46f   :  { %4981 = vrot.lane.b32.xlu0 %v4711_v2, %s6677_s19  ;;  %v4716_v2 = vadd.f32 %v9827_v53, %v3483_v25  ;;  %v11602_v25 = vld [vmem:[#allocation18_spill] sm:$0xff] }
 0x470   :  { %v10221_v42 = vpop.permute.xlu1 %4499  ;;  %v4715_v7 = vadd.f32 %v9841_v51, %v3482_v59  ;;  %v11601_v51 = vld [vmem:[#allocation169_spill] sm:$0xff]  ;;  %v11604_v59 = vld [vmem:[#allocation58_spill] sm:$0xff] }
 0x471   :  { %v10224_v13 = vpop.permute.xlu0 %4501  ;;  %v3487_v21 = vadd.f32 %v11602_v25, %v11601_v51 }
 0x472   :  { %4987 = vrot.lane.b32.xlu1 %v4714_v62, %s6677_s19  ;;  %v3484_v62 = vadd.f32 %v11600_v0, %v11599_v5  ;;  %v11607_v0 = vld [vmem:[#allocation172_spill] sm:$0xff] }
 0x473   :  { %4985 = vrot.lane.b32.xlu0 %v4713_v58, %s6677_s19  ;;  %v4718_v58 = vadd.f32 %v9899_v44, %v3485_v38  ;;  %v11606_v38 = vld [vmem:[#allocation59_spill] sm:$0xff] }
 0x474   :  { %v10233_v54 = vpop.permute.xlu1 %4511  ;;  %v4717_v53 = vadd.f32 %v9878_v18, %v3484_v62  ;;  %v11605_v18 = vld [vmem:[#allocation171_spill] sm:$0xff]  ;;  %v11608_v62 = vld [vmem:[#allocation60_spill] sm:$0xff] }
 0x475   :  { %v10236_v6 = vpop.permute.xlu0 %4505  ;;  %v3489_v5 = vadd.f32 %v11606_v38, %v11605_v18 }
 0x476   :  { %4991 = vrot.lane.b32.xlu1 %v4716_v2, %s6677_s19  ;;  %v3486_v2 = vadd.f32 %v11604_v59, %v11603_v61  ;;  %v11611_v59 = vld [vmem:[#allocation174_spill] sm:$0xff] }
 0x477   :  { %4989 = vrot.lane.b32.xlu0 %v4715_v7, %s6677_s19  ;;  %v4720_v7 = vadd.f32 %v9886_v43, %v3487_v21  ;;  %v11610_v21 = vld [vmem:[#allocation61_spill] sm:$0xff] }
 0x478   :  { %v10245_v45 = vpop.permute.xlu1 %4507  ;;  %v4719_v44 = vadd.f32 %v9902_v30, %v3486_v2  ;;  %v11609_v30 = vld [vmem:[#allocation173_spill] sm:$0xff]  ;;  %v11612_v2 = vld [vmem:[#allocation62_spill] sm:$0xff] }
 0x479   :  { %v10248_v63 = vpop.permute.xlu0 %4509  ;;  %v3491_v61 = vadd.f32 %v11610_v21, %v11609_v30 }
 0x47a   :  { %4995 = vrot.lane.b32.xlu1 %v4718_v58, %s6677_s19  ;;  %v3488_v58 = vadd.f32 %v11608_v62, %v11607_v0  ;;  %v11615_v62 = vld [vmem:[#allocation176_spill] sm:$0xff] }
 0x47b   :  { %4993 = vrot.lane.b32.xlu0 %v4717_v53, %s6677_s19  ;;  %v4722_v53 = vadd.f32 %v9923_v36, %v3489_v5  ;;  %v11614_v5 = vld [vmem:[#allocation63_spill] sm:$0xff] }
 0x47c   :  { %v10257_v40 = vpop.permute.xlu1 %4519  ;;  %v4721_v43 = vadd.f32 %v9913_v26, %v3488_v58  ;;  %v11613_v26 = vld [vmem:[#allocation175_spill] sm:$0xff]  ;;  %v11616_v58 = vld [vmem:[#allocation64_spill] sm:$0xff] }
 0x47d   :  { %v10260_v16 = vpop.permute.xlu0 %4513  ;;  %v3493_v0 = vadd.f32 %v11614_v5, %v11613_v26 }
 0x47e   :  { %4999 = vrot.lane.b32.xlu1 %v4720_v7, %s6677_s19  ;;  %v3490_v7 = vadd.f32 %v11612_v2, %v11611_v59  ;;  %v11619_v2 = vld [vmem:[#allocation178_spill] sm:$0xff] }
 0x47f   :  { %4997 = vrot.lane.b32.xlu0 %v4719_v44, %s6677_s19  ;;  %v4724_v44 = vadd.f32 %v9910_v60, %v3491_v61  ;;  %v11618_v61 = vld [vmem:[#allocation66_spill] sm:$0xff] }
 0x480   :  { %v10269_v51 = vpop.permute.xlu1 %4515  ;;  %v4723_v36 = vadd.f32 %v9926_v39, %v3490_v7  ;;  %v11617_v39 = vld [vmem:[#allocation177_spill] sm:$0xff]  ;;  %v11620_v7 = vld [vmem:[#allocation68_spill] sm:$0xff] }
 0x481   :  { %v10272_v25 = vpop.permute.xlu0 %4517  ;;  %v3495_v59 = vadd.f32 %v11618_v61, %v11617_v39 }
 0x482   :  { %5003 = vrot.lane.b32.xlu1 %v4722_v53, %s6677_s19  ;;  %v3492_v53 = vadd.f32 %v11616_v58, %v11615_v62  ;;  %v11623_v58 = vld [vmem:[#allocation181_spill] sm:$0xff] }
 0x483   :  { %5001 = vrot.lane.b32.xlu0 %v4721_v43, %s6677_s19  ;;  %v4726_v43 = vadd.f32 %v9979_v11, %v3493_v0  ;;  %v11622_v0 = vld [vmem:[#allocation69_spill] sm:$0xff] }
 0x484   :  { %v10281_v18 = vpop.permute.xlu1 %4527  ;;  %v4725_v60 = vadd.f32 %v9956_v4, %v3492_v53  ;;  %v11621_v4 = vld [vmem:[#allocation179_spill] sm:$0xff] }
 0x485   :  { %v10284_v38 = vpop.permute.xlu0 %4521  ;;  %v3497_v62 = vadd.f32 %v11622_v0, %v11621_v4  ;;  %v11624_v53 = vld [vmem:[#allocation71_spill] sm:$0xff] }
 0x486   :  { %5007 = vrot.lane.b32.xlu1 %v4724_v44, %s6677_s19  ;;  %v3494_v44 = vadd.f32 %v11620_v7, %v11619_v2  ;;  %v11627_v7 = vld [vmem:[#allocation184_spill] sm:$0xff] }
 0x487   :  { %5005 = vrot.lane.b32.xlu0 %v4723_v36, %s6677_s19  ;;  %v4728_v36 = vadd.f32 %v9964_v32, %v3495_v59  ;;  %v11626_v59 = vld [vmem:[#allocation73_spill] sm:$0xff] }
 0x488   :  { %v10293_v30 = vpop.permute.xlu1 %4523  ;;  %v4727_v11 = vadd.f32 %v9982_v19, %v3494_v44  ;;  %v11625_v19 = vld [vmem:[#allocation182_spill] sm:$0xff] }
 0x489   :  { %v10296_v21 = vpop.permute.xlu0 %4525  ;;  %v3499_v2 = vadd.f32 %v11626_v59, %v11625_v19  ;;  %v11628_v44 = vld [vmem:[#allocation74_spill] sm:$0xff] }
 0x48a   :  { %5011 = vrot.lane.b32.xlu1 %v4726_v43, %s6677_s19  ;;  %v3496_v43 = vadd.f32 %v11624_v53, %v11623_v58  ;;  %v11631_v53 = vld [vmem:[#allocation189_spill] sm:$0xff] }
 0x48b   :  { %5009 = vrot.lane.b32.xlu0 %v4725_v60, %s6677_s19  ;;  %v4730_v60 = vadd.f32 %v10037_v49, %v3497_v62  ;;  %v11630_v62 = vld [vmem:[#allocation75_spill] sm:$0xff] }
 0x48c   :  { %v10305_v26 = vpop.permute.xlu1 %4535  ;;  %v4729_v32 = vadd.f32 %v10014_v56, %v3496_v43  ;;  %v11629_v56 = vld [vmem:[#allocation186_spill] sm:$0xff]  ;;  %v11632_v43 = vld [vmem:[#allocation77_spill] sm:$0xff] }
 0x48d   :  { %v10308_v5 = vpop.permute.xlu0 %4529  ;;  %v3501_v58 = vadd.f32 %v11630_v62, %v11629_v56 }
 0x48e   :  { %5015 = vrot.lane.b32.xlu1 %v4728_v36, %s6677_s19  ;;  %v3498_v36 = vadd.f32 %v11628_v44, %v11627_v7  ;;  %v11635_v44 = vld [vmem:[#allocation192_spill] sm:$0xff] }
 0x48f   :  { %5013 = vrot.lane.b32.xlu0 %v4727_v11, %s6677_s19  ;;  %v4732_v11 = vadd.f32 %v10023_v55, %v3499_v2  ;;  %v11634_v2 = vld [vmem:[#allocation78_spill] sm:$0xff] }
 0x490   :  { %v10317_v39 = vpop.permute.xlu1 %4531  ;;  %v4731_v49 = vadd.f32 %v10040_v20, %v3498_v36  ;;  %v11633_v20 = vld [vmem:[#allocation190_spill] sm:$0xff]  ;;  %v11636_v36 = vld [vmem:[#allocation79_spill] sm:$0xff] }
 0x491   :  { %v10320_v61 = vpop.permute.xlu0 %4533  ;;  %v3503_v7 = vadd.f32 %v11634_v2, %v11633_v20 }
 0x492   :  { %5019 = vrot.lane.b32.xlu1 %v4730_v60, %s6677_s19  ;;  %v3500_v60 = vadd.f32 %v11632_v43, %v11631_v53  ;;  %v11639_v43 = vld [vmem:[#allocation197_spill] sm:$0xff] }
 0x493   :  { %5017 = vrot.lane.b32.xlu0 %v4729_v32, %s6677_s19  ;;  %v4734_v32 = vadd.f32 %v10093_v8, %v3501_v58  ;;  %v11638_v58 = vld [vmem:[#allocation81_spill] sm:$0xff] }
 0x494   :  { %v10329_v4 = vpop.permute.xlu1 %4543  ;;  %v4733_v55 = vadd.f32 %v10070_v15, %v3500_v60  ;;  %v11637_v15 = vld [vmem:[#allocation194_spill] sm:$0xff]  ;;  %v11640_v60 = vld [vmem:[#allocation83_spill] sm:$0xff] }
 0x495   :  { %v10332_v0 = vpop.permute.xlu0 %4537  ;;  %v3505_v53 = vadd.f32 %v11638_v58, %v11637_v15  ;;  %v11645_v58 = vld [vmem:[#allocation204_spill] sm:$0xff] }
 0x496   :  { %5023 = vrot.lane.b32.xlu1 %v4732_v11, %s6677_s19  ;;  %v3502_v11 = vadd.f32 %v11636_v36, %v11635_v44  ;;  %v11643_v36 = vld [vmem:[#allocation200_spill] sm:$0xff] }
 0x497   :  { %5021 = vrot.lane.b32.xlu0 %v4731_v49, %s6677_s19  ;;  %v4736_v49 = vadd.f32 %v10079_v46, %v3503_v7  ;;  %v11642_v7 = vld [vmem:[#allocation85_spill] sm:$0xff] }
 0x498   :  { %v10341_v19 = vpop.permute.xlu1 %4539  ;;  %v4735_v8 = vadd.f32 %v10096_v22, %v3502_v11  ;;  %v11641_v22 = vld [vmem:[#allocation198_spill] sm:$0xff] }
 0x499   :  { %v10344_v59 = vpop.permute.xlu0 %4541  ;;  %v3507_v44 = vadd.f32 %v11642_v7, %v11641_v22  ;;  %v11644_v11 = vld [vmem:[#allocation86_spill] sm:$0xff] }
 0x49a   :  { %5027 = vrot.lane.b32.xlu1 %v4734_v32, %s6677_s19  ;;  %v3504_v32 = vadd.f32 %v11640_v60, %v11639_v43  ;;  %v11648_v60 = vld [vmem:[#allocation89_spill] sm:$0xff]  ;;  %v11649_v7 = vld [vmem:[#allocation206_spill] sm:$0xff] }
 0x49b   :  { %5025 = vrot.lane.b32.xlu0 %v4733_v55, %s6677_s19  ;;  %v4738_v55 = vadd.f32 %v10149_v17, %v3505_v53  ;;  %v11646_v53 = vld [vmem:[#allocation87_spill] sm:$0xff] }
 0x49c   :  { %v10353_v56 = vpop.permute.xlu1 %4551  ;;  %v4737_v46 = vadd.f32 %v10126_v24, %v3504_v32  ;;  %v3509_v43 = vadd.f32 %v11646_v53, %v11645_v58  ;;  %v11654_v58 = vld [vmem:[#allocation93_spill] sm:$0xff] }
 0x49d   :  { %v10356_v62 = vpop.permute.xlu0 %4545 }
 0x49e   :  { %5031 = vrot.lane.b32.xlu1 %v4736_v49, %s6677_s19  ;;  %v3506_v49 = vadd.f32 %v11644_v11, %v11643_v36  ;;  %v11652_v11 = vld [vmem:[#allocation91_spill] sm:$0xff] }
 0x49f   :  { %5029 = vrot.lane.b32.xlu0 %v4735_v8, %s6677_s19  ;;  %v4740_v8 = vadd.f32 %v10135_v48, %v3507_v44  ;;  %v11647_v48 = vld [vmem:[#allocation205_spill] sm:$0xff]  ;;  %v11650_v44 = vld [vmem:[#allocation90_spill] sm:$0xff] }
 0x4a0   :  { %v10365_v20 = vpop.permute.xlu1 %4547  ;;  %v4739_v17 = vadd.f32 %v10152_v33, %v3506_v49  ;;  %v3508_v32 = vadd.f32 %v11648_v60, %v11647_v48  ;;  %v4742_v33 = vadd.f32 %v10173_v23, %v3509_v43  ;;  %v3511_v36 = vadd.f32 %v11650_v44, %v11649_v7  ;;  %v11651_v23 = vld [vmem:[#allocation208_spill] sm:$0xff]  ;;  %v11656_v43 = vld [vmem:[#allocation95_spill] sm:$0xff]  ;;  %v11660_v7 = vld [vmem:[#allocation98_spill] sm:$0xff] }
 0x4a1   :  { %v10368_v2 = vpop.permute.xlu0 %4549  ;;  %v3510_v49 = vadd.f32 %v11652_v11, %v11651_v23 }
 0x4a2   :  { %5035 = vrot.lane.b32.xlu1 %v4738_v55, %s6677_s19 }
 0x4a3   :  { %5033 = vrot.lane.b32.xlu0 %v4737_v46, %s6677_s19  ;;  %v4741_v46 = vadd.f32 %v10164_v28, %v3508_v32  ;;  %v4744_v28 = vadd.f32 %v10161_v10, %v3511_v36  ;;  %v11655_v10 = vld [vmem:[#allocation213_spill] sm:$0xff] }
 0x4a4   :  { %v4924_v15 = vpop.permute.xlu1 %4923  ;;  %v3512_v48 = vadd.f32 %v11656_v43, %v11655_v10  ;;  %v11665_v10 = vld [vmem:[#allocation222_spill] sm:$0xff] }
 0x4a5   :  { %5243 = vst.msk [vmem:[%s10910_s2 + $0x88] sm:$0xff] %vm5225_vm2, %v4924_v15  ;;  %v4922_v24 = vpop.permute.xlu0 %4921  ;;  %v4743_v15 = vadd.f32 %v10176_v3, %v3510_v49  ;;  %v11661_v49 = vld [vmem:[#allocation220_spill] sm:$0xff]  ;;  %v11666_v43 = vld [vmem:[#allocation102_spill] sm:$0xff] }
 0x4a6   :  { %5242 = vst.msk [vmem:[%s10910_s2 + $0x80] sm:$0xff] %vm5225_vm2, %v4922_v24  ;;  %5039 = vrot.lane.b32.xlu1 %v4740_v8, %s6677_s19  ;;  %v11653_v24 = vld [vmem:[#allocation212_spill] sm:$0xff]  ;;  %v4745_v32 = vadd.f32 %v10188_v27, %v3512_v48  ;;  %v3519_v48 = vadd.f32 %v11666_v43, %v11665_v10  ;;  %v11680_v10 = vld [vmem:[#allocation113_spill] sm:$0xff] }
 0x4a7   :  { %5037 = vrot.lane.b32.xlu0 %v4739_v17, %s6677_s19  ;;  %v3513_v53 = vadd.f32 %v11654_v58, %v11653_v24 }
 0x4a8   :  { %v4928_v55 = vpop.permute.xlu1 %4927 }
 0x4a9   :  { %5245 = vst.msk [vmem:[%s10910_s2 + $0x98] sm:$0xff] %vm5225_vm2, %v4928_v55  ;;  %v4926_v22 = vpop.permute.xlu0 %4925  ;;  %v4746_v3 = vadd.f32 %v10197_v57, %v3513_v53  ;;  %v11657_v55 = vld [vmem:[#allocation214_spill] sm:$0xff]  ;;  %v11659_v57 = vld [vmem:[#allocation216_spill] sm:$0xff] }
 0x4aa   :  { %5244 = vst.msk [vmem:[%s10910_s2 + $0x90] sm:$0xff] %vm5225_vm2, %v4926_v22  ;;  %5043 = vrot.lane.b32.xlu1 %v4742_v33, %s6677_s19  ;;  %v3514_v44 = vadd.f32 %v11660_v7, %v11659_v57  ;;  %v11672_v7 = vld [vmem:[#allocation107_spill] sm:$0xff] }
 0x4ab   :  { %5041 = vrot.lane.b32.xlu0 %v4741_v46, %s6677_s19  ;;  %v11658_v46 = vld [vmem:[#allocation97_spill] sm:$0xff] }
 0x4ac   :  { %v4932_v8 = vpop.permute.xlu1 %4931  ;;  %v3515_v22 = vadd.f32 %v11658_v46, %v11657_v55  ;;  %v4747_v23 = vadd.f32 %v10200_v14, %v3514_v44  ;;  %v11669_v46 = vld [vmem:[#allocation225_spill] sm:$0xff] }
 0x4ad   :  { %5247 = vst.msk [vmem:[%s10910_s2 + $0xa8] sm:$0xff] %vm5225_vm2, %v4932_v8  ;;  %v4930_v17 = vpop.permute.xlu0 %4929 }
 0x4ae   :  { %5246 = vst.msk [vmem:[%s10910_s2 + $0xa0] sm:$0xff] %vm5225_vm2, %v4930_v17  ;;  %5047 = vrot.lane.b32.xlu1 %v4744_v28, %s6677_s19  ;;  %v4748_v27 = vadd.f32 %v10185_v1, %v3515_v22  ;;  %v11662_v28 = vld [vmem:[#allocation99_spill] sm:$0xff]  ;;  %v11663_v1 = vld [vmem:[#allocation221_spill] sm:$0xff] }
 0x4af   :  { %5045 = vrot.lane.b32.xlu0 %v4743_v15, %s6677_s19  ;;  %v3517_v8 = vadd.f32 %v11662_v28, %v11661_v49  ;;  %v11664_v15 = vld [vmem:[#allocation101_spill] sm:$0xff] }
 0x4b0   :  { %v4936_v60 = vpop.permute.xlu1 %4935  ;;  %v3516_v17 = vadd.f32 %v11664_v15, %v11663_v1  ;;  %v11670_v22 = vld [vmem:[#allocation105_spill] sm:$0xff] }
 0x4b1   :  { %5249 = vst.msk [vmem:[%s10910_s2 + $0xb8] sm:$0xff] %vm5225_vm2, %v4936_v60  ;;  %v4934_v33 = vpop.permute.xlu0 %4933  ;;  %v4750_v14 = vadd.f32 %v10221_v42, %v3517_v8  ;;  %v11667_v42 = vld [vmem:[#allocation223_spill] sm:$0xff]  ;;  %v3521_v57 = vadd.f32 %v11670_v22, %v11669_v46  ;;  %v11674_v49 = vld [vmem:[#allocation109_spill] sm:$0xff]  ;;  %v11676_v8 = vld [vmem:[#allocation110_spill] sm:$0xff] }
 0x4b2   :  { %5248 = vst.msk [vmem:[%s10910_s2 + $0xb0] sm:$0xff] %vm5225_vm2, %v4934_v33  ;;  %5051 = vrot.lane.b32.xlu1 %v4746_v3, %s6677_s19  ;;  %v4749_v58 = vadd.f32 %v10212_v37, %v3516_v17  ;;  %v11668_v3 = vld [vmem:[#allocation103_spill] sm:$0xff]  ;;  %v4752_v37 = vadd.f32 %v10209_v35, %v3519_v48  ;;  %v11671_v35 = vld [vmem:[#allocation226_spill] sm:$0xff]  ;;  %v11683_v46 = vld [vmem:[#allocation117_spill] sm:$0xff] }
 0x4b3   :  { %5049 = vrot.lane.b32.xlu0 %v4745_v32, %s6677_s19  ;;  %v3518_v60 = vadd.f32 %v11668_v3, %v11667_v42  ;;  %v3520_v44 = vadd.f32 %v11672_v7, %v11671_v35  ;;  %v3529_v22 = vadd.f32 %v11683_v46, %v9637_v34 }
 0x4b4   :  { %v4940_v36 = vpop.permute.xlu1 %4939 }
 0x4b5   :  { %5251 = vst.msk [vmem:[%s10910_s2 + $0xc8] sm:$0xff] %vm5225_vm2, %v4940_v36  ;;  %v4938_v11 = vpop.permute.xlu0 %4937  ;;  %v4751_v33 = vadd.f32 %v10224_v13, %v3518_v60  ;;  %v4754_v13 = vadd.f32 %v10245_v45, %v3521_v57  ;;  %v4753_v36 = vadd.f32 %v10236_v6, %v3520_v44  ;;  %v11675_v45 = vld [vmem:[#allocation228_spill] sm:$0xff]  ;;  %v11681_v60 = vld [vmem:[#allocation114_spill] sm:$0xff]  ;;  %v11686_v44 = vld [vmem:[#allocation21_spill] sm:$0xff] }
 0x4b6   :  { %5250 = vst.msk [vmem:[%s10910_s2 + $0xc0] sm:$0xff] %vm5225_vm2, %v4938_v11  ;;  %5055 = vrot.lane.b32.xlu1 %v4748_v27, %s6677_s19  ;;  %v11673_v11 = vld [vmem:[#allocation227_spill] sm:$0xff]  ;;  %v3522_v1 = vadd.f32 %v11676_v8, %v11675_v45  ;;  %v11690_v45 = vld [vmem:[#allocation20_spill] sm:$0xff] }
 0x4b7   :  { %5053 = vrot.lane.b32.xlu0 %v4747_v23, %s6677_s19  ;;  %v3523_v28 = vadd.f32 %v11674_v49, %v11673_v11  ;;  %v11691_v8 = vld [vmem:[#allocation123_spill] sm:$0xff] }
 0x4b8   :  { %v4944_v24 = vpop.permute.xlu1 %4943  ;;  %v4755_v17 = vadd.f32 %v10248_v63, %v3522_v1  ;;  %v3533_v1 = vadd.f32 %v11691_v8, %v11690_v45 }
 0x4b9   :  { %5253 = vst.msk [vmem:[%s10910_s2 + $0xd8] sm:$0xff] %vm5225_vm2, %v4944_v24  ;;  %v4942_v53 = vpop.permute.xlu0 %4941  ;;  %v4756_v6 = vadd.f32 %v10233_v54, %v3523_v28  ;;  %v11677_v24 = vld [vmem:[#allocation231_spill] sm:$0xff]  ;;  %v11679_v54 = vld [vmem:[#allocation232_spill] sm:$0xff] }
 0x4ba   :  { %5252 = vst.msk [vmem:[%s10910_s2 + $0xd0] sm:$0xff] %vm5225_vm2, %v4942_v53  ;;  %5059 = vrot.lane.b32.xlu1 %v4750_v14, %s6677_s19  ;;  %v3524_v43 = vadd.f32 %v11680_v10, %v11679_v54 }
 0x4bb   :  { %5057 = vrot.lane.b32.xlu0 %v4749_v58, %s6677_s19  ;;  %v11678_v58 = vld [vmem:[#allocation111_spill] sm:$0xff] }
 0x4bc   :  { %v4948_v32 = vpop.permute.xlu1 %4947  ;;  %v3525_v53 = vadd.f32 %v11678_v58, %v11677_v24  ;;  %v4757_v42 = vadd.f32 %v10260_v16, %v3524_v43  ;;  %v11694_v58 = vld [vmem:[#allocation126_spill] sm:$0xff] }
 0x4bd   :  { %5255 = vst.msk [vmem:[%s10910_s2 + $0xe8] sm:$0xff] %vm5225_vm2, %v4948_v32  ;;  %v4946_v55 = vpop.permute.xlu0 %4945 }
 0x4be   :  { %5254 = vst.msk [vmem:[%s10910_s2 + $0xe0] sm:$0xff] %vm5225_vm2, %v4946_v55  ;;  %5063 = vrot.lane.b32.xlu1 %v4752_v37, %s6677_s19  ;;  %v4758_v63 = vadd.f32 %v10269_v51, %v3525_v53  ;;  %v3527_v37 = vadd.f32 %v11681_v60, %v9589_v41  ;;  %v11682_v51 = vld [vmem:[#allocation115_spill] sm:$0xff]  ;;  %v3535_v53 = vadd.f32 %v11694_v58, %v9733_v47  ;;  %v11698_v60 = vld [vmem:[#allocation133_spill] sm:$0xff] }
 0x4bf   :  { %5061 = vrot.lane.b32.xlu0 %v4751_v33, %s6677_s19  ;;  %v3526_v32 = vadd.f32 %v11682_v51, %v9604_v29  ;;  %v11684_v29 = vld [vmem:[#allocation70_spill] sm:$0xff] }
 0x4c0   :  { %v4952_v27 = vpop.permute.xlu1 %4951  ;;  %v4760_v16 = vadd.f32 %v10257_v40, %v3527_v37  ;;  %v11685_v40 = vld [vmem:[#allocation119_spill] sm:$0xff]  ;;  %v3539_v37 = vadd.f32 %v11698_v60, %v9803_v9 }
 0x4c1   :  { %5257 = vst.msk [vmem:[%s10910_s2 + $0xf8] sm:$0xff] %vm5225_vm2, %v4952_v27  ;;  %v4950_v23 = vpop.permute.xlu0 %4949  ;;  %v4759_v55 = vadd.f32 %v10272_v25, %v3526_v32  ;;  %v3528_v57 = vadd.f32 %v11685_v40, %v11684_v29  ;;  %v4762_v25 = vadd.f32 %v10293_v30, %v3529_v22  ;;  %v11688_v30 = vld [vmem:[#allocation72_spill] sm:$0xff]  ;;  %v11704_v40 = vld [vmem:[#allocation22_spill] sm:$0xff] }
 0x4c2   :  { %5256 = vst.msk [vmem:[%s10910_s2 + $0xf0] sm:$0xff] %vm5225_vm2, %v4950_v23  ;;  %5067 = vrot.lane.b32.xlu1 %v4754_v13, %s6677_s19  ;;  %v11687_v13 = vld [vmem:[#allocation121_spill] sm:$0xff] }
 0x4c3   :  { %5065 = vrot.lane.b32.xlu0 %v4753_v36, %s6677_s19  ;;  %v4761_v7 = vadd.f32 %v10284_v38, %v3528_v57  ;;  %v3531_v27 = vadd.f32 %v11687_v13, %v11686_v44  ;;  %v11689_v36 = vld [vmem:[#allocation122_spill] sm:$0xff] }
 0x4c4   :  { %v4956_v15 = vpop.permute.xlu1 %4955  ;;  %v3530_v23 = vadd.f32 %v11689_v36, %v11688_v30  ;;  %v11705_v57 = vld [vmem:[#allocation138_spill] sm:$0xff] }
 0x4c5   :  { %5259 = vst.msk [vmem:[%s10910_s2 + $0x108] sm:$0xff] %vm5225_vm2, %v4956_v15  ;;  %v4954_v14 = vpop.permute.xlu0 %4953  ;;  %v4764_v38 = vadd.f32 %v10281_v18, %v3531_v27  ;;  %v11692_v18 = vld [vmem:[#allocation65_spill] sm:$0xff] }
 0x4c6   :  { %5258 = vst.msk [vmem:[%s10910_s2 + $0x100] sm:$0xff] %vm5225_vm2, %v4954_v14  ;;  %5071 = vrot.lane.b32.xlu1 %v4756_v6, %s6677_s19  ;;  %v4763_v49 = vadd.f32 %v10296_v21, %v3530_v23  ;;  %v11693_v6 = vld [vmem:[#allocation125_spill] sm:$0xff]  ;;  %v4766_v21 = vadd.f32 %v10317_v39, %v3533_v1  ;;  %v11695_v39 = vld [vmem:[#allocation127_spill] sm:$0xff] }
 0x4c7   :  { %5069 = vrot.lane.b32.xlu0 %v4755_v17, %s6677_s19  ;;  %v3532_v15 = vadd.f32 %v11693_v6, %v11692_v18  ;;  %v3534_v54 = vadd.f32 %v11695_v39, %v9748_v31  ;;  %v11697_v31 = vld [vmem:[#allocation131_spill] sm:$0xff] }
 0x4c8   :  { %v4960_v48 = vpop.permute.xlu1 %4959 }
 0x4c9   :  { %5261 = vst.msk [vmem:[%s10910_s2 + $0x118] sm:$0xff] %vm5225_vm2, %v4960_v48  ;;  %v4958_v3 = vpop.permute.xlu0 %4957  ;;  %v4765_v14 = vadd.f32 %v10308_v5, %v3532_v15  ;;  %v4768_v5 = vadd.f32 %v10305_v26, %v3535_v53  ;;  %v4767_v43 = vadd.f32 %v10320_v61, %v3534_v54  ;;  %v3536_v26 = vadd.f32 %v11697_v31, %v9793_v52  ;;  %v11699_v52 = vld [vmem:[#allocation134_spill] sm:$0xff] }
 0x4ca   :  { %5260 = vst.msk [vmem:[%s10910_s2 + $0x110] sm:$0xff] %vm5225_vm2, %v4958_v3  ;;  %5075 = vrot.lane.b32.xlu1 %v4758_v63, %s6677_s19  ;;  %v11696_v63 = vld [vmem:[#allocation129_spill] sm:$0xff] }
 0x4cb   :  { %5073 = vrot.lane.b32.xlu0 %v4757_v42, %s6677_s19  ;;  %v3537_v48 = vadd.f32 %v11696_v63, %v9779_v12  ;;  %v4769_v3 = vadd.f32 %v10332_v0, %v3536_v26  ;;  %v4772_v0 = vadd.f32 %v10329_v4, %v3539_v37  ;;  %v11703_v4 = vld [vmem:[#allocation137_spill] sm:$0xff] }
 0x4cc   :  { %v4964_v33 = vpop.permute.xlu1 %4963 }
 0x4cd   :  { %5263 = vst.msk [vmem:[%s10910_s2 + $0x128] sm:$0xff] %vm5225_vm2, %v4964_v33  ;;  %v4962_v41 = vpop.permute.xlu0 %4961  ;;  %v4770_v61 = vadd.f32 %v10341_v19, %v3537_v48  ;;  %v3538_v19 = vadd.f32 %v11699_v52, %v9817_v50  ;;  %v11701_v33 = vld [vmem:[#allocation135_spill] sm:$0xff] }
 0x4ce   :  { %5262 = vst.msk [vmem:[%s10910_s2 + $0x120] sm:$0xff] %vm5225_vm2, %v4962_v41  ;;  %5079 = vrot.lane.b32.xlu1 %v4760_v16, %s6677_s19  ;;  %v11700_v16 = vld [vmem:[#allocation19_spill] sm:$0xff] }
 0x4cf   :  { %5077 = vrot.lane.b32.xlu0 %v4759_v55, %s6677_s19  ;;  %v4771_v32 = vadd.f32 %v10344_v59, %v3538_v19  ;;  %v3541_v55 = vadd.f32 %v11701_v33, %v11700_v16  ;;  %v11702_v50 = vld [vmem:[#allocation67_spill] sm:$0xff] }
 0x4d0   :  { %v4968_v35 = vpop.permute.xlu1 %4967  ;;  %v3540_v41 = vadd.f32 %v11703_v4, %v11702_v50 }
 0x4d1   :  { %5265 = vst.msk [vmem:[%s10910_s2 + $0x138] sm:$0xff] %vm5225_vm2, %v4968_v35  ;;  %v4966_v34 = vpop.permute.xlu0 %4965  ;;  %v4774_v59 = vadd.f32 %v10365_v20, %v3541_v55  ;;  %v11706_v20 = vld [vmem:[#allocation82_spill] sm:$0xff]  ;;  %v11707_v35 = vld [vmem:[#allocation139_spill] sm:$0xff] }
 0x4d2   :  { %5264 = vst.msk [vmem:[%s10910_s2 + $0x130] sm:$0xff] %vm5225_vm2, %v4966_v34  ;;  %5083 = vrot.lane.b32.xlu1 %v4762_v25, %s6677_s19  ;;  %v4773_v22 = vadd.f32 %v10356_v62, %v3540_v41  ;;  %v3543_v25 = vadd.f32 %v11705_v57, %v11704_v40 }
 0x4d3   :  { %5081 = vrot.lane.b32.xlu0 %v4761_v7, %s6677_s19  ;;  %v3542_v7 = vadd.f32 %v11707_v35, %v11706_v20 }
 0x4d4   :  { %v4972_v11 = vpop.permute.xlu1 %4971  ;;  %v4776_v62 = vadd.f32 %v10353_v56, %v3543_v25 }
 0x4d5   :  { %5267 = vst.msk [vmem:[%s10910_s2 + $0x148] sm:$0xff] %vm5225_vm2, %v4972_v11  ;;  %v4970_v28 = vpop.permute.xlu0 %4969  ;;  %v4775_v44 = vadd.f32 %v10368_v2, %v3542_v7 }
 0x4d6   :  { %5266 = vst.msk [vmem:[%s10910_s2 + $0x140] sm:$0xff] %vm5225_vm2, %v4970_v28  ;;  %5087 = vrot.lane.b32.xlu1 %v4764_v38, %s6677_s19 }
 0x4d7   :  { %5085 = vrot.lane.b32.xlu0 %v4763_v49, %s6677_s19 }
 0x4d8   :  { %v4976_v17 = vpop.permute.xlu1 %4975 }
 0x4d9   :  { %5269 = vst.msk [vmem:[%s10910_s2 + $0x158] sm:$0xff] %vm5225_vm2, %v4976_v17  ;;  %v4974_v24 = vpop.permute.xlu0 %4973 }
 0x4da   :  { %5268 = vst.msk [vmem:[%s10910_s2 + $0x150] sm:$0xff] %vm5225_vm2, %v4974_v24  ;;  %5091 = vrot.lane.b32.xlu1 %v4766_v21, %s6677_s19 }
 0x4db   :  { %5089 = vrot.lane.b32.xlu0 %v4765_v14, %s6677_s19 }
 0x4dc   :  { %v4980_v10 = vpop.permute.xlu1 %4979 }
 0x4dd   :  { %5271 = vst.msk [vmem:[%s10910_s2 + $0x168] sm:$0xff] %vm5225_vm2, %v4980_v10  ;;  %v4978_v47 = vpop.permute.xlu0 %4977 }
 0x4de   :  { %5270 = vst.msk [vmem:[%s10910_s2 + $0x160] sm:$0xff] %vm5225_vm2, %v4978_v47  ;;  %5095 = vrot.lane.b32.xlu1 %v4768_v5, %s6677_s19 }
 0x4df   :  { %5093 = vrot.lane.b32.xlu0 %v4767_v43, %s6677_s19 }
 0x4e0   :  { %v4984_v42 = vpop.permute.xlu1 %4983 }
 0x4e1   :  { %5273 = vst.msk [vmem:[%s10910_s2 + $0x178] sm:$0xff] %vm5225_vm2, %v4984_v42  ;;  %v4982_v12 = vpop.permute.xlu0 %4981 }
 0x4e2   :  { %5272 = vst.msk [vmem:[%s10910_s2 + $0x170] sm:$0xff] %vm5225_vm2, %v4982_v12  ;;  %5099 = vrot.lane.b32.xlu1 %v4770_v61, %s6677_s19 }
 0x4e3   :  { %5097 = vrot.lane.b32.xlu0 %v4769_v3, %s6677_s19 }
 0x4e4   :  { %v4988_v51 = vpop.permute.xlu1 %4987 }
 0x4e5   :  { %5275 = vst.msk [vmem:[%s10910_s2 + $0x188] sm:$0xff] %vm5225_vm2, %v4988_v51  ;;  %v4986_v9 = vpop.permute.xlu0 %4985 }
 0x4e6   :  { %5274 = vst.msk [vmem:[%s10910_s2 + $0x180] sm:$0xff] %vm5225_vm2, %v4986_v9  ;;  %5103 = vrot.lane.b32.xlu1 %v4772_v0, %s6677_s19 }
 0x4e7   :  { %5101 = vrot.lane.b32.xlu0 %v4771_v32, %s6677_s19 }
 0x4e8   :  { %v4992_v46 = vpop.permute.xlu1 %4991 }
 0x4e9   :  { %5277 = vst.msk [vmem:[%s10910_s2 + $0x198] sm:$0xff] %vm5225_vm2, %v4992_v46  ;;  %v4990_v29 = vpop.permute.xlu0 %4989 }
 0x4ea   :  { %5276 = vst.msk [vmem:[%s10910_s2 + $0x190] sm:$0xff] %vm5225_vm2, %v4990_v29  ;;  %5107 = vrot.lane.b32.xlu1 %v4774_v59, %s6677_s19 }
 0x4eb   :  { %5105 = vrot.lane.b32.xlu0 %v4773_v22, %s6677_s19 }
 0x4ec   :  { %v4996_v34 = vpop.permute.xlu1 %4995 }
 0x4ed   :  { %5279 = vst.msk [vmem:[%s10910_s2 + $0x1a8] sm:$0xff] %vm5225_vm2, %v4996_v34  ;;  %v4994_v13 = vpop.permute.xlu0 %4993 }
 0x4ee   :  { %5278 = vst.msk [vmem:[%s10910_s2 + $0x1a0] sm:$0xff] %vm5225_vm2, %v4994_v13  ;;  %5111 = vrot.lane.b32.xlu1 %v4776_v62, %s6677_s19 }
 0x4ef   :  { %5109 = vrot.lane.b32.xlu0 %v4775_v44, %s6677_s19 }
 0x4f0   :  { %v5000_v27 = vpop.permute.xlu1 %4999 }
 0x4f1   :  { %5281 = vst.msk [vmem:[%s10910_s2 + $0x1b8] sm:$0xff] %vm5225_vm2, %v5000_v27  ;;  %v4998_v56 = vpop.permute.xlu0 %4997 }
 0x4f2   :  { %5280 = vst.msk [vmem:[%s10910_s2 + $0x1b0] sm:$0xff] %vm5225_vm2, %v4998_v56 }
 0x4f4   :  { %v5004_v2 = vpop.permute.xlu1 %5003 }
 0x4f5   :  { %5283 = vst.msk [vmem:[%s10910_s2 + $0x1c8] sm:$0xff] %vm5225_vm2, %v5004_v2  ;;  %v5002_v30 = vpop.permute.xlu0 %5001 }
 0x4f6   :  { %5282 = vst.msk [vmem:[%s10910_s2 + $0x1c0] sm:$0xff] %vm5225_vm2, %v5002_v30 }
 0x4f8   :  { %v5008_v36 = vpop.permute.xlu1 %5007 }
 0x4f9   :  { %5285 = vst.msk [vmem:[%s10910_s2 + $0x1d8] sm:$0xff] %vm5225_vm2, %v5008_v36  ;;  %v5006_v23 = vpop.permute.xlu0 %5005 }
 0x4fa   :  { %5284 = vst.msk [vmem:[%s10910_s2 + $0x1d0] sm:$0xff] %vm5225_vm2, %v5006_v23 }
 0x4fc   :  { %v5012_v38 = vpop.permute.xlu1 %5011 }
 0x4fd   :  { %5287 = vst.msk [vmem:[%s10910_s2 + $0x1e8] sm:$0xff] %vm5225_vm2, %v5012_v38  ;;  %v5010_v11 = vpop.permute.xlu0 %5009 }
 0x4fe   :  { %5286 = vst.msk [vmem:[%s10910_s2 + $0x1e0] sm:$0xff] %vm5225_vm2, %v5010_v11 }
 0x500   :  { %v5016_v49 = vpop.permute.xlu1 %5015 }
 0x501   :  { %5289 = vst.msk [vmem:[%s10910_s2 + $0x1f8] sm:$0xff] %vm5225_vm2, %v5016_v49  ;;  %v5014_v28 = vpop.permute.xlu0 %5013 }
 0x502   :  { %5288 = vst.msk [vmem:[%s10910_s2 + $0x1f0] sm:$0xff] %vm5225_vm2, %v5014_v28 }
 0x504   :  { %v5020_v45 = vpop.permute.xlu1 %5019 }
 0x505   :  { %5291 = vst.msk [vmem:[%s10910_s2 + $0x208] sm:$0xff] %vm5225_vm2, %v5020_v45  ;;  %v5018_v8 = vpop.permute.xlu0 %5017 }
 0x506   :  { %5290 = vst.msk [vmem:[%s10910_s2 + $0x200] sm:$0xff] %vm5225_vm2, %v5018_v8 }
 0x508   :  { %v5024_v1 = vpop.permute.xlu1 %5023 }
 0x509   :  { %5293 = vst.msk [vmem:[%s10910_s2 + $0x218] sm:$0xff] %vm5225_vm2, %v5024_v1  ;;  %v5022_v18 = vpop.permute.xlu0 %5021 }
 0x50a   :  { %5292 = vst.msk [vmem:[%s10910_s2 + $0x210] sm:$0xff] %vm5225_vm2, %v5022_v18 }
 0x50c   :  { %v5028_v6 = vpop.permute.xlu1 %5027 }
 0x50d   :  { %5295 = vst.msk [vmem:[%s10910_s2 + $0x228] sm:$0xff] %vm5225_vm2, %v5028_v6  ;;  %v5026_v15 = vpop.permute.xlu0 %5025 }
 0x50e   :  { %5294 = vst.msk [vmem:[%s10910_s2 + $0x220] sm:$0xff] %vm5225_vm2, %v5026_v15 }
 0x510   :  { %v5032_v21 = vpop.permute.xlu1 %5031 }
 0x511   :  { %5297 = vst.msk [vmem:[%s10910_s2 + $0x238] sm:$0xff] %vm5225_vm2, %v5032_v21  ;;  %v5030_v17 = vpop.permute.xlu0 %5029 }
 0x512   :  { %5296 = vst.msk [vmem:[%s10910_s2 + $0x230] sm:$0xff] %vm5225_vm2, %v5030_v17 }
 0x514   :  { %v5036_v14 = vpop.permute.xlu1 %5035 }
 0x515   :  { %5299 = vst.msk [vmem:[%s10910_s2 + $0x248] sm:$0xff] %vm5225_vm2, %v5036_v14  ;;  %v5034_v24 = vpop.permute.xlu0 %5033 }
 0x516   :  { %5298 = vst.msk [vmem:[%s10910_s2 + $0x240] sm:$0xff] %vm5225_vm2, %v5034_v24 }
 0x518   :  { %v5040_v58 = vpop.permute.xlu1 %5039 }
 0x519   :  { %5301 = vst.msk [vmem:[%s10910_s2 + $0x258] sm:$0xff] %vm5225_vm2, %v5040_v58  ;;  %v5038_v53 = vpop.permute.xlu0 %5037 }
 0x51a   :  { %5300 = vst.msk [vmem:[%s10910_s2 + $0x250] sm:$0xff] %vm5225_vm2, %v5038_v53 }
 0x51c   :  { %v5044_v39 = vpop.permute.xlu1 %5043 }
 0x51d   :  { %5303 = vst.msk [vmem:[%s10910_s2 + $0x268] sm:$0xff] %vm5225_vm2, %v5044_v39  ;;  %v5042_v54 = vpop.permute.xlu0 %5041 }
 0x51e   :  { %5302 = vst.msk [vmem:[%s10910_s2 + $0x260] sm:$0xff] %vm5225_vm2, %v5042_v54 }
 0x520   :  { %v5048_v5 = vpop.permute.xlu1 %5047 }
 0x521   :  { %5305 = vst.msk [vmem:[%s10910_s2 + $0x278] sm:$0xff] %vm5225_vm2, %v5048_v5  ;;  %v5046_v10 = vpop.permute.xlu0 %5045 }
 0x522   :  { %5304 = vst.msk [vmem:[%s10910_s2 + $0x270] sm:$0xff] %vm5225_vm2, %v5046_v10 }
 0x524   :  { %v5052_v43 = vpop.permute.xlu1 %5051 }
 0x525   :  { %5307 = vst.msk [vmem:[%s10910_s2 + $0x288] sm:$0xff] %vm5225_vm2, %v5052_v43  ;;  %v5050_v47 = vpop.permute.xlu0 %5049 }
 0x526   :  { %5306 = vst.msk [vmem:[%s10910_s2 + $0x280] sm:$0xff] %vm5225_vm2, %v5050_v47 }
 0x528   :  { %v5056_v63 = vpop.permute.xlu1 %5055 }
 0x529   :  { %5309 = vst.msk [vmem:[%s10910_s2 + $0x298] sm:$0xff] %vm5225_vm2, %v5056_v63  ;;  %v5054_v48 = vpop.permute.xlu0 %5053 }
 0x52a   :  { %5308 = vst.msk [vmem:[%s10910_s2 + $0x290] sm:$0xff] %vm5225_vm2, %v5054_v48 }
 0x52c   :  { %v5060_v31 = vpop.permute.xlu1 %5059 }
 0x52d   :  { %5311 = vst.msk [vmem:[%s10910_s2 + $0x2a8] sm:$0xff] %vm5225_vm2, %v5060_v31  ;;  %v5058_v26 = vpop.permute.xlu0 %5057 }
 0x52e   :  { %5310 = vst.msk [vmem:[%s10910_s2 + $0x2a0] sm:$0xff] %vm5225_vm2, %v5058_v26 }
 0x530   :  { %v5064_v61 = vpop.permute.xlu1 %5063 }
 0x531   :  { %5313 = vst.msk [vmem:[%s10910_s2 + $0x2b8] sm:$0xff] %vm5225_vm2, %v5064_v61  ;;  %v5062_v42 = vpop.permute.xlu0 %5061 }
 0x532   :  { %5312 = vst.msk [vmem:[%s10910_s2 + $0x2b0] sm:$0xff] %vm5225_vm2, %v5062_v42 }
 0x534   :  { %v5068_v3 = vpop.permute.xlu1 %5067 }
 0x535   :  { %5315 = vst.msk [vmem:[%s10910_s2 + $0x2c8] sm:$0xff] %vm5225_vm2, %v5068_v3  ;;  %v5066_v12 = vpop.permute.xlu0 %5065 }
 0x536   :  { %5314 = vst.msk [vmem:[%s10910_s2 + $0x2c0] sm:$0xff] %vm5225_vm2, %v5066_v12 }
 0x538   :  { %v5072_v60 = vpop.permute.xlu1 %5071 }
 0x539   :  { %5317 = vst.msk [vmem:[%s10910_s2 + $0x2d8] sm:$0xff] %vm5225_vm2, %v5072_v60  ;;  %v5070_v37 = vpop.permute.xlu0 %5069 }
 0x53a   :  { %5316 = vst.msk [vmem:[%s10910_s2 + $0x2d0] sm:$0xff] %vm5225_vm2, %v5070_v37 }
 0x53c   :  { %v5076_v52 = vpop.permute.xlu1 %5075 }
 0x53d   :  { %5319 = vst.msk [vmem:[%s10910_s2 + $0x2e8] sm:$0xff] %vm5225_vm2, %v5076_v52  ;;  %v5074_v19 = vpop.permute.xlu0 %5073 }
 0x53e   :  { %5318 = vst.msk [vmem:[%s10910_s2 + $0x2e0] sm:$0xff] %vm5225_vm2, %v5074_v19 }
 0x540   :  { %v5080_v0 = vpop.permute.xlu1 %5079 }
 0x541   :  { %5321 = vst.msk [vmem:[%s10910_s2 + $0x2f8] sm:$0xff] %vm5225_vm2, %v5080_v0  ;;  %v5078_v51 = vpop.permute.xlu0 %5077 }
 0x542   :  { %5320 = vst.msk [vmem:[%s10910_s2 + $0x2f0] sm:$0xff] %vm5225_vm2, %v5078_v51 }
 0x544   :  { %v5084_v32 = vpop.permute.xlu1 %5083 }
 0x545   :  { %5323 = vst.msk [vmem:[%s10910_s2 + $0x308] sm:$0xff] %vm5225_vm2, %v5084_v32  ;;  %v5082_v9 = vpop.permute.xlu0 %5081 }
 0x546   :  { %5322 = vst.msk [vmem:[%s10910_s2 + $0x300] sm:$0xff] %vm5225_vm2, %v5082_v9 }
 0x548   :  { %v5088_v16 = vpop.permute.xlu1 %5087 }
 0x549   :  { %5325 = vst.msk [vmem:[%s10910_s2 + $0x318] sm:$0xff] %vm5225_vm2, %v5088_v16  ;;  %v5086_v33 = vpop.permute.xlu0 %5085 }
 0x54a   :  { %5324 = vst.msk [vmem:[%s10910_s2 + $0x310] sm:$0xff] %vm5225_vm2, %v5086_v33 }
 0x54c   :  { %v5092_v55 = vpop.permute.xlu1 %5091 }
 0x54d   :  { %5327 = vst.msk [vmem:[%s10910_s2 + $0x328] sm:$0xff] %vm5225_vm2, %v5092_v55  ;;  %v5090_v50 = vpop.permute.xlu0 %5089 }
 0x54e   :  { %5326 = vst.msk [vmem:[%s10910_s2 + $0x320] sm:$0xff] %vm5225_vm2, %v5090_v50 }
 0x550   :  { %v5096_v4 = vpop.permute.xlu1 %5095 }
 0x551   :  { %5329 = vst.msk [vmem:[%s10910_s2 + $0x338] sm:$0xff] %vm5225_vm2, %v5096_v4  ;;  %v5094_v41 = vpop.permute.xlu0 %5093 }
 0x552   :  { %5328 = vst.msk [vmem:[%s10910_s2 + $0x330] sm:$0xff] %vm5225_vm2, %v5094_v41 }
 0x554   :  { %v5100_v59 = vpop.permute.xlu1 %5099 }
 0x555   :  { %5331 = vst.msk [vmem:[%s10910_s2 + $0x348] sm:$0xff] %vm5225_vm2, %v5100_v59  ;;  %v5098_v46 = vpop.permute.xlu0 %5097 }
 0x556   :  { %5330 = vst.msk [vmem:[%s10910_s2 + $0x340] sm:$0xff] %vm5225_vm2, %v5098_v46 }
 0x558   :  { %v5104_v22 = vpop.permute.xlu1 %5103 }
 0x559   :  { %5333 = vst.msk [vmem:[%s10910_s2 + $0x358] sm:$0xff] %vm5225_vm2, %v5104_v22  ;;  %v5102_v29 = vpop.permute.xlu0 %5101 }
 0x55a   :  { %5332 = vst.msk [vmem:[%s10910_s2 + $0x350] sm:$0xff] %vm5225_vm2, %v5102_v29 }
 0x55c   :  { %v5108_v40 = vpop.permute.xlu1 %5107 }
 0x55d   :  { %5335 = vst.msk [vmem:[%s10910_s2 + $0x368] sm:$0xff] %vm5225_vm2, %v5108_v40  ;;  %v5106_v57 = vpop.permute.xlu0 %5105 }
 0x55e   :  { %5334 = vst.msk [vmem:[%s10910_s2 + $0x360] sm:$0xff] %vm5225_vm2, %v5106_v57 }
 0x560   :  { %v5112_v25 = vpop.permute.xlu1 %5111 }
 0x561   :  { %5337 = vst.msk [vmem:[%s10910_s2 + $0x378] sm:$0xff] %vm5225_vm2, %v5112_v25  ;;  %v5110_v20 = vpop.permute.xlu0 %5109 }
 0x562   :  { %5336 = vst.msk [vmem:[%s10910_s2 + $0x370] sm:$0xff] %vm5225_vm2, %v5110_v20 }

</bundles_post_ra>
